<compile_context>
chip_gen: v7x
topology: tpu7x:2x2x1
jax: 0.10.0
libtpu: 0.0.40
codegen_flags: <defaults>
</compile_context>

<pallas_src>
import functools

import numpy as np
import jax
import jax.numpy as jnp
from jax.experimental import pallas as pl
from jax.experimental.pallas import tpu as pltpu

BN_EPS = 1e-5
LRELU_SLOPE = 0.2
K, S, P = 4, 2, 1          # conv kernel / stride / pad (both convs)
C1P = 128                  # conv1 output channels padded 64 -> 128 (lane-dense)
C2 = 128                   # conv2 output channels
FC_HID = 1024
NPAD = 128                 # FC2 output lanes (output_dim padded to 128)


# ----------------------------- kernel helpers ------------------------------

def _lrelu(x):
    return jnp.where(x > 0, x, LRELU_SLOPE * x)


def _batchnorm_rows(y, gamma, beta):
    """Training-mode BN over rows (axis 0), per column.  Two-pass centered
    (biased) variance in f32, eps=1e-5."""
    inv_n = 1.0 / y.shape[0]
    mean = jnp.sum(y, axis=0, keepdims=True) * inv_n
    yc = y - mean
    var = jnp.sum(yc * yc, axis=0, keepdims=True) * inv_n
    return yc * jax.lax.rsqrt(var + BN_EPS) * gamma + beta


# ------------------------------ fused kernel -------------------------------

def _fused_disc_kernel(cols1_ref, w1_ref, b1_ref,
                       sel_ref, w2_ref, b2_ref, g2_ref, be2_ref,
                       w3_ref, b3_ref, g3_ref, be3_ref,
                       w4_ref, b4_ref,
                       o_ref, y2_ref, acc3_ref,
                       *, batch, n_spatial2, tk):
    k = pl.program_id(0)
    n_k = y2_ref.shape[0]                       # static FC1 K-tile count

    # ---- phase 0 (k == 0): conv1 -> conv2 -> BN2d -> LeakyReLU -------------
    # Runs while the pipeline streams the next w3 tile in the background.
    @pl.when(k == 0)
    def _conv_phase():
        hw1 = cols1_ref.shape[0] // batch       # H1*W1 rows per image

        # conv1: im2col matmul (output channels lane-padded to 128) + lrelu.
        y1 = jnp.dot(cols1_ref[...], w1_ref[...],
                     preferred_element_type=jnp.float32)
        y1 = _lrelu(y1 + b1_ref[...]).astype(jnp.bfloat16)   # (B*H1*W1, C1P)

        # conv2: one stacked 0/1-selector matmul per image (exact row gather,
        # zero rows for the padding halo; selector is batch-independent),
        # lane-concat of the K*K patch blocks, then ONE matmul against the
        # flattened conv2 weight (K-accumulation happens inside the MXU).
        patch_rows = []
        for b in range(batch):                  # static, tiny batch
            y1_b = y1[b * hw1:(b + 1) * hw1, :]
            pb = jnp.dot(sel_ref[...], y1_b,
                         preferred_element_type=jnp.float32)
            pb = pb.astype(jnp.bfloat16)        # lossless: 0/1 gather of bf16
            patch_rows.append(jnp.concatenate(
                [pb[j * n_spatial2:(j + 1) * n_spatial2, :]
                 for j in range(K * K)], axis=1))            # (n_sp2, K*K*C1P)
        patches = jnp.concatenate(patch_rows, axis=0)        # (B*n_sp2, K*K*C1P)

        y2 = jnp.dot(patches, w2_ref[...], preferred_element_type=jnp.float32)
        y2 = _lrelu(_batchnorm_rows(y2 + b2_ref[...],
                                    g2_ref[...], be2_ref[...]))  # (B*n_sp2, C2)

        # Flatten each image's (spatial, channel) features into lanes and
        # stage them as (n_k, B, TK) tiles matching the w3 BlockSpec.
        for b in range(batch):
            row_b = jnp.concatenate(
                [y2[b * n_spatial2 + p_: b * n_spatial2 + p_ + 1, :]
                 for p_ in range(n_spatial2)], axis=1)       # (1, feat) f32
            for t in range(n_k):
                y2_ref[t, b:b + 1, :] = row_b[:, t * tk:(t + 1) * tk]

        acc3_ref[...] = jnp.zeros_like(acc3_ref)

    # ---- every step: one FC1 K-tile (overlaps the next w3 tile's DMA) ------
    acc3_ref[...] += jnp.dot(y2_ref[k].astype(jnp.bfloat16), w3_ref[...],
                             preferred_element_type=jnp.float32)

    # ---- last step: BN1d -> LeakyReLU -> FC2 (output lane-padded to 128) ---
    @pl.when(k == pl.num_programs(0) - 1)
    def _head():
        y3 = _lrelu(_batchnorm_rows(acc3_ref[...] + b3_ref[...],
                                    g3_ref[...], be3_ref[...]))
        o_ref[...] = jnp.dot(y3.astype(jnp.bfloat16), w4_ref[...],
                             preferred_element_type=jnp.float32) + b4_ref[...]


# ------------------------------- host glue ---------------------------------

def _im2col_conv1(x_nhwc):
    """im2col for conv1 only (cheap: Cin=1; fused by XLA inside the jit).
    Rows ordered (b, h1, w1); columns ordered (ci, kh, kw) to match PyTorch's
    weight.reshape(Cout, Cin*K*K)."""
    B, H, W, C = x_nhwc.shape
    xp = jnp.pad(x_nhwc, ((0, 0), (P, P), (P, P), (0, 0)))
    Ho = (H + 2 * P - K) // S + 1
    Wo = (W + 2 * P - K) // S + 1
    cols = []
    for kh in range(K):
        for kw in range(K):
            cols.append(xp[:, kh:kh + S * Ho:S, kw:kw + S * Wo:S, :])
    patches = jnp.stack(cols, axis=3)                  # (B,Ho,Wo,K*K,C)
    patches = jnp.transpose(patches, (0, 1, 2, 4, 3))  # (B,Ho,Wo,C,K*K)
    return patches.reshape(B * Ho * Wo, C * K * K), Ho, Wo


@functools.lru_cache(maxsize=None)
def _conv2_selectors(H1, W1):
    """Batch-independent 0/1 selection matrix implementing conv2's stride-2,
    pad-1 patch gather as one matmul per image.  Rows ordered (kernel offset
    j, output position p); columns index the (h1, w1) rows of one image."""
    Ho = (H1 + 2 * P - K) // S + 1
    Wo = (W1 + 2 * P - K) // S + 1
    sel = np.zeros((K * K * Ho * Wo, H1 * W1), np.float32)
    for kh in range(K):
        for kw in range(K):
            j = kh * K + kw
            for ho in range(Ho):
                for wo in range(Wo):
                    h1 = S * ho + kh - P
                    w1 = S * wo + kw - P
                    if 0 <= h1 < H1 and 0 <= w1 < W1:
                        sel[j * Ho * Wo + ho * Wo + wo, h1 * W1 + w1] = 1.0
    return sel


def init_params(key, input_dim=1, output_dim=1, input_size=16):
    """Synthetic GAN-style init (N(0,0.02) conv/linear weights, N(1,0.02) BN
    scale, zero biases), generated in PyTorch layouts and relaid out ONCE into
    kernel-friendly layouts (lane padding, (h,w,c) w3 row order, bf16)."""
    ks = jax.random.split(key, 6)
    H2 = W2 = input_size // 4
    n_sp2 = H2 * W2
    feat = C2 * n_sp2

    w1_pt = jax.random.normal(ks[0], (64, input_dim, K, K), jnp.float32) * 0.02
    w2_pt = jax.random.normal(ks[1], (128, 64, K, K), jnp.float32) * 0.02
    w3_pt = jax.random.normal(ks[3], (FC_HID, feat), jnp.float32) * 0.02
    w4_pt = jax.random.normal(ks[5], (output_dim, FC_HID), jnp.float32) * 0.02
    g2 = 1.0 + jax.random.normal(ks[2], (128,), jnp.float32) * 0.02
    g3 = 1.0 + jax.random.normal(ks[4], (FC_HID,), jnp.float32) * 0.02

    # conv1: (Cout,Cin,kh,kw) -> (Cin*K*K, Cout); zero-pad Cout 64 -> 128.
    w1 = jnp.transpose(w1_pt, (1, 2, 3, 0)).reshape(input_dim * K * K, 64)
    w1 = jnp.pad(w1, ((0, 0), (0, C1P - 64))).astype(jnp.bfloat16)
    # conv2: (Cout,Cin,kh,kw) -> flat (K*K*C1P, Cout); zero rows for the
    # padded conv1 channels so they contribute nothing.
    w2 = jnp.transpose(w2_pt, (2, 3, 1, 0)).reshape(K * K, 64, 128)
    w2 = jnp.pad(w2, ((0, 0), (0, C1P - 64), (0, 0)))
    w2 = w2.reshape(K * K * C1P, 128).astype(jnp.bfloat16)
    # fc1: transpose to (feat, 1024); permute rows from PyTorch NCHW-flatten
    # (c,h,w) order to the kernel's (h,w,c) order — one-time weight relayout
    # instead of a per-forward activation transpose.
    perm = (np.arange(n_sp2)[:, None]
            + np.arange(C2)[None, :] * n_sp2).reshape(-1)
    w3 = jnp.transpose(w3_pt)[perm].astype(jnp.bfloat16)
    # fc2: transpose; zero-pad the output dim to 128 lanes (lane-dense store).
    w4 = jnp.pad(jnp.transpose(w4_pt),
                 ((0, 0), (0, NPAD - output_dim))).astype(jnp.bfloat16)

    return {
        "w1": w1, "b1": jnp.zeros((1, C1P), jnp.float32),
        "w2": w2, "b2": jnp.zeros((1, C2), jnp.float32),
        "g2": g2.reshape(1, C2), "be2": jnp.zeros((1, C2), jnp.float32),
        "w3": w3, "b3": jnp.zeros((1, FC_HID), jnp.float32),
        "g3": g3.reshape(1, FC_HID), "be3": jnp.zeros((1, FC_HID), jnp.float32),
        "w4": w4, "b4": jnp.zeros((1, NPAD), jnp.float32),
    }


@functools.partial(jax.jit, static_argnames=("output_dim",))
def discriminator_forward(params, x_nchw, output_dim=1):
    """x_nchw: (B, input_dim, S, S) float32.  Returns (B, output_dim) f32."""
    B = x_nchw.shape[0]
    x = jnp.transpose(x_nchw, (0, 2, 3, 1))            # NCHW -> NHWC
    cols1, H1, W1 = _im2col_conv1(x)                   # (B*H1*W1, Cin*K*K)
    cols1 = cols1.astype(jnp.bfloat16)
    sel = jnp.asarray(_conv2_selectors(H1, W1), jnp.bfloat16)

    H2 = (H1 + 2 * P - K) // S + 1
    W2 = (W1 + 2 * P - K) // S + 1
    n_sp2 = H2 * W2
    feat = n_sp2 * C2                                  # == params["w3"].shape[0]
    tk = 512 if feat % 512 == 0 else C2                # w3 K-tile rows (1 MiB)
    n_k = feat // tk

    kernel = functools.partial(_fused_disc_kernel, batch=B,
                               n_spatial2=n_sp2, tk=tk)

    def full(shape):                                   # resident (un-streamed)
        return pl.BlockSpec(shape, lambda k, _s=shape: (0,) * len(_s))

    grid_spec = pltpu.PrefetchScalarGridSpec(
        num_scalar_prefetch=0,
        grid=(n_k,),
        in_specs=[
            full(cols1.shape), full(params["w1"].shape), full(params["b1"].shape),
            full(sel.shape), full(params["w2"].shape), full(params["b2"].shape),
            full(params["g2"].shape), full(params["be2"].shape),
            pl.BlockSpec((tk, FC_HID), lambda k: (k, 0)),   # streamed w3 tiles
            full(params["b3"].shape), full(params["g3"].shape),
            full(params["be3"].shape),
            full(params["w4"].shape), full(params["b4"].shape),
        ],
        out_specs=pl.BlockSpec((B, NPAD), lambda k: (0, 0)),
        scratch_shapes=[pltpu.VMEM((n_k, B, tk), jnp.float32),   # staged FC1 input
                        pltpu.VMEM((B, FC_HID), jnp.float32)],   # FC1 accumulator
    )
    out = pl.pallas_call(
        kernel,
        out_shape=jax.ShapeDtypeStruct((B, NPAD), jnp.float32),
        grid_spec=grid_spec,
        compiler_params=pltpu.CompilerParams(
            dimension_semantics=("arbitrary",),
            vmem_limit_bytes=12 * 1024 * 1024),
    )(cols1, params["w1"], params["b1"],
      sel, params["w2"], params["b2"], params["g2"], params["be2"],
      params["w3"], params["b3"], params["g3"], params["be3"],
      params["w4"], params["b4"])
    return out[:, :output_dim]


if __name__ == "__main__":
    INPUT_DIM, OUTPUT_DIM, INPUT_SIZE, BATCH = 1, 1, 16, 2

    key = jax.random.PRNGKey(0)
    k_params, k_x = jax.random.split(key)
    params = init_params(k_params, INPUT_DIM, OUTPUT_DIM, INPUT_SIZE)
    x = jax.random.normal(k_x, (BATCH, INPUT_DIM, INPUT_SIZE, INPUT_SIZE),
                          jnp.float32)

    out = discriminator_forward(params, x, output_dim=OUTPUT_DIM)
    out = jax.block_until_ready(out)
    assert out.shape == (BATCH, OUTPUT_DIM) and out.dtype == jnp.float32
    assert bool(jnp.all(jnp.isfinite(out)))
    print("KERNEL_OK")
</pallas_src>

<mosaic_0001>
module attributes {stable_mosaic.version = 11 : i64} {
  func.func @_fused_disc_kernel(%arg0: i32, %arg1: memref<128x16xbf16, #tpu.memory_space<vmem>>, %arg2: memref<16x128xbf16, #tpu.memory_space<vmem>>, %arg3: memref<1x128xf32, #tpu.memory_space<vmem>>, %arg4: memref<256x64xbf16, #tpu.memory_space<vmem>>, %arg5: memref<2048x128xbf16, #tpu.memory_space<vmem>>, %arg6: memref<1x128xf32, #tpu.memory_space<vmem>>, %arg7: memref<1x128xf32, #tpu.memory_space<vmem>>, %arg8: memref<1x128xf32, #tpu.memory_space<vmem>>, %arg9: memref<512x1024xbf16, #tpu.memory_space<vmem>>, %arg10: memref<1x1024xf32, #tpu.memory_space<vmem>>, %arg11: memref<1x1024xf32, #tpu.memory_space<vmem>>, %arg12: memref<1x1024xf32, #tpu.memory_space<vmem>>, %arg13: memref<1024x128xbf16, #tpu.memory_space<vmem>>, %arg14: memref<1x128xf32, #tpu.memory_space<vmem>>, %arg15: memref<2x128xf32, #tpu.memory_space<vmem>>, %arg16: memref<4x2x512xf32, #tpu.memory_space<vmem>>, %arg17: memref<2x1024xf32, #tpu.memory_space<vmem>>) attributes {dimension_semantics = [#tpu.dimension_semantics<arbitrary>], iteration_bounds = array<i64: 4>, scalar_prefetch = 0 : i64, scratch_operands = 2 : i64, tpu.core_type = #tpu.core_type<tc>, window_params = [{pipeline_mode = #tpu.pipeline_mode<synchronous>, transform_indices = @transform_0, window_bounds = array<i64: 128, 16>}, {pipeline_mode = #tpu.pipeline_mode<synchronous>, transform_indices = @transform_1, window_bounds = array<i64: 16, 128>}, {pipeline_mode = #tpu.pipeline_mode<synchronous>, transform_indices = @transform_2, window_bounds = array<i64: 1, 128>}, {pipeline_mode = #tpu.pipeline_mode<synchronous>, transform_indices = @transform_3, window_bounds = array<i64: 256, 64>}, {pipeline_mode = #tpu.pipeline_mode<synchronous>, transform_indices = @transform_4, window_bounds = array<i64: 2048, 128>}, {pipeline_mode = #tpu.pipeline_mode<synchronous>, transform_indices = @transform_5, window_bounds = array<i64: 1, 128>}, {pipeline_mode = #tpu.pipeline_mode<synchronous>, transform_indices = @transform_6, window_bounds = array<i64: 1, 128>}, {pipeline_mode = #tpu.pipeline_mode<synchronous>, transform_indices = @transform_7, window_bounds = array<i64: 1, 128>}, {transform_indices = @transform_8, window_bounds = array<i64: 512, 1024>}, {pipeline_mode = #tpu.pipeline_mode<synchronous>, transform_indices = @transform_9, window_bounds = array<i64: 1, 1024>}, {pipeline_mode = #tpu.pipeline_mode<synchronous>, transform_indices = @transform_10, window_bounds = array<i64: 1, 1024>}, {pipeline_mode = #tpu.pipeline_mode<synchronous>, transform_indices = @transform_11, window_bounds = array<i64: 1, 1024>}, {pipeline_mode = #tpu.pipeline_mode<synchronous>, transform_indices = @transform_12, window_bounds = array<i64: 1024, 128>}, {pipeline_mode = #tpu.pipeline_mode<synchronous>, transform_indices = @transform_13, window_bounds = array<i64: 1, 128>}, {pipeline_mode = #tpu.pipeline_mode<synchronous>, transform_indices = @transform_14, window_bounds = array<i64: 2, 128>}]} {
    %c0_i32 = arith.constant 0 : i32
    %0 = arith.cmpi eq, %arg0, %c0_i32 : i32
    %1 = arith.extui %0 : i1 to i32
    %c0_i32_0 = arith.constant 0 : i32
    %2 = arith.cmpi ne, %1, %c0_i32_0 : i32
    scf.if %2 {
      %c0_9 = arith.constant 0 : index
      %c0_10 = arith.constant 0 : index
      %15 = vector.load %arg1[%c0_9, %c0_10] : memref<128x16xbf16, #tpu.memory_space<vmem>>, vector<128x16xbf16>
      %c0_11 = arith.constant 0 : index
      %c0_12 = arith.constant 0 : index
      %16 = vector.load %arg2[%c0_11, %c0_12] : memref<16x128xbf16, #tpu.memory_space<vmem>>, vector<16x128xbf16>
      %cst_13 = arith.constant dense<0.000000e+00> : vector<128x128xf32>
      %17 = tpu.matmul %15, %16, %cst_13 {dimension_numbers = #tpu.dot_dimension_numbers<[1], [0], [0], [1], [0, 0, 1, 1], [], []>} : vector<128x16xbf16>, vector<16x128xbf16>, vector<128x128xf32> -> vector<128x128xf32>
      %c0_14 = arith.constant 0 : index
      %c0_15 = arith.constant 0 : index
      %18 = vector.load %arg3[%c0_14, %c0_15] : memref<1x128xf32, #tpu.memory_space<vmem>>, vector<1x128xf32>
      %19 = vector.broadcast %18 : vector<1x128xf32> to vector<128x128xf32>
      %20 = arith.addf %17, %19 : vector<128x128xf32>
      %cst_16 = arith.constant 0.000000e+00 : f32
      %21 = vector.broadcast %cst_16 : f32 to vector<128x128xf32>
      %22 = arith.cmpf ogt, %20, %21 : vector<128x128xf32>
      %cst_17 = arith.constant 2.000000e-01 : f32
      %23 = vector.broadcast %cst_17 : f32 to vector<128x128xf32>
      %24 = arith.mulf %23, %20 : vector<128x128xf32>
      %25 = arith.select %22, %20, %24 : vector<128x128xi1>, vector<128x128xf32>
      %26 = arith.truncf %25 : vector<128x128xf32> to vector<128x128xbf16>
      %27 = vector.extract_strided_slice %26 {offsets = [0, 0], sizes = [64, 128], strides = [1, 1]} : vector<128x128xbf16> to vector<64x128xbf16>
      %c0_18 = arith.constant 0 : index
      %c0_19 = arith.constant 0 : index
      %28 = vector.load %arg4[%c0_18, %c0_19] : memref<256x64xbf16, #tpu.memory_space<vmem>>, vector<256x64xbf16>
      %cst_20 = arith.constant dense<0.000000e+00> : vector<256x128xf32>
      %29 = tpu.matmul %28, %27, %cst_20 {dimension_numbers = #tpu.dot_dimension_numbers<[1], [0], [0], [1], [0, 0, 1, 1], [], []>} : vector<256x64xbf16>, vector<64x128xbf16>, vector<256x128xf32> -> vector<256x128xf32>
      %30 = arith.truncf %29 : vector<256x128xf32> to vector<256x128xbf16>
      %31 = vector.extract_strided_slice %30 {offsets = [0, 0], sizes = [16, 128], strides = [1, 1]} : vector<256x128xbf16> to vector<16x128xbf16>
      %32 = vector.extract_strided_slice %30 {offsets = [16, 0], sizes = [16, 128], strides = [1, 1]} : vector<256x128xbf16> to vector<16x128xbf16>
      %33 = vector.extract_strided_slice %30 {offsets = [32, 0], sizes = [16, 128], strides = [1, 1]} : vector<256x128xbf16> to vector<16x128xbf16>
      %34 = vector.extract_strided_slice %30 {offsets = [48, 0], sizes = [16, 128], strides = [1, 1]} : vector<256x128xbf16> to vector<16x128xbf16>
      %35 = vector.extract_strided_slice %30 {offsets = [64, 0], sizes = [16, 128], strides = [1, 1]} : vector<256x128xbf16> to vector<16x128xbf16>
      %36 = vector.extract_strided_slice %30 {offsets = [80, 0], sizes = [16, 128], strides = [1, 1]} : vector<256x128xbf16> to vector<16x128xbf16>
      %37 = vector.extract_strided_slice %30 {offsets = [96, 0], sizes = [16, 128], strides = [1, 1]} : vector<256x128xbf16> to vector<16x128xbf16>
      %38 = vector.extract_strided_slice %30 {offsets = [112, 0], sizes = [16, 128], strides = [1, 1]} : vector<256x128xbf16> to vector<16x128xbf16>
      %39 = vector.extract_strided_slice %30 {offsets = [128, 0], sizes = [16, 128], strides = [1, 1]} : vector<256x128xbf16> to vector<16x128xbf16>
      %40 = vector.extract_strided_slice %30 {offsets = [144, 0], sizes = [16, 128], strides = [1, 1]} : vector<256x128xbf16> to vector<16x128xbf16>
      %41 = vector.extract_strided_slice %30 {offsets = [160, 0], sizes = [16, 128], strides = [1, 1]} : vector<256x128xbf16> to vector<16x128xbf16>
      %42 = vector.extract_strided_slice %30 {offsets = [176, 0], sizes = [16, 128], strides = [1, 1]} : vector<256x128xbf16> to vector<16x128xbf16>
      %43 = vector.extract_strided_slice %30 {offsets = [192, 0], sizes = [16, 128], strides = [1, 1]} : vector<256x128xbf16> to vector<16x128xbf16>
      %44 = vector.extract_strided_slice %30 {offsets = [208, 0], sizes = [16, 128], strides = [1, 1]} : vector<256x128xbf16> to vector<16x128xbf16>
      %45 = vector.extract_strided_slice %30 {offsets = [224, 0], sizes = [16, 128], strides = [1, 1]} : vector<256x128xbf16> to vector<16x128xbf16>
      %46 = vector.extract_strided_slice %30 {offsets = [240, 0], sizes = [16, 128], strides = [1, 1]} : vector<256x128xbf16> to vector<16x128xbf16>
      %47 = tpu.concatenate %31, %32, %33, %34, %35, %36, %37, %38, %39, %40, %41, %42, %43, %44, %45, %46 in 1 : vector<16x128xbf16>, vector<16x128xbf16>, vector<16x128xbf16>, vector<16x128xbf16>, vector<16x128xbf16>, vector<16x128xbf16>, vector<16x128xbf16>, vector<16x128xbf16>, vector<16x128xbf16>, vector<16x128xbf16>, vector<16x128xbf16>, vector<16x128xbf16>, vector<16x128xbf16>, vector<16x128xbf16>, vector<16x128xbf16>, vector<16x128xbf16> -> vector<16x2048xbf16>
      %48 = vector.extract_strided_slice %26 {offsets = [64, 0], sizes = [64, 128], strides = [1, 1]} : vector<128x128xbf16> to vector<64x128xbf16>
      %c0_21 = arith.constant 0 : index
      %c0_22 = arith.constant 0 : index
      %49 = vector.load %arg4[%c0_21, %c0_22] : memref<256x64xbf16, #tpu.memory_space<vmem>>, vector<256x64xbf16>
      %cst_23 = arith.constant dense<0.000000e+00> : vector<256x128xf32>
      %50 = tpu.matmul %49, %48, %cst_23 {dimension_numbers = #tpu.dot_dimension_numbers<[1], [0], [0], [1], [0, 0, 1, 1], [], []>} : vector<256x64xbf16>, vector<64x128xbf16>, vector<256x128xf32> -> vector<256x128xf32>
      %51 = arith.truncf %50 : vector<256x128xf32> to vector<256x128xbf16>
      %52 = vector.extract_strided_slice %51 {offsets = [0, 0], sizes = [16, 128], strides = [1, 1]} : vector<256x128xbf16> to vector<16x128xbf16>
      %53 = vector.extract_strided_slice %51 {offsets = [16, 0], sizes = [16, 128], strides = [1, 1]} : vector<256x128xbf16> to vector<16x128xbf16>
      %54 = vector.extract_strided_slice %51 {offsets = [32, 0], sizes = [16, 128], strides = [1, 1]} : vector<256x128xbf16> to vector<16x128xbf16>
      %55 = vector.extract_strided_slice %51 {offsets = [48, 0], sizes = [16, 128], strides = [1, 1]} : vector<256x128xbf16> to vector<16x128xbf16>
      %56 = vector.extract_strided_slice %51 {offsets = [64, 0], sizes = [16, 128], strides = [1, 1]} : vector<256x128xbf16> to vector<16x128xbf16>
      %57 = vector.extract_strided_slice %51 {offsets = [80, 0], sizes = [16, 128], strides = [1, 1]} : vector<256x128xbf16> to vector<16x128xbf16>
      %58 = vector.extract_strided_slice %51 {offsets = [96, 0], sizes = [16, 128], strides = [1, 1]} : vector<256x128xbf16> to vector<16x128xbf16>
      %59 = vector.extract_strided_slice %51 {offsets = [112, 0], sizes = [16, 128], strides = [1, 1]} : vector<256x128xbf16> to vector<16x128xbf16>
      %60 = vector.extract_strided_slice %51 {offsets = [128, 0], sizes = [16, 128], strides = [1, 1]} : vector<256x128xbf16> to vector<16x128xbf16>
      %61 = vector.extract_strided_slice %51 {offsets = [144, 0], sizes = [16, 128], strides = [1, 1]} : vector<256x128xbf16> to vector<16x128xbf16>
      %62 = vector.extract_strided_slice %51 {offsets = [160, 0], sizes = [16, 128], strides = [1, 1]} : vector<256x128xbf16> to vector<16x128xbf16>
      %63 = vector.extract_strided_slice %51 {offsets = [176, 0], sizes = [16, 128], strides = [1, 1]} : vector<256x128xbf16> to vector<16x128xbf16>
      %64 = vector.extract_strided_slice %51 {offsets = [192, 0], sizes = [16, 128], strides = [1, 1]} : vector<256x128xbf16> to vector<16x128xbf16>
      %65 = vector.extract_strided_slice %51 {offsets = [208, 0], sizes = [16, 128], strides = [1, 1]} : vector<256x128xbf16> to vector<16x128xbf16>
      %66 = vector.extract_strided_slice %51 {offsets = [224, 0], sizes = [16, 128], strides = [1, 1]} : vector<256x128xbf16> to vector<16x128xbf16>
      %67 = vector.extract_strided_slice %51 {offsets = [240, 0], sizes = [16, 128], strides = [1, 1]} : vector<256x128xbf16> to vector<16x128xbf16>
      %68 = tpu.concatenate %52, %53, %54, %55, %56, %57, %58, %59, %60, %61, %62, %63, %64, %65, %66, %67 in 1 : vector<16x128xbf16>, vector<16x128xbf16>, vector<16x128xbf16>, vector<16x128xbf16>, vector<16x128xbf16>, vector<16x128xbf16>, vector<16x128xbf16>, vector<16x128xbf16>, vector<16x128xbf16>, vector<16x128xbf16>, vector<16x128xbf16>, vector<16x128xbf16>, vector<16x128xbf16>, vector<16x128xbf16>, vector<16x128xbf16>, vector<16x128xbf16> -> vector<16x2048xbf16>
      %69 = tpu.concatenate %47, %68 in 0 : vector<16x2048xbf16>, vector<16x2048xbf16> -> vector<32x2048xbf16>
      %c0_24 = arith.constant 0 : index
      %c0_25 = arith.constant 0 : index
      %70 = vector.load %arg5[%c0_24, %c0_25] : memref<2048x128xbf16, #tpu.memory_space<vmem>>, vector<2048x128xbf16>
      %cst_26 = arith.constant dense<0.000000e+00> : vector<32x128xf32>
      %71 = tpu.matmul %69, %70, %cst_26 {dimension_numbers = #tpu.dot_dimension_numbers<[1], [0], [0], [1], [0, 0, 1, 1], [], []>} : vector<32x2048xbf16>, vector<2048x128xbf16>, vector<32x128xf32> -> vector<32x128xf32>
      %c0_27 = arith.constant 0 : index
      %c0_28 = arith.constant 0 : index
      %72 = vector.load %arg6[%c0_27, %c0_28] : memref<1x128xf32, #tpu.memory_space<vmem>>, vector<1x128xf32>
      %73 = vector.broadcast %72 : vector<1x128xf32> to vector<32x128xf32>
      %74 = arith.addf %71, %73 : vector<32x128xf32>
      %c0_29 = arith.constant 0 : index
      %c0_30 = arith.constant 0 : index
      %75 = vector.load %arg7[%c0_29, %c0_30] : memref<1x128xf32, #tpu.memory_space<vmem>>, vector<1x128xf32>
      %c0_31 = arith.constant 0 : index
      %c0_32 = arith.constant 0 : index
      %76 = vector.load %arg8[%c0_31, %c0_32] : memref<1x128xf32, #tpu.memory_space<vmem>>, vector<1x128xf32>
      %cst_33 = arith.constant dense<0.000000e+00> : vector<128xf32>
      %77 = vector.multi_reduction <add>, %74, %cst_33 [0] : vector<32x128xf32> to vector<128xf32>
      %78 = vector.shape_cast %77 : vector<128xf32> to vector<1x128xf32>
      %cst_34 = arith.constant 3.125000e-02 : f32
      %79 = vector.broadcast %cst_34 : f32 to vector<1x128xf32>
      %80 = arith.mulf %78, %79 : vector<1x128xf32>
      %81 = vector.broadcast %80 : vector<1x128xf32> to vector<32x128xf32>
      %82 = arith.subf %74, %81 : vector<32x128xf32>
      %83 = arith.mulf %82, %82 : vector<32x128xf32>
      %cst_35 = arith.constant dense<0.000000e+00> : vector<128xf32>
      %84 = vector.multi_reduction <add>, %83, %cst_35 [0] : vector<32x128xf32> to vector<128xf32>
      %85 = vector.shape_cast %84 : vector<128xf32> to vector<1x128xf32>
      %cst_36 = arith.constant 3.125000e-02 : f32
      %86 = vector.broadcast %cst_36 : f32 to vector<1x128xf32>
      %87 = arith.mulf %85, %86 : vector<1x128xf32>
      %cst_37 = arith.constant 9.99999974E-6 : f32
      %88 = vector.broadcast %cst_37 : f32 to vector<1x128xf32>
      %89 = arith.addf %87, %88 : vector<1x128xf32>
      %90 = math.rsqrt %89 : vector<1x128xf32>
      %91 = vector.broadcast %90 : vector<1x128xf32> to vector<32x128xf32>
      %92 = arith.mulf %82, %91 : vector<32x128xf32>
      %93 = vector.broadcast %75 : vector<1x128xf32> to vector<32x128xf32>
      %94 = arith.mulf %92, %93 : vector<32x128xf32>
      %95 = vector.broadcast %76 : vector<1x128xf32> to vector<32x128xf32>
      %96 = arith.addf %94, %95 : vector<32x128xf32>
      %cst_38 = arith.constant 0.000000e+00 : f32
      %97 = vector.broadcast %cst_38 : f32 to vector<32x128xf32>
      %98 = arith.cmpf ogt, %96, %97 : vector<32x128xf32>
      %cst_39 = arith.constant 2.000000e-01 : f32
      %99 = vector.broadcast %cst_39 : f32 to vector<32x128xf32>
      %100 = arith.mulf %99, %96 : vector<32x128xf32>
      %101 = arith.select %98, %96, %100 : vector<32x128xi1>, vector<32x128xf32>
      %102 = vector.extract_strided_slice %101 {offsets = [0, 0], sizes = [1, 128], strides = [1, 1]} : vector<32x128xf32> to vector<1x128xf32>
      %103 = vector.extract_strided_slice %101 {offsets = [1, 0], sizes = [1, 128], strides = [1, 1]} : vector<32x128xf32> to vector<1x128xf32>
      %104 = vector.extract_strided_slice %101 {offsets = [2, 0], sizes = [1, 128], strides = [1, 1]} : vector<32x128xf32> to vector<1x128xf32>
      %105 = vector.extract_strided_slice %101 {offsets = [3, 0], sizes = [1, 128], strides = [1, 1]} : vector<32x128xf32> to vector<1x128xf32>
      %106 = vector.extract_strided_slice %101 {offsets = [4, 0], sizes = [1, 128], strides = [1, 1]} : vector<32x128xf32> to vector<1x128xf32>
      %107 = vector.extract_strided_slice %101 {offsets = [5, 0], sizes = [1, 128], strides = [1, 1]} : vector<32x128xf32> to vector<1x128xf32>
      %108 = vector.extract_strided_slice %101 {offsets = [6, 0], sizes = [1, 128], strides = [1, 1]} : vector<32x128xf32> to vector<1x128xf32>
      %109 = vector.extract_strided_slice %101 {offsets = [7, 0], sizes = [1, 128], strides = [1, 1]} : vector<32x128xf32> to vector<1x128xf32>
      %110 = vector.extract_strided_slice %101 {offsets = [8, 0], sizes = [1, 128], strides = [1, 1]} : vector<32x128xf32> to vector<1x128xf32>
      %111 = vector.extract_strided_slice %101 {offsets = [9, 0], sizes = [1, 128], strides = [1, 1]} : vector<32x128xf32> to vector<1x128xf32>
      %112 = vector.extract_strided_slice %101 {offsets = [10, 0], sizes = [1, 128], strides = [1, 1]} : vector<32x128xf32> to vector<1x128xf32>
      %113 = vector.extract_strided_slice %101 {offsets = [11, 0], sizes = [1, 128], strides = [1, 1]} : vector<32x128xf32> to vector<1x128xf32>
      %114 = vector.extract_strided_slice %101 {offsets = [12, 0], sizes = [1, 128], strides = [1, 1]} : vector<32x128xf32> to vector<1x128xf32>
      %115 = vector.extract_strided_slice %101 {offsets = [13, 0], sizes = [1, 128], strides = [1, 1]} : vector<32x128xf32> to vector<1x128xf32>
      %116 = vector.extract_strided_slice %101 {offsets = [14, 0], sizes = [1, 128], strides = [1, 1]} : vector<32x128xf32> to vector<1x128xf32>
      %117 = vector.extract_strided_slice %101 {offsets = [15, 0], sizes = [1, 128], strides = [1, 1]} : vector<32x128xf32> to vector<1x128xf32>
      %118 = tpu.concatenate %102, %103, %104, %105, %106, %107, %108, %109, %110, %111, %112, %113, %114, %115, %116, %117 in 1 : vector<1x128xf32>, vector<1x128xf32>, vector<1x128xf32>, vector<1x128xf32>, vector<1x128xf32>, vector<1x128xf32>, vector<1x128xf32>, vector<1x128xf32>, vector<1x128xf32>, vector<1x128xf32>, vector<1x128xf32>, vector<1x128xf32>, vector<1x128xf32>, vector<1x128xf32>, vector<1x128xf32>, vector<1x128xf32> -> vector<1x2048xf32>
      %119 = vector.extract_strided_slice %118 {offsets = [0, 0], sizes = [1, 512], strides = [1, 1]} : vector<1x2048xf32> to vector<1x512xf32>
      %c0_40 = arith.constant 0 : index
      %c0_41 = arith.constant 0 : index
      %c0_42 = arith.constant 0 : index
      %120 = vector.load %arg16[%c0_40, %c0_41, %c0_42] : memref<4x2x512xf32, #tpu.memory_space<vmem>>, vector<1x1x512xf32>
      %121 = vector.shape_cast %120 : vector<1x1x512xf32> to vector<1x512xf32>
      %122 = vector.shape_cast %119 : vector<1x512xf32> to vector<1x1x512xf32>
      tpu.vector_store %arg16[%c0_40, %c0_41, %c0_42], %122 {strides = array<i32>} : memref<4x2x512xf32, #tpu.memory_space<vmem>>, vector<1x1x512xf32>,
      %123 = vector.extract_strided_slice %118 {offsets = [0, 512], sizes = [1, 512], strides = [1, 1]} : vector<1x2048xf32> to vector<1x512xf32>
      %c1 = arith.constant 1 : index
      %c0_43 = arith.constant 0 : index
      %c0_44 = arith.constant 0 : index
      %124 = vector.load %arg16[%c1, %c0_43, %c0_44] : memref<4x2x512xf32, #tpu.memory_space<vmem>>, vector<1x1x512xf32>
      %125 = vector.shape_cast %124 : vector<1x1x512xf32> to vector<1x512xf32>
      %126 = vector.shape_cast %123 : vector<1x512xf32> to vector<1x1x512xf32>
      tpu.vector_store %arg16[%c1, %c0_43, %c0_44], %126 {strides = array<i32>} : memref<4x2x512xf32, #tpu.memory_space<vmem>>, vector<1x1x512xf32>,
      %127 = vector.extract_strided_slice %118 {offsets = [0, 1024], sizes = [1, 512], strides = [1, 1]} : vector<1x2048xf32> to vector<1x512xf32>
      %c2 = arith.constant 2 : index
      %c0_45 = arith.constant 0 : index
      %c0_46 = arith.constant 0 : index
      %128 = vector.load %arg16[%c2, %c0_45, %c0_46] : memref<4x2x512xf32, #tpu.memory_space<vmem>>, vector<1x1x512xf32>
      %129 = vector.shape_cast %128 : vector<1x1x512xf32> to vector<1x512xf32>
      %130 = vector.shape_cast %127 : vector<1x512xf32> to vector<1x1x512xf32>
      tpu.vector_store %arg16[%c2, %c0_45, %c0_46], %130 {strides = array<i32>} : memref<4x2x512xf32, #tpu.memory_space<vmem>>, vector<1x1x512xf32>,
      %131 = vector.extract_strided_slice %118 {offsets = [0, 1536], sizes = [1, 512], strides = [1, 1]} : vector<1x2048xf32> to vector<1x512xf32>
      %c3 = arith.constant 3 : index
      %c0_47 = arith.constant 0 : index
      %c0_48 = arith.constant 0 : index
      %132 = vector.load %arg16[%c3, %c0_47, %c0_48] : memref<4x2x512xf32, #tpu.memory_space<vmem>>, vector<1x1x512xf32>
      %133 = vector.shape_cast %132 : vector<1x1x512xf32> to vector<1x512xf32>
      %134 = vector.shape_cast %131 : vector<1x512xf32> to vector<1x1x512xf32>
      tpu.vector_store %arg16[%c3, %c0_47, %c0_48], %134 {strides = array<i32>} : memref<4x2x512xf32, #tpu.memory_space<vmem>>, vector<1x1x512xf32>,
      %135 = vector.extract_strided_slice %101 {offsets = [16, 0], sizes = [1, 128], strides = [1, 1]} : vector<32x128xf32> to vector<1x128xf32>
      %136 = vector.extract_strided_slice %101 {offsets = [17, 0], sizes = [1, 128], strides = [1, 1]} : vector<32x128xf32> to vector<1x128xf32>
      %137 = vector.extract_strided_slice %101 {offsets = [18, 0], sizes = [1, 128], strides = [1, 1]} : vector<32x128xf32> to vector<1x128xf32>
      %138 = vector.extract_strided_slice %101 {offsets = [19, 0], sizes = [1, 128], strides = [1, 1]} : vector<32x128xf32> to vector<1x128xf32>
      %139 = vector.extract_strided_slice %101 {offsets = [20, 0], sizes = [1, 128], strides = [1, 1]} : vector<32x128xf32> to vector<1x128xf32>
      %140 = vector.extract_strided_slice %101 {offsets = [21, 0], sizes = [1, 128], strides = [1, 1]} : vector<32x128xf32> to vector<1x128xf32>
      %141 = vector.extract_strided_slice %101 {offsets = [22, 0], sizes = [1, 128], strides = [1, 1]} : vector<32x128xf32> to vector<1x128xf32>
      %142 = vector.extract_strided_slice %101 {offsets = [23, 0], sizes = [1, 128], strides = [1, 1]} : vector<32x128xf32> to vector<1x128xf32>
      %143 = vector.extract_strided_slice %101 {offsets = [24, 0], sizes = [1, 128], strides = [1, 1]} : vector<32x128xf32> to vector<1x128xf32>
      %144 = vector.extract_strided_slice %101 {offsets = [25, 0], sizes = [1, 128], strides = [1, 1]} : vector<32x128xf32> to vector<1x128xf32>
      %145 = vector.extract_strided_slice %101 {offsets = [26, 0], sizes = [1, 128], strides = [1, 1]} : vector<32x128xf32> to vector<1x128xf32>
      %146 = vector.extract_strided_slice %101 {offsets = [27, 0], sizes = [1, 128], strides = [1, 1]} : vector<32x128xf32> to vector<1x128xf32>
      %147 = vector.extract_strided_slice %101 {offsets = [28, 0], sizes = [1, 128], strides = [1, 1]} : vector<32x128xf32> to vector<1x128xf32>
      %148 = vector.extract_strided_slice %101 {offsets = [29, 0], sizes = [1, 128], strides = [1, 1]} : vector<32x128xf32> to vector<1x128xf32>
      %149 = vector.extract_strided_slice %101 {offsets = [30, 0], sizes = [1, 128], strides = [1, 1]} : vector<32x128xf32> to vector<1x128xf32>
      %150 = vector.extract_strided_slice %101 {offsets = [31, 0], sizes = [1, 128], strides = [1, 1]} : vector<32x128xf32> to vector<1x128xf32>
      %151 = tpu.concatenate %135, %136, %137, %138, %139, %140, %141, %142, %143, %144, %145, %146, %147, %148, %149, %150 in 1 : vector<1x128xf32>, vector<1x128xf32>, vector<1x128xf32>, vector<1x128xf32>, vector<1x128xf32>, vector<1x128xf32>, vector<1x128xf32>, vector<1x128xf32>, vector<1x128xf32>, vector<1x128xf32>, vector<1x128xf32>, vector<1x128xf32>, vector<1x128xf32>, vector<1x128xf32>, vector<1x128xf32>, vector<1x128xf32> -> vector<1x2048xf32>
      %152 = vector.extract_strided_slice %151 {offsets = [0, 0], sizes = [1, 512], strides = [1, 1]} : vector<1x2048xf32> to vector<1x512xf32>
      %c0_49 = arith.constant 0 : index
      %c1_50 = arith.constant 1 : index
      %c0_51 = arith.constant 0 : index
      %153 = vector.load %arg16[%c0_49, %c1_50, %c0_51] : memref<4x2x512xf32, #tpu.memory_space<vmem>>, vector<1x1x512xf32>
      %154 = vector.shape_cast %153 : vector<1x1x512xf32> to vector<1x512xf32>
      %155 = vector.shape_cast %152 : vector<1x512xf32> to vector<1x1x512xf32>
      tpu.vector_store %arg16[%c0_49, %c1_50, %c0_51], %155 {strides = array<i32>} : memref<4x2x512xf32, #tpu.memory_space<vmem>>, vector<1x1x512xf32>,
      %156 = vector.extract_strided_slice %151 {offsets = [0, 512], sizes = [1, 512], strides = [1, 1]} : vector<1x2048xf32> to vector<1x512xf32>
      %c1_52 = arith.constant 1 : index
      %c1_53 = arith.constant 1 : index
      %c0_54 = arith.constant 0 : index
      %157 = vector.load %arg16[%c1_52, %c1_53, %c0_54] : memref<4x2x512xf32, #tpu.memory_space<vmem>>, vector<1x1x512xf32>
      %158 = vector.shape_cast %157 : vector<1x1x512xf32> to vector<1x512xf32>
      %159 = vector.shape_cast %156 : vector<1x512xf32> to vector<1x1x512xf32>
      tpu.vector_store %arg16[%c1_52, %c1_53, %c0_54], %159 {strides = array<i32>} : memref<4x2x512xf32, #tpu.memory_space<vmem>>, vector<1x1x512xf32>,
      %160 = vector.extract_strided_slice %151 {offsets = [0, 1024], sizes = [1, 512], strides = [1, 1]} : vector<1x2048xf32> to vector<1x512xf32>
      %c2_55 = arith.constant 2 : index
      %c1_56 = arith.constant 1 : index
      %c0_57 = arith.constant 0 : index
      %161 = vector.load %arg16[%c2_55, %c1_56, %c0_57] : memref<4x2x512xf32, #tpu.memory_space<vmem>>, vector<1x1x512xf32>
      %162 = vector.shape_cast %161 : vector<1x1x512xf32> to vector<1x512xf32>
      %163 = vector.shape_cast %160 : vector<1x512xf32> to vector<1x1x512xf32>
      tpu.vector_store %arg16[%c2_55, %c1_56, %c0_57], %163 {strides = array<i32>} : memref<4x2x512xf32, #tpu.memory_space<vmem>>, vector<1x1x512xf32>,
      %164 = vector.extract_strided_slice %151 {offsets = [0, 1536], sizes = [1, 512], strides = [1, 1]} : vector<1x2048xf32> to vector<1x512xf32>
      %c3_58 = arith.constant 3 : index
      %c1_59 = arith.constant 1 : index
      %c0_60 = arith.constant 0 : index
      %165 = vector.load %arg16[%c3_58, %c1_59, %c0_60] : memref<4x2x512xf32, #tpu.memory_space<vmem>>, vector<1x1x512xf32>
      %166 = vector.shape_cast %165 : vector<1x1x512xf32> to vector<1x512xf32>
      %167 = vector.shape_cast %164 : vector<1x512xf32> to vector<1x1x512xf32>
      tpu.vector_store %arg16[%c3_58, %c1_59, %c0_60], %167 {strides = array<i32>} : memref<4x2x512xf32, #tpu.memory_space<vmem>>, vector<1x1x512xf32>,
      %cst_61 = arith.constant 0.000000e+00 : f32
      %168 = vector.broadcast %cst_61 : f32 to vector<2x1024xf32>
      %c0_62 = arith.constant 0 : index
      %c0_63 = arith.constant 0 : index
      %169 = vector.load %arg17[%c0_62, %c0_63] : memref<2x1024xf32, #tpu.memory_space<vmem>>, vector<2x1024xf32>
      tpu.vector_store %arg17[%c0_62, %c0_63], %168 {strides = array<i32>} : memref<2x1024xf32, #tpu.memory_space<vmem>>, vector<2x1024xf32>,
    } else {
    }
    %c0 = arith.constant 0 : index
    %c0_1 = arith.constant 0 : index
    %3 = vector.load %arg17[%c0, %c0_1] : memref<2x1024xf32, #tpu.memory_space<vmem>>, vector<2x1024xf32>
    %4 = arith.index_cast %arg0 : i32 to index
    %c0_2 = arith.constant 0 : index
    %c0_3 = arith.constant 0 : index
    %5 = vector.load %arg16[%4, %c0_2, %c0_3] : memref<4x2x512xf32, #tpu.memory_space<vmem>>, vector<1x2x512xf32>
    %6 = vector.shape_cast %5 : vector<1x2x512xf32> to vector<2x512xf32>
    %7 = arith.truncf %6 : vector<2x512xf32> to vector<2x512xbf16>
    %c0_4 = arith.constant 0 : index
    %c0_5 = arith.constant 0 : index
    %8 = vector.load %arg9[%c0_4, %c0_5] : memref<512x1024xbf16, #tpu.memory_space<vmem>>, vector<512x1024xbf16>
    %cst = arith.constant dense<0.000000e+00> : vector<2x1024xf32>
    %9 = tpu.matmul %7, %8, %cst {dimension_numbers = #tpu.dot_dimension_numbers<[1], [0], [0], [1], [0, 0, 1, 1], [], []>} : vector<2x512xbf16>, vector<512x1024xbf16>, vector<2x1024xf32> -> vector<2x1024xf32>
    %10 = arith.addf %3, %9 : vector<2x1024xf32>
    %c0_6 = arith.constant 0 : index
    %c0_7 = arith.constant 0 : index
    %11 = vector.load %arg17[%c0_6, %c0_7] : memref<2x1024xf32, #tpu.memory_space<vmem>>, vector<2x1024xf32>
    tpu.vector_store %arg17[%c0_6, %c0_7], %10 {strides = array<i32>} : memref<2x1024xf32, #tpu.memory_space<vmem>>, vector<2x1024xf32>,
    %c3_i32 = arith.constant 3 : i32
    %12 = arith.cmpi eq, %arg0, %c3_i32 : i32
    %13 = arith.extui %12 : i1 to i32
    %c0_i32_8 = arith.constant 0 : i32
    %14 = arith.cmpi ne, %13, %c0_i32_8 : i32
    scf.if %14 {
      %c0_9 = arith.constant 0 : index
      %c0_10 = arith.constant 0 : index
      %15 = vector.load %arg17[%c0_9, %c0_10] : memref<2x1024xf32, #tpu.memory_space<vmem>>, vector<2x1024xf32>
      %c0_11 = arith.constant 0 : index
      %c0_12 = arith.constant 0 : index
      %16 = vector.load %arg10[%c0_11, %c0_12] : memref<1x1024xf32, #tpu.memory_space<vmem>>, vector<1x1024xf32>
      %17 = vector.broadcast %16 : vector<1x1024xf32> to vector<2x1024xf32>
      %18 = arith.addf %15, %17 : vector<2x1024xf32>
      %c0_13 = arith.constant 0 : index
      %c0_14 = arith.constant 0 : index
      %19 = vector.load %arg11[%c0_13, %c0_14] : memref<1x1024xf32, #tpu.memory_space<vmem>>, vector<1x1024xf32>
      %c0_15 = arith.constant 0 : index
      %c0_16 = arith.constant 0 : index
      %20 = vector.load %arg12[%c0_15, %c0_16] : memref<1x1024xf32, #tpu.memory_space<vmem>>, vector<1x1024xf32>
      %cst_17 = arith.constant dense<0.000000e+00> : vector<1024xf32>
      %21 = vector.multi_reduction <add>, %18, %cst_17 [0] : vector<2x1024xf32> to vector<1024xf32>
      %22 = vector.shape_cast %21 : vector<1024xf32> to vector<1x1024xf32>
      %cst_18 = arith.constant 5.000000e-01 : f32
      %23 = vector.broadcast %cst_18 : f32 to vector<1x1024xf32>
      %24 = arith.mulf %22, %23 : vector<1x1024xf32>
      %25 = vector.broadcast %24 : vector<1x1024xf32> to vector<2x1024xf32>
      %26 = arith.subf %18, %25 : vector<2x1024xf32>
      %27 = arith.mulf %26, %26 : vector<2x1024xf32>
      %cst_19 = arith.constant dense<0.000000e+00> : vector<1024xf32>
      %28 = vector.multi_reduction <add>, %27, %cst_19 [0] : vector<2x1024xf32> to vector<1024xf32>
      %29 = vector.shape_cast %28 : vector<1024xf32> to vector<1x1024xf32>
      %cst_20 = arith.constant 5.000000e-01 : f32
      %30 = vector.broadcast %cst_20 : f32 to vector<1x1024xf32>
      %31 = arith.mulf %29, %30 : vector<1x1024xf32>
      %cst_21 = arith.constant 9.99999974E-6 : f32
      %32 = vector.broadcast %cst_21 : f32 to vector<1x1024xf32>
      %33 = arith.addf %31, %32 : vector<1x1024xf32>
      %34 = math.rsqrt %33 : vector<1x1024xf32>
      %35 = vector.broadcast %34 : vector<1x1024xf32> to vector<2x1024xf32>
      %36 = arith.mulf %26, %35 : vector<2x1024xf32>
      %37 = vector.broadcast %19 : vector<1x1024xf32> to vector<2x1024xf32>
      %38 = arith.mulf %36, %37 : vector<2x1024xf32>
      %39 = vector.broadcast %20 : vector<1x1024xf32> to vector<2x1024xf32>
      %40 = arith.addf %38, %39 : vector<2x1024xf32>
      %cst_22 = arith.constant 0.000000e+00 : f32
      %41 = vector.broadcast %cst_22 : f32 to vector<2x1024xf32>
      %42 = arith.cmpf ogt, %40, %41 : vector<2x1024xf32>
      %cst_23 = arith.constant 2.000000e-01 : f32
      %43 = vector.broadcast %cst_23 : f32 to vector<2x1024xf32>
      %44 = arith.mulf %43, %40 : vector<2x1024xf32>
      %45 = arith.select %42, %40, %44 : vector<2x1024xi1>, vector<2x1024xf32>
      %46 = arith.truncf %45 : vector<2x1024xf32> to vector<2x1024xbf16>
      %c0_24 = arith.constant 0 : index
      %c0_25 = arith.constant 0 : index
      %47 = vector.load %arg13[%c0_24, %c0_25] : memref<1024x128xbf16, #tpu.memory_space<vmem>>, vector<1024x128xbf16>
      %cst_26 = arith.constant dense<0.000000e+00> : vector<2x128xf32>
      %48 = tpu.matmul %46, %47, %cst_26 {dimension_numbers = #tpu.dot_dimension_numbers<[1], [0], [0], [1], [0, 0, 1, 1], [], []>} : vector<2x1024xbf16>, vector<1024x128xbf16>, vector<2x128xf32> -> vector<2x128xf32>
      %c0_27 = arith.constant 0 : index
      %c0_28 = arith.constant 0 : index
      %49 = vector.load %arg14[%c0_27, %c0_28] : memref<1x128xf32, #tpu.memory_space<vmem>>, vector<1x128xf32>
      %50 = vector.broadcast %49 : vector<1x128xf32> to vector<2x128xf32>
      %51 = arith.addf %48, %50 : vector<2x128xf32>
      %c0_29 = arith.constant 0 : index
      %c0_30 = arith.constant 0 : index
      %52 = vector.load %arg15[%c0_29, %c0_30] : memref<2x128xf32, #tpu.memory_space<vmem>>, vector<2x128xf32>
      tpu.vector_store %arg15[%c0_29, %c0_30], %51 {strides = array<i32>} : memref<2x128xf32, #tpu.memory_space<vmem>>, vector<2x128xf32>,
    } else {
    }
    return
  }
  func.func @transform_0(%arg0: i32) -> (i32, i32) {
    %c0_i32 = arith.constant 0 : i32
    %c0_i32_0 = arith.constant 0 : i32
    %c0_i32_1 = arith.constant 0 : i32
    return %c0_i32, %c0_i32_0 : i32, i32
  }
  func.func @transform_1(%arg0: i32) -> (i32, i32) {
    %c0_i32 = arith.constant 0 : i32
    %c0_i32_0 = arith.constant 0 : i32
    %c0_i32_1 = arith.constant 0 : i32
    return %c0_i32, %c0_i32_0 : i32, i32
  }
  func.func @transform_2(%arg0: i32) -> (i32, i32) {
    %c0_i32 = arith.constant 0 : i32
    %c0_i32_0 = arith.constant 0 : i32
    %c0_i32_1 = arith.constant 0 : i32
    return %c0_i32, %c0_i32_0 : i32, i32
  }
  func.func @transform_3(%arg0: i32) -> (i32, i32) {
    %c0_i32 = arith.constant 0 : i32
    %c0_i32_0 = arith.constant 0 : i32
    %c0_i32_1 = arith.constant 0 : i32
    return %c0_i32, %c0_i32_0 : i32, i32
  }
  func.func @transform_4(%arg0: i32) -> (i32, i32) {
    %c0_i32 = arith.constant 0 : i32
    %c0_i32_0 = arith.constant 0 : i32
    %c0_i32_1 = arith.constant 0 : i32
    return %c0_i32, %c0_i32_0 : i32, i32
  }
  func.func @transform_5(%arg0: i32) -> (i32, i32) {
    %c0_i32 = arith.constant 0 : i32
    %c0_i32_0 = arith.constant 0 : i32
    %c0_i32_1 = arith.constant 0 : i32
    return %c0_i32, %c0_i32_0 : i32, i32
  }
  func.func @transform_6(%arg0: i32) -> (i32, i32) {
    %c0_i32 = arith.constant 0 : i32
    %c0_i32_0 = arith.constant 0 : i32
    %c0_i32_1 = arith.constant 0 : i32
    return %c0_i32, %c0_i32_0 : i32, i32
  }
  func.func @transform_7(%arg0: i32) -> (i32, i32) {
    %c0_i32 = arith.constant 0 : i32
    %c0_i32_0 = arith.constant 0 : i32
    %c0_i32_1 = arith.constant 0 : i32
    return %c0_i32, %c0_i32_0 : i32, i32
  }
  func.func @transform_8(%arg0: i32) -> (i32, i32) {
    %c0_i32 = arith.constant 0 : i32
    %c0_i32_0 = arith.constant 0 : i32
    return %arg0, %c0_i32 : i32, i32
  }
  func.func @transform_9(%arg0: i32) -> (i32, i32) {
    %c0_i32 = arith.constant 0 : i32
    %c0_i32_0 = arith.constant 0 : i32
    %c0_i32_1 = arith.constant 0 : i32
    return %c0_i32, %c0_i32_0 : i32, i32
  }
  func.func @transform_10(%arg0: i32) -> (i32, i32) {
    %c0_i32 = arith.constant 0 : i32
    %c0_i32_0 = arith.constant 0 : i32
    %c0_i32_1 = arith.constant 0 : i32
    return %c0_i32, %c0_i32_0 : i32, i32
  }
  func.func @transform_11(%arg0: i32) -> (i32, i32) {
    %c0_i32 = arith.constant 0 : i32
    %c0_i32_0 = arith.constant 0 : i32
    %c0_i32_1 = arith.constant 0 : i32
    return %c0_i32, %c0_i32_0 : i32, i32
  }
  func.func @transform_12(%arg0: i32) -> (i32, i32) {
    %c0_i32 = arith.constant 0 : i32
    %c0_i32_0 = arith.constant 0 : i32
    %c0_i32_1 = arith.constant 0 : i32
    return %c0_i32, %c0_i32_0 : i32, i32
  }
  func.func @transform_13(%arg0: i32) -> (i32, i32) {
    %c0_i32 = arith.constant 0 : i32
    %c0_i32_0 = arith.constant 0 : i32
    %c0_i32_1 = arith.constant 0 : i32
    return %c0_i32, %c0_i32_0 : i32, i32
  }
  func.func @transform_14(%arg0: i32) -> (i32, i32) {
    %c0_i32 = arith.constant 0 : i32
    %c0_i32_0 = arith.constant 0 : i32
    %c0_i32_1 = arith.constant 0 : i32
    return %c0_i32, %c0_i32_0 : i32, i32
  }
}

</mosaic_0001>

<bundles_post_ra>
// kernel: discriminator_forward.1
= control target key start
LH: loop header
LB: loop body
LE: loop exit
PB: predicated region body
PF: predicated region fallthrough
CT: control target
= control target key end

     0   :  { %s9629_s0 = inlined_call_operand.vmem [shape: bf16[128,16], index: 0, kind: input, shape index: {}]   ;;  %s9630_s1 = inlined_call_operand.hbm [shape: bf16[16,128], index: 1, kind: input, shape index: {}]   ;;  %s9631_s2 = inlined_call_operand.hbm [shape: f32[1,128], index: 2, kind: input, shape index: {}]   ;;  %s9632_s3 = inlined_call_operand.hbm [shape: bf16[256,64], index: 3, kind: input, shape index: {}]   ;;  %s9633_s4 = inlined_call_operand.hbm [shape: bf16[2048,128], index: 4, kind: input, shape index: {}]   ;;  %s9634_s5 = inlined_call_operand.hbm [shape: f32[1,128], index: 5, kind: input, shape index: {}]   ;;  %s9635_s6 = inlined_call_operand.hbm [shape: f32[1,128], index: 6, kind: input, shape index: {}]   ;;  %s9636_s7 = inlined_call_operand.hbm [shape: f32[1,128], index: 7, kind: input, shape index: {}]   ;;  %s9637_s8 = inlined_call_operand.hbm [shape: bf16[2048,1024], index: 8, kind: input, shape index: {}]   ;;  %s9638_s9 = inlined_call_operand.hbm [shape: f32[1,1024], index: 9, kind: input, shape index: {}]   ;;  %s9639_s10 = inlined_call_operand.hbm [shape: f32[1,1024], index: 10, kind: input, shape index: {}]   ;;  %s9640_s11 = inlined_call_operand.hbm [shape: f32[1,1024], index: 11, kind: input, shape index: {}]   ;;  %s9641_s12 = inlined_call_operand.hbm [shape: bf16[1024,128], index: 12, kind: input, shape index: {}]   ;;  %s9642_s13 = inlined_call_operand.hbm [shape: f32[1,128], index: 13, kind: input, shape index: {}]   ;;  %s9643_s14 = inlined_call_operand.vmem [shape: f32[2,128], index: 14, kind: output, shape index: {}]  }
   0x1   :  { %9653 = sst [smem:[#allocation33_spill]] %s9629_s0 }
   0x2   :  { %9654 = sst [smem:[#allocation34_spill]] %s9631_s2 }
   0x3   :  { %9655 = sst [smem:[#allocation35_spill]] %s9633_s4 }
   0x4   :  { %9656 = sst [smem:[#allocation36_spill]] %s9635_s6 }
   0x5   :  { %9657 = sst [smem:[#allocation37_spill]] %s9637_s8 }
   0x6   :  { %9658 = sst [smem:[#allocation38_spill]] %s9643_s14 }
   0x7   :  { %19 = vsyncpa [#allocation5], 0 }
   0x8   :  { %20 = vsyncpa [#allocation7], 0 }
   0x9   :  { %21 = vsyncpa [#allocation10], 0 }
   0xa   :  { %22 = vsyncpa [#allocation13], 0 }
   0xb   :  { %23 = vsyncpa [#allocation16], 0 }
   0xc   :  { %25 = vsyncpa [#allocation16 + $0x1], 0 }
   0xd   :  { %26 = vsyncpa [#allocation19], 0 }
   0xe   :  { %27 = vsyncpa [#allocation22], 0  ;;  %s8502_s29 = smov 0   ;;  %s8504_s30 = smov 0  }
   0xf   :  { %s8506_s15 = smov 0   ;;  %s8508_s16 = smov 0  }
  0x10 LB: > { %s8407_s17 = smov [#allocation6]   ;;  %s8523_s19 = sadd.s32 4294967295, %s8405_s16   ;;  %s8405_s16 = sphi %s8508_s16, %s9696_s16   ;;  %s8401_s15 = sphi %s8506_s15, %s9695_s15   ;;  %s8397_s30 = sphi %s8504_s30, %s9694_s30   ;;  %s8393_s29 = sphi %s8502_s29, %s9693_s29  }
  0x11   : > { %s387_s18 = sshll.u32 %s8407_s17, 4  ;;  %p6538_p0 = scmp.ge.s32.totalorder %s8405_s16, 1  ;;  %s388_s18 = int_to_ptr.vmem [resolvable:$true] %s387_s18 }
  0x12   : > { %p9645_p1 = scmp.eq.s32.totalorder %s8523_s19, 0  ;;  %p358_p2 = scmp.lt.s32.totalorder %s8405_s16, 5 }
  0x13   : > { %s8408_s21 = smov [#allocation9]   ;;  %s8409_s24 = smov [#allocation12]  }
  0x14   : > { %p8529_p4 = pnand %p6538_p0, %p358_p2  ;;  %s410_s22 = sshll.u32 %s8408_s21, 4  ;;  %s8541_s22 = int_to_ptr.vmem [resolvable:$true] %s410_s22 }
  0x15   : > { %s435_s25 = sshll.u32 %s8409_s24, 4  ;;  %s9662_s2 = sld [smem:[#allocation34_spill]]  ;;  %s8543_s25 = int_to_ptr.vmem [resolvable:$true] %s435_s25 }
  0x16   : > { %s9659_s20 = scalar_select %p8529_p4, 1, 0 }
  0x17   : > { %p7624_p5 = pneg %p8529_p4 }
  0x18   : > { %9660 = sst [smem:[#allocation32_spill]] %s9659_s20 }
  0x19   : > { %p8537_p6 = pnand %p7624_p5, %p9645_p1 }
  0x1b   : > { %s7977_s28 = scalar_lea.hbm %s9662_s2, 16  ;;  %p8553_p8 = pneg %p8537_p6 }
  0x1c   : > { %p7978_p7 = scmp.ne.s32.totalorder %s9662_s2, %s7977_s28  ;;  %p7984_p11 = scmp.lt.u32.totalorder %s7977_s28, %s9662_s2 }
  0x1e   : > { %p7980_p9 = pnand %p8553_p8, %p7978_p7 }
  0x20   : > { %p7981_p10 = pneg %p7980_p9 }
  0x22   : > { %p7986_p12 = pnand %p7984_p11, %p7981_p10 }
  0x24   : > { %7989 = shalt.err (!%p7986_p12)
}
  0x25   : > { %s7990_s26 = scalar_lea.vmem %s388_s18, 16  ;;  %s7997_s14 = scalar_lea.vmem %s388_s18, 32 }
  0x26   : > { %p7991_p13 = scmp.ne.s32.totalorder %s388_s18, %s7990_s26  ;;  %p7998_p5 = scmp.lt.s32.totalorder %s388_s18, %s388_s18 }
  0x27   : > { %p7999_p3 = scmp.lt.s32.totalorder %s7997_s14, %s7990_s26 }
  0x28   : > { %p7993_p0 = pnand %p7991_p13, %p8553_p8 }
  0x29   : > { %p8000_p1 = por %p7999_p3, %p7998_p5 }
  0x2a   : > { %p7994_p2 = pneg %p7993_p0 }
  0x2c   : > { %p8001_p4 = pnand %p8000_p1, %p7994_p2 }
  0x2e   : > { %8004 = shalt.err (!%p8001_p4)
}
  0x2f   : > { %7630 = dma.hbm_to_vmem [thread:$0]  (!%p8537_p6), %s9662_s2, 16, %s388_s18, [#allocation7]  }
  0x30   : > { %s9664_s4 = sld [smem:[#allocation35_spill]] }
  0x36   : > { %s8005_s24 = scalar_lea.hbm %s9664_s4, 16384 }
  0x37   : > { %p8006_p7 = scmp.ne.s32.totalorder %s9664_s4, %s8005_s24  ;;  %p8012_p1 = scmp.lt.u32.totalorder %s8005_s24, %s9664_s4 }
  0x39   : > { %p8008_p9 = pnand %p8006_p7, %p8553_p8 }
  0x3b   : > { %p8009_p3 = pneg %p8008_p9 }
  0x3d   : > { %p8014_p4 = pnand %p8012_p1, %p8009_p3 }
  0x3f   : > { %8017 = shalt.err (!%p8014_p4)
}
  0x40   : > { %s8018_s18 = scalar_lea.vmem %s8541_s22, 16384  ;;  %p8026_p13 = scmp.lt.s32.totalorder %s8541_s22, %s8541_s22 }
  0x41   : > { %p8019_p10 = scmp.ne.s32.totalorder %s8541_s22, %s8018_s18  ;;  %p8027_p0 = scmp.lt.s32.totalorder %s8018_s18, %s8018_s18 }
  0x43   : > { %p8021_p11 = pnand %p8019_p10, %p8553_p8  ;;  %p8028_p2 = por %p8027_p0, %p8026_p13 }
  0x45   : > { %p8022_p12 = pneg %p8021_p11 }
  0x47   : > { %p8029_p5 = pnand %p8028_p2, %p8022_p12 }
  0x49   : > { %8032 = shalt.err (!%p8029_p5)
}
  0x4a   : > { %s9649_s8 = smov 64   ;;  %s9651_s20 = smov 4  }
  0x4b   : > { %7636 = dma.hbm_to_vmem [thread:$0]  (!%p8537_p6), %s9664_s4, 16384, %s8541_s22, [#allocation10], %s9649_s8, %s9649_s8, %s9651_s20  }
  0x4c   : > { %s9665_s6 = sld [smem:[#allocation36_spill]] }
  0x52   : > { %s8033_s24 = scalar_lea.hbm %s9665_s6, 16 }
  0x53   : > { %p8034_p7 = scmp.ne.s32.totalorder %s9665_s6, %s8033_s24  ;;  %p8040_p1 = scmp.lt.u32.totalorder %s8033_s24, %s9665_s6 }
  0x55   : > { %p8036_p9 = pnand %p8034_p7, %p8553_p8 }
  0x57   : > { %p8037_p3 = pneg %p8036_p9 }
  0x59   : > { %p8042_p4 = pnand %p8040_p1, %p8037_p3 }
  0x5b   : > { %8045 = shalt.err (!%p8042_p4)
}
  0x5c   : > { %s8046_s22 = scalar_lea.vmem %s8543_s25, 16  ;;  %s8053_s27 = scalar_lea.vmem %s8543_s25, 32 }
  0x5d   : > { %p8047_p10 = scmp.ne.s32.totalorder %s8543_s25, %s8046_s22  ;;  %p8054_p13 = scmp.lt.s32.totalorder %s8543_s25, %s8543_s25 }
  0x5e   : > { %p8055_p0 = scmp.lt.s32.totalorder %s8053_s27, %s8046_s22 }
  0x5f   : > { %p8049_p11 = pnand %p8047_p10, %p8553_p8 }
  0x60   : > { %p8056_p2 = por %p8055_p0, %p8054_p13 }
  0x61   : > { %p8050_p12 = pneg %p8049_p11 }
  0x63   : > { %p8057_p5 = pnand %p8056_p2, %p8050_p12 }
  0x65   : > { %8060 = shalt.err (!%p8057_p5)
}
  0x66   : > { %7642 = dma.hbm_to_vmem [thread:$0]  (!%p8537_p6), %s9665_s6, 16, %s8543_s25, [#allocation13]  }
  0x67   : > { %s8412_s0 = smov [#allocation17]   ;;  %s8413_s24 = smov [#allocation18]  }
  0x68   : > { %s457_s28 = sshll.u32 %s8412_s0, 4  ;;  %s468_s26 = sshll.u32 %s8413_s24, 4  ;;  %s458_s28 = int_to_ptr.vmem [resolvable:$true] %s457_s28  ;;  %s469_s26 = int_to_ptr.vmem [resolvable:$true] %s468_s26 }
  0x69   : > { %s8061_s22 = scalar_lea.hbm %s9638_s9, 128 }
  0x6a   : > { %p8062_p7 = scmp.ne.s32.totalorder %s9638_s9, %s8061_s22  ;;  %p8068_p1 = scmp.lt.u32.totalorder %s8061_s22, %s9638_s9 }
  0x6c   : > { %p8064_p9 = pnand %p8062_p7, %p8553_p8 }
  0x6e   : > { %p8065_p3 = pneg %p8064_p9 }
  0x70   : > { %p8070_p4 = pnand %p8068_p1, %p8065_p3 }
  0x72   : > { %8073 = shalt.err (!%p8070_p4)
}
  0x73   : > { %s8074_s25 = scalar_lea.vmem %s458_s28, 128  ;;  %p8082_p13 = scmp.lt.s32.totalorder %s458_s28, %s458_s28 }
  0x74   : > { %p8075_p10 = scmp.ne.s32.totalorder %s458_s28, %s8074_s25  ;;  %p8083_p0 = scmp.lt.s32.totalorder %s8074_s25, %s8074_s25 }
  0x76   : > { %p8077_p11 = pnand %p8075_p10, %p8553_p8  ;;  %p8084_p2 = por %p8083_p0, %p8082_p13 }
  0x78   : > { %p8078_p12 = pneg %p8077_p11 }
  0x7a   : > { %p8085_p5 = pnand %p8084_p2, %p8078_p12 }
  0x7c   : > { %8088 = shalt.err (!%p8085_p5)
}
  0x7d   : > { %7648 = dma.hbm_to_vmem [thread:$0]  (!%p8537_p6), %s9638_s9, 128, %s458_s28, [#allocation16]  }
  0x7e   : > { %s8089_s24 = scalar_lea.hbm %s9639_s10, 128 }
  0x7f   : > { %p8090_p7 = scmp.ne.s32.totalorder %s9639_s10, %s8089_s24  ;;  %p8096_p1 = scmp.lt.u32.totalorder %s8089_s24, %s9639_s10 }
  0x81   : > { %p8092_p9 = pnand %p8090_p7, %p8553_p8 }
  0x83   : > { %p8093_p3 = pneg %p8092_p9 }
  0x85   : > { %p8098_p4 = pnand %p8096_p1, %p8093_p3 }
  0x87   : > { %8101 = shalt.err (!%p8098_p4)
}
  0x88   : > { %s8102_s2 = scalar_lea.vmem %s469_s26, 128  ;;  %p8110_p13 = scmp.lt.s32.totalorder %s469_s26, %s469_s26 }
  0x89   : > { %p8103_p10 = scmp.ne.s32.totalorder %s469_s26, %s8102_s2  ;;  %p8111_p0 = scmp.lt.s32.totalorder %s8102_s2, %s8102_s2 }
  0x8b   : > { %p8105_p11 = pnand %p8103_p10, %p8553_p8  ;;  %p8112_p2 = por %p8111_p0, %p8110_p13 }
  0x8d   : > { %p8106_p12 = pneg %p8105_p11 }
  0x8f   : > { %p8113_p5 = pnand %p8112_p2, %p8106_p12 }
  0x91   : > { %8116 = shalt.err (!%p8113_p5)
}
  0x92   : > { %7651 = dma.hbm_to_vmem [thread:$0]  (!%p8537_p6), %s9639_s10, 128, %s469_s26, [#allocation19]  }
  0x93   : > { %s8414_s8 = smov [#allocation21]   ;;  %s8415_s20 = smov [#allocation4]  }
  0x94   : > { %s489_s17 = sshll.u32 %s8414_s8, 4  ;;  %s373_s0 = sshll.u32 %s8415_s20, 4  ;;  %s490_s17 = int_to_ptr.vmem [resolvable:$true] %s489_s17  ;;  %s374_s0 = int_to_ptr.vmem [resolvable:$true] %s373_s0 }
  0x95   : > { %s8117_s18 = scalar_lea.hbm %s9641_s12, 8192 }
  0x96   : > { %p8118_p7 = scmp.ne.s32.totalorder %s9641_s12, %s8117_s18  ;;  %p8124_p1 = scmp.lt.u32.totalorder %s8117_s18, %s9641_s12 }
  0x98   : > { %p8120_p9 = pnand %p8118_p7, %p8553_p8 }
  0x9a   : > { %p8121_p3 = pneg %p8120_p9 }
  0x9c   : > { %p8126_p4 = pnand %p8124_p1, %p8121_p3 }
  0x9e   : > { %8129 = shalt.err (!%p8126_p4)
}
  0x9f   : > { %s8130_s26 = scalar_lea.vmem %s490_s17, 8192  ;;  %p8138_p13 = scmp.lt.s32.totalorder %s490_s17, %s490_s17 }
  0xa0   : > { %p8131_p10 = scmp.ne.s32.totalorder %s490_s17, %s8130_s26  ;;  %p8139_p0 = scmp.lt.s32.totalorder %s8130_s26, %s8130_s26 }
  0xa2   : > { %p8133_p11 = pnand %p8131_p10, %p8553_p8  ;;  %p8140_p2 = por %p8139_p0, %p8138_p13 }
  0xa4   : > { %p8134_p12 = pneg %p8133_p11 }
  0xa6   : > { %p8141_p5 = pnand %p8140_p2, %p8134_p12 }
  0xa8   : > { %8144 = shalt.err (!%p8141_p5)
}
  0xa9   : > { %s9666_s25 = smov 4   ;;  %s9667_s8 = smov 64  }
  0xaa   : > { %7657 = dma.hbm_to_vmem [thread:$0]  (!%p8537_p6), %s9641_s12, 8192, %s490_s17, [#allocation22], %s9667_s8, %s9667_s8, %s9666_s25  }
  0xab   : > { %s8145_s22 = scalar_lea.hbm %s9630_s1, 128 }
  0xac   : > { %p8146_p7 = scmp.ne.s32.totalorder %s9630_s1, %s8145_s22  ;;  %p8152_p1 = scmp.lt.u32.totalorder %s8145_s22, %s9630_s1 }
  0xae   : > { %p8148_p9 = pnand %p8146_p7, %p8553_p8 }
  0xb0   : > { %p8149_p3 = pneg %p8148_p9 }
  0xb2   : > { %p8154_p4 = pnand %p8152_p1, %p8149_p3 }
  0xb4   : > { %8157 = shalt.err (!%p8154_p4)
}
  0xb5   : > { %s8158_s20 = scalar_lea.vmem %s374_s0, 128  ;;  %p8166_p13 = scmp.lt.s32.totalorder %s374_s0, %s374_s0 }
  0xb6   : > { %p8159_p10 = scmp.ne.s32.totalorder %s374_s0, %s8158_s20  ;;  %p8167_p0 = scmp.lt.s32.totalorder %s8158_s20, %s8158_s20 }
  0xb8   : > { %p8161_p11 = pnand %p8159_p10, %p8553_p8  ;;  %p8168_p2 = por %p8167_p0, %p8166_p13 }
  0xba   : > { %p8162_p12 = pneg %p8161_p11 }
  0xbc   : > { %p8169_p5 = pnand %p8168_p2, %p8162_p12 }
  0xbe   : > { %8172 = shalt.err (!%p8169_p5)
}
  0xbf   : > { %7627 = dma.hbm_to_vmem [thread:$0]  (!%p8537_p6), %s9630_s1, 128, %s374_s0, [#allocation5], %s9667_s8, %s9667_s8, %s9666_s25  }
  0xc0   : > { %s8416_s14 = smov [#allocation8]   ;;  %s8417_s22 = smov [#allocation11]  }
  0xc1   : > { %s397_s18 = sshll.u32 %s8416_s14, 4  ;;  %s424_s27 = sshll.u32 %s8417_s22, 4  ;;  %s398_s18 = int_to_ptr.vmem [resolvable:$true] %s397_s18  ;;  %s425_s27 = int_to_ptr.vmem [resolvable:$true] %s424_s27 }
  0xc2   : > { %s8173_s26 = scalar_lea.hbm %s9632_s3, 2048 }
  0xc3   : > { %p8174_p7 = scmp.ne.s32.totalorder %s9632_s3, %s8173_s26  ;;  %p8180_p1 = scmp.lt.u32.totalorder %s8173_s26, %s9632_s3 }
  0xc5   : > { %p8176_p9 = pnand %p8174_p7, %p8553_p8 }
  0xc7   : > { %p8177_p3 = pneg %p8176_p9 }
  0xc9   : > { %p8182_p4 = pnand %p8180_p1, %p8177_p3 }
  0xcb   : > { %8185 = shalt.err (!%p8182_p4)
}
  0xcc   : > { %s8186_s0 = scalar_lea.vmem %s398_s18, 2048  ;;  %p8194_p13 = scmp.lt.s32.totalorder %s398_s18, %s398_s18 }
  0xcd   : > { %p8187_p10 = scmp.ne.s32.totalorder %s398_s18, %s8186_s0  ;;  %p8195_p0 = scmp.lt.s32.totalorder %s8186_s0, %s8186_s0 }
  0xcf   : > { %p8189_p11 = pnand %p8187_p10, %p8553_p8  ;;  %p8196_p2 = por %p8195_p0, %p8194_p13 }
  0xd1   : > { %p8190_p12 = pneg %p8189_p11 }
  0xd3   : > { %p8197_p5 = pnand %p8196_p2, %p8190_p12 }
  0xd5   : > { %8200 = shalt.err (!%p8197_p5)
}
  0xd6   : > { %7633 = dma.hbm_to_vmem [thread:$0]  (!%p8537_p6), %s9632_s3, 2048, %s398_s18, [#allocation7], %s9667_s8, %s9667_s8, %s9666_s25  }
  0xd7   : > { %s8201_s22 = scalar_lea.hbm %s9634_s5, 16 }
  0xd8   : > { %p8202_p7 = scmp.ne.s32.totalorder %s9634_s5, %s8201_s22  ;;  %p8208_p1 = scmp.lt.u32.totalorder %s8201_s22, %s9634_s5 }
  0xda   : > { %p8204_p9 = pnand %p8202_p7, %p8553_p8 }
  0xdc   : > { %p8205_p3 = pneg %p8204_p9 }
  0xde   : > { %p8210_p4 = pnand %p8208_p1, %p8205_p3 }
  0xe0   : > { %8213 = shalt.err (!%p8210_p4)
}
  0xe1   : > { %s8214_s17 = scalar_lea.vmem %s425_s27, 16  ;;  %s8221_s25 = scalar_lea.vmem %s425_s27, 32 }
  0xe2   : > { %p8215_p10 = scmp.ne.s32.totalorder %s425_s27, %s8214_s17  ;;  %p8222_p13 = scmp.lt.s32.totalorder %s425_s27, %s425_s27 }
  0xe3   : > { %p8223_p0 = scmp.lt.s32.totalorder %s8221_s25, %s8214_s17 }
  0xe4   : > { %p8217_p11 = pnand %p8215_p10, %p8553_p8 }
  0xe5   : > { %p8224_p2 = por %p8223_p0, %p8222_p13 }
  0xe6   : > { %p8218_p12 = pneg %p8217_p11 }
  0xe8   : > { %p8225_p5 = pnand %p8224_p2, %p8218_p12 }
  0xea   : > { %8228 = shalt.err (!%p8225_p5)
}
  0xeb   : > { %7639 = dma.hbm_to_vmem [thread:$0]  (!%p8537_p6), %s9634_s5, 16, %s425_s27, [#allocation10]  }
  0xec   : > { %s8418_s0 = smov [#allocation14]   ;;  %s8419_s6 = smov [#allocation20]  }
  0xed   : > { %s446_s4 = sshll.u32 %s8418_s0, 4  ;;  %s479_s24 = sshll.u32 %s8419_s6, 4  ;;  %s447_s4 = int_to_ptr.vmem [resolvable:$true] %s446_s4  ;;  %s480_s24 = int_to_ptr.vmem [resolvable:$true] %s479_s24 }
  0xee   : > { %s8229_s2 = scalar_lea.hbm %s9636_s7, 16 }
  0xef   : > { %p8230_p7 = scmp.ne.s32.totalorder %s9636_s7, %s8229_s2  ;;  %p8236_p1 = scmp.lt.u32.totalorder %s8229_s2, %s9636_s7 }
  0xf1   : > { %p8232_p9 = pnand %p8230_p7, %p8553_p8 }
  0xf3   : > { %p8233_p3 = pneg %p8232_p9 }
  0xf5   : > { %p8238_p4 = pnand %p8236_p1, %p8233_p3 }
  0xf7   : > { %8241 = shalt.err (!%p8238_p4)
}
  0xf8   : > { %s8242_s27 = scalar_lea.vmem %s447_s4, 16  ;;  %s8249_s25 = scalar_lea.vmem %s447_s4, 32 }
  0xf9   : > { %p8243_p10 = scmp.ne.s32.totalorder %s447_s4, %s8242_s27  ;;  %p8250_p13 = scmp.lt.s32.totalorder %s447_s4, %s447_s4 }
  0xfa   : > { %p8251_p0 = scmp.lt.s32.totalorder %s8249_s25, %s8242_s27 }
  0xfb   : > { %p8245_p11 = pnand %p8243_p10, %p8553_p8 }
  0xfc   : > { %p8252_p2 = por %p8251_p0, %p8250_p13 }
  0xfd   : > { %p8246_p12 = pneg %p8245_p11 }
  0xff   : > { %p8253_p5 = pnand %p8252_p2, %p8246_p12 }
 0x101   : > { %8256 = shalt.err (!%p8253_p5)
}
 0x102   : > { %7645 = dma.hbm_to_vmem [thread:$0]  (!%p8537_p6), %s9636_s7, 16, %s447_s4, [#allocation13]  }
 0x103   : > { %s8257_s14 = scalar_lea.hbm %s9640_s11, 128 }
 0x104   : > { %p8258_p7 = scmp.ne.s32.totalorder %s9640_s11, %s8257_s14  ;;  %p8264_p1 = scmp.lt.u32.totalorder %s8257_s14, %s9640_s11 }
 0x106   : > { %p8260_p9 = pnand %p8258_p7, %p8553_p8 }
 0x108   : > { %p8261_p3 = pneg %p8260_p9 }
 0x10a   : > { %p8266_p4 = pnand %p8264_p1, %p8261_p3 }
 0x10c   : > { %8269 = shalt.err (!%p8266_p4)
}
 0x10d   : > { %s8270_s20 = scalar_lea.vmem %s480_s24, 128  ;;  %p8278_p13 = scmp.lt.s32.totalorder %s480_s24, %s480_s24 }
 0x10e   : > { %p8271_p10 = scmp.ne.s32.totalorder %s480_s24, %s8270_s20  ;;  %p8279_p0 = scmp.lt.s32.totalorder %s8270_s20, %s8270_s20 }
 0x110   : > { %p8273_p11 = pnand %p8271_p10, %p8553_p8  ;;  %p8280_p2 = por %p8279_p0, %p8278_p13 }
 0x112   : > { %p8274_p12 = pneg %p8273_p11 }
 0x114   : > { %p8281_p5 = pnand %p8280_p2, %p8274_p12 }
 0x116   : > { %8284 = shalt.err (!%p8281_p5)
}
 0x117   : > { %7654 = dma.hbm_to_vmem [thread:$0]  (!%p8537_p6), %s9640_s11, 128, %s480_s24, [#allocation19]  }
 0x118   : > { %s8420_s27 = smov [#allocation23]   ;;  %s8285_s0 = scalar_lea.hbm %s9642_s13, 16 }
 0x119   : > { %s503_s25 = sshll.u32 %s8420_s27, 4  ;;  %p8286_p7 = scmp.ne.s32.totalorder %s9642_s13, %s8285_s0  ;;  %s504_s25 = int_to_ptr.vmem [resolvable:$true] %s503_s25 }
 0x11a   : > { %p8292_p1 = scmp.lt.u32.totalorder %s8285_s0, %s9642_s13 }
 0x11b   : > { %p8288_p9 = pnand %p8286_p7, %p8553_p8 }
 0x11d   : > { %p8289_p3 = pneg %p8288_p9 }
 0x11f   : > { %p8294_p4 = pnand %p8292_p1, %p8289_p3 }
 0x121   : > { %8297 = shalt.err (!%p8294_p4)
}
 0x122   : > { %s8298_s24 = scalar_lea.vmem %s504_s25, 16  ;;  %s8305_s28 = scalar_lea.vmem %s504_s25, 32 }
 0x123   : > { %p8299_p10 = scmp.ne.s32.totalorder %s504_s25, %s8298_s24  ;;  %p8306_p13 = scmp.lt.s32.totalorder %s504_s25, %s504_s25 }
 0x124   : > { %p8307_p0 = scmp.lt.s32.totalorder %s8305_s28, %s8298_s24 }
 0x125   : > { %p8301_p11 = pnand %p8299_p10, %p8553_p8 }
 0x126   : > { %p8308_p2 = por %p8307_p0, %p8306_p13 }
 0x127   : > { %p8302_p12 = pneg %p8301_p11 }
 0x129   : > { %p8309_p5 = pnand %p8308_p2, %p8302_p12 }
 0x12b   : > { %8312 = shalt.err (!%p8309_p5)
}
 0x12c   : > { %7660 = dma.hbm_to_vmem [thread:$0]  (!%p8537_p6), %s9642_s13, 16, %s504_s25, [#allocation22]  }
 0x12d   : > { %s8791_s21 = sadd.s32 1, %s8405_s16   ;;  %s208_s23 = sadd.s32 1, %s8401_s15 }
 0x12e   : > { %s205_s4 = ssub.s32 %s8405_s16, %s8791_s21  ;;  %p215_p8 = scmp.ne.s32.totalorder %s8401_s15, %s8397_s30 }
 0x12f   : > { %p206_p7 = scmp.eq.s32.totalorder %s205_s4, 0  ;;  %p216_p9 = scmp.eq.s32.totalorder %s8405_s16, 0 }
 0x130   : > { %p221_p3 = scmp.ne.s32.totalorder %s8397_s30, %s8393_s29  ;;  %p7677_p1 = scmp.lt.s32.totalorder %s8405_s16, 4 }
 0x131   : > { %s8803_s17 = scalar_select %p206_p7, %s8401_s15, %s208_s23  }
 0x132   : > { %p217_p4 = por %p216_p9, %p215_p8  ;;  %p9668_p10 = scmp.eq.s32.totalorder %s8523_s19, 0 }
 0x133   : > { %s514_s8 = sand.u32 1, %s8405_s16   ;;  %s516_s25 = sand.u32 1, %s8401_s15  }
 0x134   : > { %p8807_p11 = por %p9668_p10, %p221_p3  ;;  %s6552_s18 = sshll.u32 %s516_s25, 11 }
 0x135   : > { %s7095_s0 = sshll.u32 %s8405_s16, 15  ;;  %s9670_s22 = sld [smem:[#allocation37_spill]] }
 0x136   : > { %s518_s29 = scalar_lea.vmem [#allocation15], %s6552_s18  ;;  %p8821_p6 = pnand %p7677_p1, %p217_p4 }
 0x137   : > { %s526_s24 = sshll.u32 %s518_s29, 4  ;;  %s8825_s16 = scalar_lea.sflag [#allocation16], %s514_s8  ;;  %s8819_s24 = int_to_ptr.vmem [resolvable:$true] %s526_s24 }
 0x138   : > { %p8315_p13 = pneg %p8821_p6 }
 0x13b   : > { %s8817_s2 = scalar_lea.hbm %s9670_s22, %s7095_s0  ;;  %s8318_s4 = scalar_lea.hbm %s9670_s22, 131072 }
 0x13c   : > { %s8313_s26 = scalar_lea.hbm %s8817_s2, 32768  ;;  %p8319_p5 = scmp.lt.u32.totalorder %s8817_s2, %s9670_s22 }
 0x13d   : > { %p8314_p12 = scmp.ne.s32.totalorder %s8817_s2, %s8313_s26  ;;  %p8320_p8 = scmp.lt.u32.totalorder %s8318_s4, %s8313_s26 }
 0x13e   : > { %p8322_p9 = scmp.lt.u32.totalorder %s8313_s26, %s8817_s2 }
 0x13f   : > { %p8316_p0 = pnand %p8315_p13, %p8314_p12  ;;  %p8321_p7 = por %p8320_p8, %p8319_p5 }
 0x141   : > { %p8317_p2 = pneg %p8316_p0  ;;  %p8323_p3 = por %p8322_p9, %p8321_p7 }
 0x143   : > { %p8324_p1 = pnand %p8323_p3, %p8317_p2 }
 0x145   : > { %8327 = shalt.err (!%p8324_p1)
}
 0x146   : > { %s8328_s8 = scalar_lea.vmem %s8819_s24, 32768  ;;  %s8421_s0 = smov [#allocation15]  }
 0x147   : > { %p8329_p4 = scmp.ne.s32.totalorder %s8819_s24, %s8328_s8  ;;  %s8333_s6 = sshll.u32 %s8421_s0, 4  ;;  %s8334_s6 = int_to_ptr.vmem [resolvable:$false] %s8333_s6 }
 0x148   : > { %s8335_s14 = scalar_lea.vmem %s8334_s6, 65536  ;;  %p8336_p0 = scmp.lt.s32.totalorder %s8819_s24, %s8334_s6 }
 0x149   : > { %p8331_p10 = pnand %p8329_p4, %p8315_p13  ;;  %p8337_p5 = scmp.lt.s32.totalorder %s8335_s14, %s8328_s8 }
 0x14b   : > { %p8332_p12 = pneg %p8331_p10  ;;  %p8338_p8 = por %p8337_p5, %p8336_p0 }
 0x14d   : > { %p8339_p7 = pnand %p8338_p8, %p8332_p12 }
 0x14f   : > { %8342 = shalt.err (!%p8339_p7)
}
 0x150   : > { %s8422_s29 = smov 512   ;;  %s8423_s26 = smov 32  }
 0x151   : > { %7664 = dma.hbm_to_vmem [thread:$0]  (!%p8821_p6), %s8817_s2, 32768, %s8819_s24, %s8825_s16, %s8422_s29, %s8422_s29, %s8423_s26  }
 0x152   : > { %s9672_s20 = sld [smem:[#allocation32_spill]] }
 0x158   : > { %p9673_p13 = scmp.ne.s32.totalorder %s9672_s20, 0 }
 0x159   : > { %p9674_p2 = scmp.eq.s32.totalorder (!%p9673_p13), %s8523_s19, 0 }
 0x15a   : > { %538 = sbr.rel (%p9673_p13) target bundleno = 2083 (0x823), region = 76 }
 0x161   : > { %8360 = dma.done.wait (%p9674_p2), [#allocation5], 128   ;;  %p9675_p9 = pmov %p9674_p2 }
 0x162   : > { %p9676_p3 = pmov %p9674_p2 }
 0x163   : > { %8362 = vsyncadd (%p9675_p9), [#allocation5], 4294967168 }
 0x164   : > { %8364 = dma.done.wait (%p9676_p3), [#allocation7], 2064   ;;  %p9677_p1 = pmov %p9674_p2 }
 0x166   : > { %8366 = vsyncadd (%p9677_p1), [#allocation7], 4294965232  ;;  %p9678_p4 = pmov %p9677_p1 }
 0x167   : > { %p9679_p6 = pmov %p9677_p1 }
 0x168   : > { %8368 = dma.done.wait (%p9678_p4), [#allocation10], 16400  }
 0x169   : > { %8370 = vsyncadd (%p9679_p6), [#allocation10], 4294950896  ;;  %p9680_p10 = pmov %p9677_p1 }
 0x16a   : > { %p9681_p12 = pmov %p9677_p1 }
 0x16b   : > { %8372 = dma.done.wait (%p9680_p10), [#allocation13], 32  }
 0x16c   : > { %8374 = vsyncadd (%p9681_p12), [#allocation13], 4294967264  ;;  %s568_s2 = sand.u32 1, %s8523_s19   ;;  %s570_s24 = sand.u32 1, %s8397_s30  }
 0x16d   : > { %s6564_s28 = sshll.u32 %s570_s24, 11  ;;  %s569_s16 = scalar_lea.sflag [#allocation16], %s568_s2 }
 0x16e   : > { %s8873_s23 = scalar_lea.vmem [#allocation15], %s6564_s28 }
 0x16f   : > { %8376 = dma.done.wait (%p8807_p11), %s569_s16, 32768  }
 0x170   : > { %8378 = vsyncadd (%p8807_p11), %s569_s16, 4294934528  ;;  %p9682_p0 = pmov %p9677_p1 }
 0x172   : > { %8380 = dma.done.wait (%p9682_p0), [#allocation16], 128   ;;  %p9683_p5 = pmov %p9682_p0 }
 0x173   : > { %p9684_p8 = pmov %p9682_p0 }
 0x174   : > { %8382 = vsyncadd (%p9683_p5), [#allocation16], 4294967168 }
 0x175   : > { %8384 = dma.done.wait (%p9684_p8), [#allocation19], 256   ;;  %p9685_p7 = pmov %p9682_p0 }
 0x176   : > { %p9686_p13 = pmov %p9682_p0 }
 0x177   : > { %8386 = vsyncadd (%p9685_p7), [#allocation19], 4294967040 }
 0x178   : > { %8388 = dma.done.wait (%p9686_p13), [#allocation22], 8208   ;;  %p9687_p2 = pmov %p9682_p0 }
 0x179   : > { %p9688_p11 = scmp.ne.s32.totalorder %s8523_s19, 0 }
 0x17a   : > { %8390 = vsyncadd (%p9687_p2), [#allocation22], 4294959088  ;;  %v7741_v0 = vld [vmem:[#allocation4] sm:$0xff] (!%p9688_p11)   ;;  %vm709_vm0 = vcmask (!%p9688_p11), 130048   ;;  %s9689_s25 = sld [smem:[#allocation33_spill]] (!%p9688_p11)  ;;  %v7750_v9 = vld [vmem:[#allocation8] sm:$0xff] (!%p9688_p11)  }
 0x17b   : > { %637 = sbr.rel (%p9688_p11) target bundleno = 1261 (0x4ed), region = 132  ;;  %7458 = vmatprep.subr.bf16.mxu0 (!%p9688_p11), %v7741_v0  ;;  %7556 = vmatprep.subr.bf16.mxu1 (!%p9688_p11), %v7741_v0  ;;  %vm999_vm1 = vcmask (!%p9688_p11), 523264   ;;  %v8927_v10 = vld [vmem:[#allocation6] ss:$0 sm:$0xff] (!%p9688_p11) }
 0x17c   : > { %7459 = vmatpush3.bf16.msra.mxu0 (!%p9688_p11), %v7741_v0  ;;  %7557 = vmatpush3.bf16.msra.mxu1 (!%p9688_p11), %v7741_v0 }
 0x180   : > { %v7742_v1 = vld [vmem:[%s9689_s25] sm:$0xff] (!%p9688_p11)   ;;  %v7743_v2 = vld [vmem:[%s9689_s25 + $0x8] sm:$0xff] (!%p9688_p11)   ;;  %v7744_v3 = vld [vmem:[%s9689_s25 + $0x10] sm:$0xff] (!%p9688_p11)  }
 0x181   : > { %7460 = vmatprep.mubr.msk.bf16.mxu0 (!%p9688_p11), %vm709_vm0, %v7742_v1  ;;  %v7746_v4 = vld [vmem:[%s9689_s25 + $0x20] sm:$0xff] (!%p9688_p11)   ;;  %v7747_v5 = vld [vmem:[%s9689_s25 + $0x28] sm:$0xff] (!%p9688_p11)   ;;  %v7748_v6 = vld [vmem:[%s9689_s25 + $0x30] sm:$0xff] (!%p9688_p11)  }
 0x182   : > { %7461 = vmatmul.mubr.msk.bf16.vlgmr.msra.gmra.mrb[0].mxu0 %vm709_vm0, %v7743_v2  ;;  %7468 = vmatprep.mubr.msk.bf16.mxu1 %vm709_vm0, %v7746_v4  ;;  %v7745_v7 = vld [vmem:[%s9689_s25 + $0x18] sm:$0xff]  }
 0x183   : > { %7464 = vmatprep.mubr.msk.bf16.mxu0 %vm709_vm0, %v7744_v3  ;;  %7469 = vmatmul.mubr.msk.bf16.vlgmr.msra.gmra.mrb[0].mxu1 %vm709_vm0, %v7747_v5  ;;  %v7749_v8 = vld [vmem:[%s9689_s25 + $0x38] sm:$0xff]  }
 0x184   : > { %7472 = vmatprep.mubr.msk.bf16.mxu1 %vm709_vm0, %v7748_v6 }
 0x18a   : > { %7465 = vmatmul.mubr.msk.bf16.gmra.mrb[4].mxu0 %vm709_vm0, %v7745_v7 }
 0x18b   : > { %7473 = vmatmul.mubr.msk.bf16.gmra.mrb[4].mxu1 %vm709_vm0, %v7749_v8  ;;  %7524 = vmatprep.mubr.msk.bf16.mxu0 %vm999_vm1, %v7750_v9 }
 0x18c   : > { %7484 = vmatprep.mubr.msk.bf16.mxu1 %vm999_vm1, %v7750_v9 }
 0x255   : > { %v7462_v11 = vpop.f32.mrb[0].mxu0 }
 0x256   : > { %v777_v12 = vadd.f32 %v7462_v11, %v8927_v10  ;;  %v768_v13 = vpop.f32.mrb[1].mxu0  ;;  %v7470_v16 = vpop.f32.mrb[0].mxu1 }
 0x257   : > { %v769_v14 = vadd.f32 %v8927_v10, %v768_v13  ;;  %v7463_v15 = vpop.f32.mrb[2].mxu0  ;;  %v809_v20 = vadd.f32 %v7470_v16, %v8927_v10  ;;  %v800_v21 = vpop.f32.mrb[1].mxu1 }
 0x258   : > { %vm833_vm2 = vcmp.gt.f32.partialorder %v777_v12, 0.0  ;;  %v849_v17 = vmul.f32 0.2, %v777_v12  ;;  %v780_v18 = vadd.f32 %v7463_v15, %v8927_v10  ;;  %v771_v19 = vpop.f32.mrb[3].mxu0  ;;  %v801_v24 = vadd.f32 %v8927_v10, %v800_v21  ;;  %v7471_v25 = vpop.f32.mrb[2].mxu1  ;;  %v7752_v21 = vld [vmem:[#allocation8 + $0x10] sm:$0xff]  }
 0x259   : > { %vm831_vm3 = vcmp.gt.f32.partialorder %v769_v14, 0.0  ;;  %v847_v22 = vmul.f32 0.2, %v769_v14  ;;  %v772_v23 = vadd.f32 %v8927_v10, %v771_v19  ;;  %vm841_vm5 = vcmp.gt.f32.partialorder %v809_v20, 0.0  ;;  %v803_v31 = vpop.f32.mrb[3].mxu1  ;;  %v7766_v19 = vld [vmem:[#allocation9 + $0x40] sm:$0xff]  }
 0x25a   : > { %vm834_vm4 = vcmp.gt.f32.partialorder %v780_v18, 0.0  ;;  %v850_v26 = vmul.f32 0.2, %v780_v18  ;;  %v857_v27 = vmul.f32 0.2, %v809_v20  ;;  %v865_v30 = vsel %vm833_vm2, %v777_v12, %v849_v17 }
 0x25b   : > { %vm832_vm6 = vcmp.gt.f32.partialorder %v772_v23, 0.0  ;;  %v848_v28 = vmul.f32 0.2, %v772_v23  ;;  %v863_v29 = vsel %vm831_vm3, %v769_v14, %v847_v22  ;;  %vm839_vm7 = vcmp.gt.f32.partialorder %v801_v24, 0.0  ;;  %v7767_v22 = vld [vmem:[#allocation9] sm:$0xff]  }
 0x25c   : > { %v866_v32 = vsel %vm834_vm4, %v780_v18, %v850_v26  ;;  %v855_v33 = vmul.f32 0.2, %v801_v24  ;;  %v812_v34 = vadd.f32 %v7471_v25, %v8927_v10  ;;  %v804_v38 = vadd.f32 %v8927_v10, %v803_v31  ;;  %v7771_v25 = vld [vmem:[#allocation9 + $0x8] sm:$0xff]   ;;  %v7774_v26 = vld [vmem:[#allocation9 + $0x50] sm:$0xff]  }
 0x25d   : > { %v7466_v35 = vpop.f32.mrb[4].mxu0  ;;  %v864_v36 = vsel %vm832_vm6, %v772_v23, %v848_v28  ;;  %v880_v37 = vpack.c.bf16 %v866_v32, %v865_v30  ;;  %v873_v39 = vsel %vm841_vm5, %v809_v20, %v857_v27  ;;  %v7751_v20 = vld [vmem:[#allocation8 + $0x8] sm:$0xff]   ;;  %v7753_v27 = vld [vmem:[#allocation8 + $0x18] sm:$0xff]   ;;  %v7754_v28 = vld [vmem:[#allocation8 + $0x20] sm:$0xff]  }
 0x25e   : > { %v793_v40 = vadd.f32 %v7466_v35, %v8927_v10  ;;  %v784_v41 = vpop.f32.mrb[5].mxu0  ;;  %v879_v42 = vpack.c.bf16 %v864_v36, %v863_v29  ;;  %vm842_vm8 = vcmp.gt.f32.partialorder %v812_v34, 0.0  ;;  %v858_v43 = vmul.f32 0.2, %v812_v34  ;;  %v7474_v47 = vpop.f32.mrb[4].mxu1  ;;  %v7770_v23 = vld [vmem:[#allocation9 + $0x48] sm:$0xff]  }
 0x25f   : > { %v785_v44 = vadd.f32 %v8927_v10, %v784_v41  ;;  %v7467_v45 = vpop.f32.mrb[6].mxu0  ;;  %vm840_vm9 = vcmp.gt.f32.partialorder %v804_v38, 0.0  ;;  %v856_v46 = vmul.f32 0.2, %v804_v38  ;;  %v871_v48 = vsel %vm839_vm7, %v801_v24, %v855_v33  ;;  %v816_v53 = vpop.f32.mrb[5].mxu1  ;;  %v7768_v24 = vld [vmem:[#allocation9 + $0xc0] sm:$0xff]  }
 0x260   : > { %vm837_vm10 = vcmp.gt.f32.partialorder %v793_v40, 0.0  ;;  %v853_v49 = vmul.f32 0.2, %v793_v40  ;;  %v796_v50 = vadd.f32 %v7467_v45, %v8927_v10  ;;  %v787_v51 = vpop.f32.mrb[7].mxu0  ;;  %7476 = vmatprep.subr.bf16.mxu1 %v879_v42  ;;  %v825_v52 = vadd.f32 %v7474_v47, %v8927_v10  ;;  %v7475_v57 = vpop.f32.mrb[6].mxu1  ;;  %v7769_v29 = vld [vmem:[#allocation9 + $0x80] sm:$0xff]  }
 0x261   : > { %vm835_vm11 = vcmp.gt.f32.partialorder %v785_v44, 0.0  ;;  %v851_v54 = vmul.f32 0.2, %v785_v44  ;;  %v788_v55 = vadd.f32 %v8927_v10, %v787_v51  ;;  %7477 = vmatpush3.bf16.msra.mxu1 %v879_v42  ;;  %v817_v56 = vadd.f32 %v8927_v10, %v816_v53  ;;  %v819_v63 = vpop.f32.mrb[7].mxu1  ;;  %v7775_v30 = vld [vmem:[#allocation9 + $0x10] sm:$0xff]   ;;  %v7772_v31 = vld [vmem:[#allocation9 + $0xc8] sm:$0xff]  }
 0x262   : > { %vm838_vm12 = vcmp.gt.f32.partialorder %v796_v50, 0.0  ;;  %v854_v58 = vmul.f32 0.2, %v796_v50  ;;  %7478 = vmatprep.subr.bf16.mxu1 %v880_v37  ;;  %vm845_vm13 = vcmp.gt.f32.partialorder %v825_v52, 0.0  ;;  %v861_v59 = vmul.f32 0.2, %v825_v52 }
 0x263   : > { %vm836_vm14 = vcmp.gt.f32.partialorder %v788_v55, 0.0  ;;  %v852_v60 = vmul.f32 0.2, %v788_v55  ;;  %v867_v61 = vsel %vm835_vm11, %v785_v44, %v851_v54  ;;  %v869_v62 = vsel %vm837_vm10, %v793_v40, %v853_v49  ;;  %v7778_v32 = vld [vmem:[#allocation9 + $0x58] sm:$0xff]   ;;  %v7773_v33 = vld [vmem:[#allocation9 + $0x88] sm:$0xff]   ;;  %v7776_v35 = vld [vmem:[#allocation9 + $0xd0] sm:$0xff]  }
 0x264   : > { %v870_v0 = vsel %vm838_vm12, %v796_v50, %v854_v58  ;;  %vm843_vm15 = vcmp.gt.f32.partialorder %v817_v56, 0.0  ;;  %v859_v1 = vmul.f32 0.2, %v817_v56  ;;  %v828_v2 = vadd.f32 %v7475_v57, %v8927_v10  ;;  %v7782_v36 = vld [vmem:[#allocation9 + $0x60] sm:$0xff]   ;;  %v7780_v41 = vld [vmem:[#allocation9 + $0xd8] sm:$0xff]   ;;  %v7786_v42 = vld [vmem:[#allocation9 + $0x68] sm:$0xff]  }
 0x265   : > { %7479 = vmatpush3.bf16.msra.mxu1 %v880_v37  ;;  %v868_v3 = vsel %vm836_vm14, %v788_v55, %v852_v60  ;;  %v882_v4 = vpack.c.bf16 %v870_v0, %v869_v62  ;;  %v820_v5 = vadd.f32 %v8927_v10, %v819_v63  ;;  %v872_v6 = vsel %vm840_vm9, %v804_v38, %v856_v46  ;;  %v7755_v37 = vld [vmem:[#allocation8 + $0x28] sm:$0xff]   ;;  %v7756_v38 = vld [vmem:[#allocation8 + $0x30] sm:$0xff]   ;;  %v7783_v40 = vld [vmem:[#allocation9 + $0x20] sm:$0xff]  }
 0x266   : > { %v881_v7 = vpack.c.bf16 %v868_v3, %v867_v61  ;;  %vm846_vm0 = vcmp.gt.f32.partialorder %v828_v2, 0.0  ;;  %v862_v8 = vmul.f32 0.2, %v828_v2  ;;  %v883_v9 = vpack.c.bf16 %v872_v6, %v871_v48  ;;  %v7787_v44 = vld [vmem:[#allocation9 + $0x28] sm:$0xff]   ;;  %v7784_v45 = vld [vmem:[#allocation9 + $0xe0] sm:$0xff]   ;;  %v7790_v46 = vld [vmem:[#allocation9 + $0x70] sm:$0xff]  }
 0x267   : > { %vm844_vm2 = vcmp.gt.f32.partialorder %v820_v5, 0.0  ;;  %v860_v11 = vmul.f32 0.2, %v820_v5  ;;  %v874_v12 = vsel %vm842_vm8, %v812_v34, %v858_v43  ;;  %v875_v13 = vsel %vm843_vm15, %v817_v56, %v859_v1  ;;  %v7779_v34 = vld [vmem:[#allocation9 + $0x18] sm:$0xff]   ;;  %v7758_v48 = vld [vmem:[#allocation8 + $0x40] sm:$0xff]   ;;  %v7791_v50 = vld [vmem:[#allocation9 + $0x30] sm:$0xff]  }
 0x268   : > { %7480 = vmatprep.subr.bf16.mxu1 %v881_v7  ;;  %7516 = vmatprep.subr.bf16.mxu0 %v883_v9  ;;  %v884_v14 = vpack.c.bf16 %v874_v12, %v873_v39  ;;  %v877_v15 = vsel %vm845_vm13, %v825_v52, %v861_v59  ;;  %v878_v16 = vsel %vm846_vm0, %v828_v2, %v862_v8  ;;  %v7777_v39 = vld [vmem:[#allocation9 + $0x90] sm:$0xff]   ;;  %v7781_v43 = vld [vmem:[#allocation9 + $0x98] sm:$0xff]   ;;  %v7785_v49 = vld [vmem:[#allocation9 + $0xa0] sm:$0xff]  }
 0x269   : > { %7481 = vmatpush3.bf16.msra.mxu1 %v881_v7  ;;  %7517 = vmatpush3.bf16.msra.mxu0 %v883_v9  ;;  %v876_v10 = vsel %vm844_vm2, %v820_v5, %v860_v11  ;;  %v886_v17 = vpack.c.bf16 %v878_v16, %v877_v15  ;;  %v7757_v47 = vld [vmem:[#allocation8 + $0x38] sm:$0xff]   ;;  %v7788_v51 = vld [vmem:[#allocation9 + $0xe8] sm:$0xff]   ;;  %v7792_v53 = vld [vmem:[#allocation9 + $0xf0] sm:$0xff]  }
 0x26a   : > { %7482 = vmatprep.subr.bf16.mxu1 %v882_v4  ;;  %7518 = vmatprep.subr.bf16.mxu0 %v884_v14  ;;  %v885_v18 = vpack.c.bf16 %v876_v10, %v875_v13  ;;  %v7789_v52 = vld [vmem:[#allocation9 + $0xa8] sm:$0xff]   ;;  %v7760_v55 = vld [vmem:[#allocation8 + $0x50] sm:$0xff]   ;;  %v7761_v57 = vld [vmem:[#allocation8 + $0x58] sm:$0xff]  }
 0x26b   : > { %v7759_v54 = vld [vmem:[#allocation8 + $0x48] sm:$0xff]   ;;  %v7793_v56 = vld [vmem:[#allocation9 + $0xb0] sm:$0xff]   ;;  %v7762_v58 = vld [vmem:[#allocation8 + $0x60] sm:$0xff]  }
 0x26c   : > { %v7763_v59 = vld [vmem:[#allocation8 + $0x68] sm:$0xff]   ;;  %v7764_v60 = vld [vmem:[#allocation8 + $0x70] sm:$0xff]   ;;  %v7765_v61 = vld [vmem:[#allocation8 + $0x78] sm:$0xff]  }
 0x26d   : > { %7483 = vmatpush3.bf16.msra.mxu1 %v882_v4  ;;  %7519 = vmatpush3.bf16.msra.mxu0 %v884_v14  ;;  %v7794_v62 = vld [vmem:[#allocation9 + $0x78] sm:$0xff]   ;;  %v7796_v0 = vld [vmem:[#allocation9 + $0x140] sm:$0xff]   ;;  %v7800_v12 = vld [vmem:[#allocation9 + $0x148] sm:$0xff]  }
 0x26e   : > { %7520 = vmatprep.subr.bf16.mxu0 %v885_v18  ;;  %7146 = vmatprep.subr.bf16.mxu1 %v7766_v19  ;;  %v7795_v63 = vld [vmem:[#allocation9 + $0x38] sm:$0xff]   ;;  %v7803_v3 = vld [vmem:[#allocation9 + $0x1c0] sm:$0xff]   ;;  %v7801_v13 = vld [vmem:[#allocation9 + $0x108] sm:$0xff]  }
 0x26f   : > { %v7797_v1 = vld [vmem:[#allocation9 + $0xf8] sm:$0xff]   ;;  %v7798_v9 = vld [vmem:[#allocation9 + $0x100] sm:$0xff]   ;;  %v7802_v15 = vld [vmem:[#allocation9 + $0x150] sm:$0xff]  }
 0x270   : > { %7485 = vmatmul.mubr.msk.bf16.vlgmr.msra.gmra.mrb[8].mxu1 %vm999_vm1, %v7751_v20  ;;  %v7799_v2 = vld [vmem:[#allocation9 + $0xb8] sm:$0xff]  }
 0x271   : > { %7521 = vmatpush3.bf16.msra.mxu0 %v885_v18  ;;  %7488 = vmatprep.mubr.msk.bf16.mxu1 %vm999_vm1, %v7752_v21 }
 0x272   : > { %7522 = vmatprep.subr.bf16.mxu0 %v886_v17  ;;  %7147 = vmatpush3.bf16.msra.mxu1 %v7767_v22  ;;  %v7804_v22 = vld [vmem:[#allocation9 + $0x110] sm:$0xff]  }
 0x273   : > { %7148 = vmatprep.subr.bf16.mxu1 %v7770_v23  ;;  %v7805_v23 = vld [vmem:[#allocation9 + $0x180] sm:$0xff]  }
 0x275   : > { %7523 = vmatpush3.bf16.msra.mxu0 %v886_v17 }
 0x276   : > { %7174 = vmatprep.subr.bf16.mxu0 %v7768_v24  ;;  %7149 = vmatpush3.bf16.msra.mxu1 %v7771_v25 }
 0x277   : > { %7150 = vmatprep.subr.bf16.mxu1 %v7774_v26 }
 0x278   : > { %7489 = vmatmul.mubr.msk.bf16.gmra.mrb[12].mxu1 %vm999_vm1, %v7753_v27  ;;  %7525 = vmatmul.mubr.msk.bf16.vlgmr.msra.gmra.mrb[8].mxu0 %vm999_vm1, %v7751_v20 }
 0x279   : > { %7528 = vmatprep.mubr.msk.bf16.mxu0 %vm999_vm1, %v7752_v21  ;;  %7492 = vmatprep.mubr.msk.bf16.mxu1 %vm999_vm1, %v7754_v28 }
 0x27a   : > { %7175 = vmatpush3.bf16.msra.mxu0 %v7769_v29  ;;  %7151 = vmatpush3.bf16.msra.mxu1 %v7775_v30  ;;  %v7808_v30 = vld [vmem:[#allocation9 + $0x118] sm:$0xff]  }
 0x27b   : > { %7176 = vmatprep.subr.bf16.mxu0 %v7772_v31  ;;  %7152 = vmatprep.subr.bf16.mxu1 %v7778_v32  ;;  %v7809_v31 = vld [vmem:[#allocation9 + $0x188] sm:$0xff]  }
 0x27e   : > { %7177 = vmatpush3.bf16.msra.mxu0 %v7773_v33  ;;  %7153 = vmatpush3.bf16.msra.mxu1 %v7779_v34  ;;  %v7810_v33 = vld [vmem:[#allocation9 + $0x160] sm:$0xff]   ;;  %v7811_v34 = vld [vmem:[#allocation9 + $0x1d0] sm:$0xff]  }
 0x27f   : > { %7178 = vmatprep.subr.bf16.mxu0 %v7776_v35  ;;  %7154 = vmatprep.subr.bf16.mxu1 %v7782_v36 }
 0x280   : > { %7529 = vmatmul.mubr.msk.bf16.gmra.mrb[12].mxu0 %vm999_vm1, %v7753_v27  ;;  %7493 = vmatmul.mubr.msk.bf16.gmra.mrb[16].mxu1 %vm999_vm1, %v7755_v37  ;;  %v7806_v27 = vld [vmem:[#allocation9 + $0x158] sm:$0xff]  }
 0x281   : > { %7496 = vmatprep.mubr.msk.bf16.mxu1 %vm999_vm1, %v7756_v38  ;;  %7532 = vmatprep.mubr.msk.bf16.mxu0 %vm999_vm1, %v7754_v28  ;;  %v7807_v28 = vld [vmem:[#allocation9 + $0x1c8] sm:$0xff]  }
 0x282   : > { %7179 = vmatpush3.bf16.msra.mxu0 %v7777_v39  ;;  %7155 = vmatpush3.bf16.msra.mxu1 %v7783_v40  ;;  %v7812_v40 = vld [vmem:[#allocation9 + $0x120] sm:$0xff]  }
 0x283   : > { %7180 = vmatprep.subr.bf16.mxu0 %v7780_v41  ;;  %7156 = vmatprep.subr.bf16.mxu1 %v7786_v42  ;;  %v7813_v41 = vld [vmem:[#allocation9 + $0x190] sm:$0xff]  }
 0x286   : > { %7181 = vmatpush3.bf16.msra.mxu0 %v7781_v43  ;;  %7157 = vmatpush3.bf16.msra.mxu1 %v7787_v44 }
 0x287   : > { %7182 = vmatprep.subr.bf16.mxu0 %v7784_v45  ;;  %7158 = vmatprep.subr.bf16.mxu1 %v7790_v46 }
 0x288   : > { %7497 = vmatmul.mubr.msk.bf16.gmra.mrb[20].mxu1 %vm999_vm1, %v7757_v47  ;;  %7533 = vmatmul.mubr.msk.bf16.gmra.mrb[16].mxu0 %vm999_vm1, %v7755_v37 }
 0x289   : > { %7536 = vmatprep.mubr.msk.bf16.mxu0 %vm999_vm1, %v7756_v38  ;;  %7500 = vmatprep.mubr.msk.bf16.mxu1 %vm999_vm1, %v7758_v48 }
 0x28a   : > { %7183 = vmatpush3.bf16.msra.mxu0 %v7785_v49  ;;  %7159 = vmatpush3.bf16.msra.mxu1 %v7791_v50  ;;  %v7816_v50 = vld [vmem:[#allocation9 + $0x128] sm:$0xff]  }
 0x28b   : > { %7184 = vmatprep.subr.bf16.mxu0 %v7788_v51  ;;  %7160 = vmatprep.subr.bf16.mxu1 %v7794_v62  ;;  %v7817_v51 = vld [vmem:[#allocation9 + $0x198] sm:$0xff]  }
 0x28e   : > { %7185 = vmatpush3.bf16.msra.mxu0 %v7789_v52  ;;  %7161 = vmatpush3.bf16.msra.mxu1 %v7795_v63  ;;  %v7818_v52 = vld [vmem:[#allocation9 + $0x170] sm:$0xff]  }
 0x28f   : > { %7186 = vmatprep.subr.bf16.mxu0 %v7792_v53  ;;  %7202 = vmatprep.subr.bf16.mxu1 %v7796_v0  ;;  %v7819_v53 = vld [vmem:[#allocation9 + $0x1e0] sm:$0xff]  }
 0x290   : > { %7537 = vmatmul.mubr.msk.bf16.gmra.mrb[20].mxu0 %vm999_vm1, %v7757_v47  ;;  %7501 = vmatmul.mubr.msk.bf16.gmra.mrb[24].mxu1 %vm999_vm1, %v7759_v54  ;;  %v7814_v47 = vld [vmem:[#allocation9 + $0x168] sm:$0xff]  }
 0x291   : > { %7504 = vmatprep.mubr.msk.bf16.mxu1 %vm999_vm1, %v7760_v55  ;;  %7540 = vmatprep.mubr.msk.bf16.mxu0 %vm999_vm1, %v7758_v48  ;;  %v7815_v48 = vld [vmem:[#allocation9 + $0x1d8] sm:$0xff]  }
 0x292   : > { %7187 = vmatpush3.bf16.msra.mxu0 %v7793_v56 }
 0x293   : > { %7188 = vmatprep.subr.bf16.mxu0 %v7797_v1 }
 0x296   : > { %7189 = vmatpush3.bf16.msra.mxu0 %v7799_v2  ;;  %v7822_v2 = vld [vmem:[#allocation9 + $0x178] sm:$0xff]  }
 0x297   : > { %7230 = vmatprep.subr.bf16.mxu0 %v7803_v3  ;;  %v7823_v3 = vld [vmem:[#allocation9 + $0x1e8] sm:$0xff]  }
 0x298   : > { %7505 = vmatmul.mubr.msk.bf16.gmra.mrb[28].mxu1 %vm999_vm1, %v7761_v57  ;;  %7541 = vmatmul.mubr.msk.bf16.gmra.mrb[24].mxu0 %vm999_vm1, %v7759_v54 }
 0x299   : > { %7544 = vmatprep.mubr.msk.bf16.mxu0 %vm999_vm1, %v7760_v55  ;;  %7508 = vmatprep.mubr.msk.bf16.mxu1 %vm999_vm1, %v7762_v58 }
 0x2a0   : > { %7545 = vmatmul.mubr.msk.bf16.gmra.mrb[28].mxu0 %vm999_vm1, %v7761_v57  ;;  %7509 = vmatmul.mubr.msk.bf16.gmra.mrb[32].mxu1 %vm999_vm1, %v7763_v59 }
 0x2a1   : > { %7512 = vmatprep.mubr.msk.bf16.mxu1 %vm999_vm1, %v7764_v60  ;;  %7548 = vmatprep.mubr.msk.bf16.mxu0 %vm999_vm1, %v7762_v58 }
 0x2a8   : > { %7513 = vmatmul.mubr.msk.bf16.gmra.mrb[36].mxu1 %vm999_vm1, %v7765_v61  ;;  %7549 = vmatmul.mubr.msk.bf16.gmra.mrb[32].mxu0 %vm999_vm1, %v7763_v59 }
 0x2a9   : > { %7552 = vmatprep.mubr.msk.bf16.mxu0 %vm999_vm1, %v7764_v60  ;;  %v7820_v60 = vld [vmem:[#allocation9 + $0x130] sm:$0xff]  }
 0x2b0   : > { %7553 = vmatmul.mubr.msk.bf16.gmra.mrb[36].mxu0 %vm999_vm1, %v7765_v61  ;;  %v7821_v61 = vld [vmem:[#allocation9 + $0x1a0] sm:$0xff]  }
 0x343   : > { %v7486_v4 = vpop.f32.mrb[8].mxu1 }
 0x344   : > { %v1082_v5 = vpop.f32.mrb[9].mxu1 }
 0x345   : > { %v7487_v6 = vpop.f32.mrb[10].mxu1 }
 0x346   : > { %v1210_v7 = vpack.c.bf16 %v7487_v6, %v7486_v4  ;;  %v1085_v8 = vpop.f32.mrb[11].mxu1  ;;  %v7824_v6 = vld [vmem:[#allocation9 + $0x138] sm:$0xff]  }
 0x347   : > { %v1209_v11 = vpack.c.bf16 %v1085_v8, %v1082_v5  ;;  %v7826_v8 = vld [vmem:[#allocation9 + $0x1f0] sm:$0xff]  }
 0x348   : > { %2465 = vmatprep.mubr.bf16.mxu1 %v1210_v7  ;;  %v7825_v7 = vld [vmem:[#allocation9 + $0x1a8] sm:$0xff]  }
 0x349   : > { %2466 = vmatmul.mubr.bf16.vlgmr.msra.gmra.mrb[40].mxu1 %v1209_v11 }
 0x34a   : > { %7203 = vmatpush3.bf16.msra.mxu1 %v7798_v9  ;;  %v7827_v9 = vld [vmem:[#allocation9 + $0x240] sm:$0xff]  }
 0x34b   : > { %v7490_v14 = vpop.f32.mrb[12].mxu1  ;;  %7204 = vmatprep.subr.bf16.mxu1 %v7800_v12  ;;  %v7526_v16 = vpop.f32.mrb[8].mxu0 }
 0x34c   : > { %v1098_v10 = vpop.f32.mrb[13].mxu1  ;;  %v1259_v17 = vpop.f32.mrb[9].mxu0 }
 0x34d   : > { %v7491_v18 = vpop.f32.mrb[14].mxu1  ;;  %v7527_v19 = vpop.f32.mrb[10].mxu0 }
 0x34e   : > { %v1212_v20 = vpack.c.bf16 %v7491_v18, %v7490_v14  ;;  %7205 = vmatpush3.bf16.msra.mxu1 %v7801_v13  ;;  %v1101_v21 = vpop.f32.mrb[15].mxu1  ;;  %v1387_v24 = vpack.c.bf16 %v7527_v19, %v7526_v16  ;;  %v1262_v25 = vpop.f32.mrb[11].mxu0 }
 0x34f   : > { %v1211_v26 = vpack.c.bf16 %v1101_v21, %v1098_v10  ;;  %7206 = vmatprep.subr.bf16.mxu1 %v7802_v15  ;;  %v1386_v29 = vpack.c.bf16 %v1262_v25, %v1259_v17  ;;  %v7828_v10 = vld [vmem:[#allocation9 + $0x1b0] sm:$0xff]   ;;  %v7829_v17 = vld [vmem:[#allocation9 + $0x200] sm:$0xff]  }
 0x350   : > { %2514 = vmatprep.mubr.bf16.mxu0 %v1212_v20  ;;  %2473 = vmatprep.mubr.bf16.mxu1 %v1387_v24 }
 0x351   : > { %2515 = vmatmul.mubr.bf16.vlgmr.msra.gmra.mrb[40].mxu0 %v1211_v26  ;;  %2474 = vmatmul.mubr.bf16.gmra.mrb[44].mxu1 %v1386_v29  ;;  %v7832_v26 = vld [vmem:[#allocation9 + $0x1b8] sm:$0xff]   ;;  %v7835_v29 = vld [vmem:[#allocation9 + $0x2c0] sm:$0xff]  }
 0x352   : > { %7207 = vmatpush3.bf16.msra.mxu1 %v7804_v22  ;;  %7231 = vmatpush3.bf16.msra.mxu0 %v7805_v23  ;;  %v7830_v22 = vld [vmem:[#allocation9 + $0x1f8] sm:$0xff]   ;;  %v7831_v23 = vld [vmem:[#allocation9 + $0x248] sm:$0xff]  }
 0x353   : > { %7208 = vmatprep.subr.bf16.mxu1 %v7806_v27  ;;  %7232 = vmatprep.subr.bf16.mxu0 %v7807_v28  ;;  %v7530_v32 = vpop.f32.mrb[12].mxu0  ;;  %v7494_v35 = vpop.f32.mrb[16].mxu1  ;;  %v7833_v27 = vld [vmem:[#allocation9 + $0x208] sm:$0xff]   ;;  %v7834_v28 = vld [vmem:[#allocation9 + $0x250] sm:$0xff]  }
 0x354   : > { %v1275_v36 = vpop.f32.mrb[13].mxu0  ;;  %v8981_v37 = vpop.f32.mrb[17].mxu1 }
 0x355   : > { %v7531_v38 = vpop.f32.mrb[14].mxu0  ;;  %v7495_v39 = vpop.f32.mrb[18].mxu1 }
 0x356   : > { %7209 = vmatpush3.bf16.msra.mxu1 %v7808_v30  ;;  %7233 = vmatpush3.bf16.msra.mxu0 %v7809_v31  ;;  %v1389_v42 = vpack.c.bf16 %v7531_v38, %v7530_v32  ;;  %v1278_v43 = vpop.f32.mrb[15].mxu0  ;;  %v1214_v44 = vpack.c.bf16 %v7495_v39, %v7494_v35  ;;  %v8983_v45 = vpop.f32.mrb[19].mxu1 }
 0x357   : > { %7210 = vmatprep.subr.bf16.mxu1 %v7810_v33  ;;  %7234 = vmatprep.subr.bf16.mxu0 %v7811_v34  ;;  %v1388_v46 = vpack.c.bf16 %v1278_v43, %v1275_v36  ;;  %v1213_v49 = vpack.c.bf16 %v8983_v45, %v8981_v37  ;;  %v7836_v36 = vld [vmem:[#allocation9 + $0x210] sm:$0xff]   ;;  %v7837_v37 = vld [vmem:[#allocation9 + $0x280] sm:$0xff]   ;;  %v7839_v43 = vld [vmem:[#allocation9 + $0x2c8] sm:$0xff]  }
 0x358   : > { %2522 = vmatprep.mubr.bf16.mxu0 %v1389_v42  ;;  %2563 = vmatprep.mubr.bf16.mxu1 %v1214_v44  ;;  %v7838_v42 = vld [vmem:[#allocation9 + $0x258] sm:$0xff]  }
 0x359   : > { %2523 = vmatmul.mubr.bf16.gmra.mrb[44].mxu0 %v1388_v46  ;;  %v7840_v46 = vld [vmem:[#allocation9 + $0x218] sm:$0xff]  }
 0x35a   : > { %7211 = vmatpush3.bf16.msra.mxu1 %v7812_v40  ;;  %7235 = vmatpush3.bf16.msra.mxu0 %v7813_v41 }
 0x35b   : > { %7212 = vmatprep.subr.bf16.mxu1 %v7814_v47  ;;  %7236 = vmatprep.subr.bf16.mxu0 %v7815_v48  ;;  %v7498_v54 = vpop.f32.mrb[20].mxu1  ;;  %v7534_v55 = vpop.f32.mrb[16].mxu0  ;;  %v7841_v47 = vld [vmem:[#allocation9 + $0x288] sm:$0xff]   ;;  %v7842_v48 = vld [vmem:[#allocation9 + $0x260] sm:$0xff]  }
 0x35c   : > { %v8987_v56 = vpop.f32.mrb[21].mxu1  ;;  %v8989_v57 = vpop.f32.mrb[17].mxu0 }
 0x35d   : > { %v7499_v58 = vpop.f32.mrb[22].mxu1  ;;  %v7535_v59 = vpop.f32.mrb[18].mxu0 }
 0x35e   : > { %7213 = vmatpush3.bf16.msra.mxu1 %v7816_v50  ;;  %7237 = vmatpush3.bf16.msra.mxu0 %v7817_v51  ;;  %v1216_v62 = vpack.c.bf16 %v7499_v58, %v7498_v54  ;;  %v8991_v63 = vpop.f32.mrb[23].mxu1  ;;  %v1391_v0 = vpack.c.bf16 %v7535_v59, %v7534_v55  ;;  %v8993_v1 = vpop.f32.mrb[19].mxu0 }
 0x35f   : > { %7214 = vmatprep.subr.bf16.mxu1 %v7818_v52  ;;  %7238 = vmatprep.subr.bf16.mxu0 %v7819_v53  ;;  %v1215_v4 = vpack.c.bf16 %v8991_v63, %v8987_v56  ;;  %v1390_v5 = vpack.c.bf16 %v8993_v1, %v8989_v57  ;;  %v7844_v56 = vld [vmem:[#allocation9 + $0x220] sm:$0xff]   ;;  %v7845_v57 = vld [vmem:[#allocation9 + $0x290] sm:$0xff]   ;;  %v7847_v63 = vld [vmem:[#allocation9 + $0x2d8] sm:$0xff]  }
 0x360   : > { %2612 = vmatprep.mubr.bf16.mxu0 %v1216_v62  ;;  %v7846_v62 = vld [vmem:[#allocation9 + $0x268] sm:$0xff]  }
 0x362   : > { %7215 = vmatpush3.bf16.msra.mxu1 %v7820_v60  ;;  %7239 = vmatpush3.bf16.msra.mxu0 %v7821_v61 }
 0x363   : > { %7216 = vmatprep.subr.bf16.mxu1 %v7822_v2  ;;  %7240 = vmatprep.subr.bf16.mxu0 %v7823_v3  ;;  %v7538_v11 = vpop.f32.mrb[20].mxu0  ;;  %v7502_v12 = vpop.f32.mrb[24].mxu1  ;;  %v7848_v2 = vld [vmem:[#allocation9 + $0x228] sm:$0xff]   ;;  %v7849_v3 = vld [vmem:[#allocation9 + $0x298] sm:$0xff]  }
 0x364   : > { %v8999_v13 = vpop.f32.mrb[21].mxu0  ;;  %v9001_v14 = vpop.f32.mrb[25].mxu1 }
 0x365   : > { %v7539_v15 = vpop.f32.mrb[22].mxu0  ;;  %v7503_v16 = vpop.f32.mrb[26].mxu1 }
 0x366   : > { %7217 = vmatpush3.bf16.msra.mxu1 %v7824_v6  ;;  %7241 = vmatpush3.bf16.msra.mxu0 %v7825_v7  ;;  %v1393_v18 = vpack.c.bf16 %v7539_v15, %v7538_v11  ;;  %v9003_v19 = vpop.f32.mrb[23].mxu0  ;;  %v1218_v20 = vpack.c.bf16 %v7503_v16, %v7502_v12  ;;  %v9005_v21 = vpop.f32.mrb[27].mxu1  ;;  %v7853_v15 = vld [vmem:[#allocation9 + $0x2a0] sm:$0xff]  }
 0x367   : > { %7242 = vmatprep.subr.bf16.mxu0 %v7826_v8  ;;  %7258 = vmatprep.subr.bf16.mxu1 %v7827_v9  ;;  %v1392_v24 = vpack.c.bf16 %v9003_v19, %v8999_v13  ;;  %v1217_v25 = vpack.c.bf16 %v9005_v21, %v9001_v14  ;;  %v7852_v13 = vld [vmem:[#allocation9 + $0x230] sm:$0xff]   ;;  %v7854_v19 = vld [vmem:[#allocation9 + $0x278] sm:$0xff]   ;;  %v7871_v21 = vld [vmem:[#allocation9 + $0x3c8] sm:$0xff]  }
 0x368   : > { %v7870_v14 = vld [vmem:[#allocation9 + $0x358] sm:$0xff]  }
 0x369   : > { %2564 = vmatmul.mubr.bf16.vlgmr.msra.gmra.mrb[48].mxu1 %v1213_v49  ;;  %v7843_v49 = vld [vmem:[#allocation9 + $0x2d0] sm:$0xff]  }
 0x36a   : > { %7243 = vmatpush3.bf16.msra.mxu0 %v7828_v10  ;;  %7259 = vmatpush3.bf16.msra.mxu1 %v7829_v17 }
 0x36b   : > { %7244 = vmatprep.subr.bf16.mxu0 %v7830_v22  ;;  %7260 = vmatprep.subr.bf16.mxu1 %v7831_v23  ;;  %v9011_v30 = vpop.f32.mrb[28].mxu1  ;;  %v9013_v31 = vpop.f32.mrb[24].mxu0 }
 0x36c   : > { %2571 = vmatprep.mubr.bf16.mxu1 %v1391_v0  ;;  %v9015_v32 = vpop.f32.mrb[29].mxu1  ;;  %v9017_v33 = vpop.f32.mrb[25].mxu0 }
 0x36d   : > { %v7507_v34 = vpop.f32.mrb[30].mxu1  ;;  %v9019_v35 = vpop.f32.mrb[26].mxu0 }
 0x36e   : > { %7245 = vmatpush3.bf16.msra.mxu0 %v7832_v26  ;;  %7261 = vmatpush3.bf16.msra.mxu1 %v7833_v27  ;;  %v1220_v38 = vpack.c.bf16 %v7507_v34, %v9011_v30  ;;  %v9022_v39 = vpop.f32.mrb[31].mxu1  ;;  %v1395_v40 = vpack.c.bf16 %v9019_v35, %v9013_v31  ;;  %v9026_v41 = vpop.f32.mrb[27].mxu0  ;;  %v7857_v26 = vld [vmem:[#allocation9 + $0x2a8] sm:$0xff]   ;;  %v7858_v27 = vld [vmem:[#allocation9 + $0x2f0] sm:$0xff]   ;;  %v7874_v35 = vld [vmem:[#allocation9 + $0x360] sm:$0xff]  }
 0x36f   : > { %7262 = vmatprep.subr.bf16.mxu1 %v7834_v28  ;;  %7286 = vmatprep.subr.bf16.mxu0 %v7835_v29  ;;  %v1219_v44 = vpack.c.bf16 %v9022_v39, %v9015_v32  ;;  %v1394_v45 = vpack.c.bf16 %v9026_v41, %v9017_v33  ;;  %v7859_v28 = vld [vmem:[#allocation9 + $0x340] sm:$0xff]   ;;  %v7873_v31 = vld [vmem:[#allocation9 + $0x388] sm:$0xff]   ;;  %v7877_v33 = vld [vmem:[#allocation9 + $0x390] sm:$0xff]  }
 0x370   : > { %v7876_v32 = vld [vmem:[#allocation9 + $0x320] sm:$0xff]   ;;  %v7878_v39 = vld [vmem:[#allocation9 + $0x368] sm:$0xff]   ;;  %v7879_v41 = vld [vmem:[#allocation9 + $0x3d8] sm:$0xff]  }
 0x371   : > { %2572 = vmatmul.mubr.bf16.gmra.mrb[52].mxu1 %v1390_v5  ;;  %2613 = vmatmul.mubr.bf16.vlgmr.msra.gmra.mrb[48].mxu0 %v1215_v4  ;;  %v7850_v4 = vld [vmem:[#allocation9 + $0x270] sm:$0xff]   ;;  %v7851_v5 = vld [vmem:[#allocation9 + $0x2e0] sm:$0xff]  }
 0x372   : > { %7263 = vmatpush3.bf16.msra.mxu1 %v7836_v36  ;;  %7287 = vmatpush3.bf16.msra.mxu0 %v7837_v37  ;;  %v7860_v36 = vld [vmem:[#allocation9 + $0x2b0] sm:$0xff]   ;;  %v7861_v37 = vld [vmem:[#allocation9 + $0x300] sm:$0xff]  }
 0x373   : > { %7264 = vmatprep.subr.bf16.mxu1 %v7838_v42  ;;  %7288 = vmatprep.subr.bf16.mxu0 %v7839_v43  ;;  %v9032_v50 = vpop.f32.mrb[28].mxu0  ;;  %v9034_v51 = vpop.f32.mrb[32].mxu1  ;;  %v7862_v43 = vld [vmem:[#allocation9 + $0x2f8] sm:$0xff]  }
 0x374   : > { %2620 = vmatprep.mubr.bf16.mxu0 %v1393_v18  ;;  %2661 = vmatprep.mubr.bf16.mxu1 %v1218_v20  ;;  %v9036_v52 = vpop.f32.mrb[29].mxu0  ;;  %v9038_v53 = vpop.f32.mrb[33].mxu1  ;;  %v7855_v20 = vld [vmem:[#allocation9 + $0x2e8] sm:$0xff]  }
 0x375   : > { %v9040_v54 = vpop.f32.mrb[30].mxu0  ;;  %v9042_v55 = vpop.f32.mrb[34].mxu1 }
 0x376   : > { %7265 = vmatpush3.bf16.msra.mxu1 %v7840_v46  ;;  %7289 = vmatpush3.bf16.msra.mxu0 %v7841_v47  ;;  %v1397_v58 = vpack.c.bf16 %v9040_v54, %v9032_v50  ;;  %v9046_v59 = vpop.f32.mrb[31].mxu0  ;;  %v1222_v60 = vpack.c.bf16 %v9042_v55, %v9034_v51  ;;  %v9050_v61 = vpop.f32.mrb[35].mxu1  ;;  %v7863_v46 = vld [vmem:[#allocation9 + $0x348] sm:$0xff]   ;;  %v7882_v50 = vld [vmem:[#allocation9 + $0x370] sm:$0xff]   ;;  %v7883_v51 = vld [vmem:[#allocation9 + $0x3e0] sm:$0xff]  }
 0x377   : > { %7266 = vmatprep.subr.bf16.mxu1 %v7842_v48  ;;  %7290 = vmatprep.subr.bf16.mxu0 %v7843_v49  ;;  %v1396_v0 = vpack.c.bf16 %v9046_v59, %v9036_v52  ;;  %v1221_v1 = vpack.c.bf16 %v9050_v61, %v9038_v53  ;;  %v7864_v48 = vld [vmem:[#allocation9 + $0x2b8] sm:$0xff]   ;;  %v7865_v49 = vld [vmem:[#allocation9 + $0x308] sm:$0xff]   ;;  %v7884_v54 = vld [vmem:[#allocation9 + $0x330] sm:$0xff]  }
 0x378   : > { %v7885_v55 = vld [vmem:[#allocation9 + $0x3a0] sm:$0xff]   ;;  %v7886_v52 = vld [vmem:[#allocation9 + $0x378] sm:$0xff]  }
 0x379   : > { %2621 = vmatmul.mubr.bf16.gmra.mrb[52].mxu0 %v1392_v24  ;;  %v7856_v24 = vld [vmem:[#allocation9 + $0x238] sm:$0xff]  }
 0x37a   : > { %7267 = vmatpush3.bf16.msra.mxu1 %v7844_v56  ;;  %7291 = vmatpush3.bf16.msra.mxu0 %v7845_v57  ;;  %v7866_v56 = vld [vmem:[#allocation9 + $0x350] sm:$0xff]   ;;  %v7867_v57 = vld [vmem:[#allocation9 + $0x3c0] sm:$0xff]   ;;  %v7888_v59 = vld [vmem:[#allocation9 + $0x338] sm:$0xff]  }
 0x37b   : > { %7268 = vmatprep.subr.bf16.mxu1 %v7846_v62  ;;  %7292 = vmatprep.subr.bf16.mxu0 %v7847_v63  ;;  %v9059_v6 = vpop.f32.mrb[36].mxu1  ;;  %v9061_v7 = vpop.f32.mrb[32].mxu0  ;;  %v7868_v62 = vld [vmem:[#allocation9 + $0x310] sm:$0xff]   ;;  %v7869_v63 = vld [vmem:[#allocation9 + $0x380] sm:$0xff]  }
 0x37c   : > { %2710 = vmatprep.mubr.bf16.mxu0 %v1220_v38  ;;  %v9063_v8 = vpop.f32.mrb[37].mxu1  ;;  %v9065_v9 = vpop.f32.mrb[33].mxu0 }
 0x37d   : > { %v9067_v11 = vpop.f32.mrb[38].mxu1  ;;  %v9069_v12 = vpop.f32.mrb[34].mxu0 }
 0x37e   : > { %7269 = vmatpush3.bf16.msra.mxu1 %v7848_v2  ;;  %7293 = vmatpush3.bf16.msra.mxu0 %v7849_v3  ;;  %v1224_v16 = vpack.c.bf16 %v9067_v11, %v9059_v6  ;;  %v1399_v10 = vpack.c.bf16 %v9069_v12, %v9061_v7  ;;  %v9075_v17 = vpop.f32.mrb[39].mxu1  ;;  %v9077_v18 = vpop.f32.mrb[35].mxu0  ;;  %v7891_v2 = vld [vmem:[#allocation9 + $0x3b0] sm:$0xff]   ;;  %v7892_v3 = vld [vmem:[#allocation9 + $0x3f8] sm:$0xff]  }
 0x37f   : > { %7270 = vmatprep.subr.bf16.mxu1 %v7850_v4  ;;  %7294 = vmatprep.subr.bf16.mxu0 %v7851_v5  ;;  %v1223_v22 = vpack.c.bf16 %v9075_v17, %v9063_v8  ;;  %v1398_v23 = vpack.c.bf16 %v9077_v18, %v9065_v9  ;;  %v7893_v4 = vld [vmem:[#allocation9 + $0x3b8] sm:$0xff]   ;;  %v6637_v9 = vld [vmem:[#allocation11] ss:$0 sm:$0xff] }
 0x382   : > { %7271 = vmatpush3.bf16.msra.mxu1 %v7852_v13  ;;  %7295 = vmatpush3.bf16.msra.mxu0 %v7853_v15 }
 0x383   : > { %7272 = vmatprep.subr.bf16.mxu1 %v7854_v19  ;;  %7296 = vmatprep.subr.bf16.mxu0 %v7855_v20  ;;  %v9083_v29 = vpop.f32.mrb[36].mxu0 }
 0x384   : > { %v9085_v30 = vpop.f32.mrb[37].mxu0 }
 0x385   : > { %v9087_v34 = vpop.f32.mrb[38].mxu0 }
 0x386   : > { %7273 = vmatpush3.bf16.msra.mxu1 %v7856_v24  ;;  %7297 = vmatpush3.bf16.msra.mxu0 %v7857_v26  ;;  %v1401_v38 = vpack.c.bf16 %v9087_v34, %v9083_v29  ;;  %v9091_v42 = vpop.f32.mrb[39].mxu0 }
 0x387   : > { %7298 = vmatprep.subr.bf16.mxu0 %v7858_v27  ;;  %7314 = vmatprep.subr.bf16.mxu1 %v7859_v28  ;;  %v1400_v47 = vpack.c.bf16 %v9091_v42, %v9085_v30 }
 0x389   : > { %2662 = vmatmul.mubr.bf16.vlgmr.msra.gmra.mrb[56].mxu1 %v1217_v25  ;;  %v7872_v25 = vld [vmem:[#allocation9 + $0x318] sm:$0xff]  }
 0x38a   : > { %7299 = vmatpush3.bf16.msra.mxu0 %v7860_v36  ;;  %7315 = vmatpush3.bf16.msra.mxu1 %v7861_v37 }
 0x38b   : > { %7300 = vmatprep.subr.bf16.mxu0 %v7862_v43  ;;  %7316 = vmatprep.subr.bf16.mxu1 %v7863_v46 }
 0x38c   : > { %2669 = vmatprep.mubr.bf16.mxu1 %v1395_v40  ;;  %v7875_v40 = vld [vmem:[#allocation9 + $0x3d0] sm:$0xff]  }
 0x38e   : > { %7301 = vmatpush3.bf16.msra.mxu0 %v7864_v48  ;;  %7317 = vmatpush3.bf16.msra.mxu1 %v7865_v49 }
 0x38f   : > { %7318 = vmatprep.subr.bf16.mxu1 %v7866_v56  ;;  %7342 = vmatprep.subr.bf16.mxu0 %v7867_v57 }
 0x391   : > { %2670 = vmatmul.mubr.bf16.gmra.mrb[60].mxu1 %v1394_v45  ;;  %2711 = vmatmul.mubr.bf16.vlgmr.msra.gmra.mrb[56].mxu0 %v1219_v44  ;;  %v7880_v44 = vld [vmem:[#allocation9 + $0x328] sm:$0xff]   ;;  %v7881_v45 = vld [vmem:[#allocation9 + $0x398] sm:$0xff]  }
 0x392   : > { %7319 = vmatpush3.bf16.msra.mxu1 %v7868_v62  ;;  %7343 = vmatpush3.bf16.msra.mxu0 %v7869_v63 }
 0x393   : > { %7320 = vmatprep.subr.bf16.mxu1 %v7870_v14  ;;  %7344 = vmatprep.subr.bf16.mxu0 %v7871_v21 }
 0x394   : > { %2718 = vmatprep.mubr.bf16.mxu0 %v1397_v58  ;;  %2759 = vmatprep.mubr.bf16.mxu1 %v1222_v60  ;;  %v7887_v58 = vld [vmem:[#allocation9 + $0x3e8] sm:$0xff]  }
 0x395   : > { %v7889_v60 = vld [vmem:[#allocation9 + $0x3a8] sm:$0xff]  }
 0x396   : > { %7321 = vmatpush3.bf16.msra.mxu1 %v7872_v25  ;;  %7345 = vmatpush3.bf16.msra.mxu0 %v7873_v31 }
 0x397   : > { %7322 = vmatprep.subr.bf16.mxu1 %v7874_v35  ;;  %7346 = vmatprep.subr.bf16.mxu0 %v7875_v40 }
 0x399   : > { %2719 = vmatmul.mubr.bf16.gmra.mrb[60].mxu0 %v1396_v0  ;;  %v7890_v0 = vld [vmem:[#allocation9 + $0x3f0] sm:$0xff]  }
 0x39a   : > { %7323 = vmatpush3.bf16.msra.mxu1 %v7876_v32  ;;  %7347 = vmatpush3.bf16.msra.mxu0 %v7877_v33 }
 0x39b   : > { %7324 = vmatprep.subr.bf16.mxu1 %v7878_v39  ;;  %7348 = vmatprep.subr.bf16.mxu0 %v7879_v41 }
 0x39c   : > { %2808 = vmatprep.mubr.bf16.mxu0 %v1224_v16 }
 0x39e   : > { %7325 = vmatpush3.bf16.msra.mxu1 %v7880_v44  ;;  %7349 = vmatpush3.bf16.msra.mxu0 %v7881_v45 }
 0x39f   : > { %7326 = vmatprep.subr.bf16.mxu1 %v7882_v50  ;;  %7350 = vmatprep.subr.bf16.mxu0 %v7883_v51 }
 0x3a2   : > { %7327 = vmatpush3.bf16.msra.mxu1 %v7884_v54  ;;  %7351 = vmatpush3.bf16.msra.mxu0 %v7885_v55 }
 0x3a3   : > { %7328 = vmatprep.subr.bf16.mxu1 %v7886_v52  ;;  %7352 = vmatprep.subr.bf16.mxu0 %v7887_v58 }
 0x3a6   : > { %7329 = vmatpush3.bf16.msra.mxu1 %v7888_v59  ;;  %7353 = vmatpush3.bf16.msra.mxu0 %v7889_v60 }
 0x3a7   : > { %7354 = vmatprep.subr.bf16.mxu0 %v7890_v0 }
 0x3a9   : > { %2760 = vmatmul.mubr.bf16.vlgmr.msra.gmra.mrb[64].mxu1 %v1221_v1 }
 0x3aa   : > { %7355 = vmatpush3.bf16.msra.mxu0 %v7891_v2  ;;  %2767 = vmatprep.mubr.bf16.mxu1 %v1399_v10 }
 0x3ab   : > { %7356 = vmatprep.subr.bf16.mxu0 %v7892_v3 }
 0x3ae   : > { %7357 = vmatpush3.bf16.msra.mxu0 %v7893_v4 }
 0x3b1   : > { %2768 = vmatmul.mubr.bf16.gmra.mrb[68].mxu1 %v1398_v23  ;;  %2809 = vmatmul.mubr.bf16.vlgmr.msra.gmra.mrb[64].mxu0 %v1223_v22 }
 0x3b2   : > { %2816 = vmatprep.mubr.bf16.mxu0 %v1401_v38 }
 0x3b9   : > { %2817 = vmatmul.mubr.bf16.gmra.mrb[68].mxu0 %v1400_v47 }
 0x41c   : > { %v7162_v53 = vpop.f32.mrb[40].mxu1 }
 0x41d   : > { %v7163_v61 = vpop.f32.mrb[41].mxu1 }
 0x41e   : > { %v7164_v1 = vadd.f32 %v7163_v61, %v7162_v53  ;;  %v7165_v5 = vpop.f32.mrb[42].mxu1 }
 0x41f   : > { %v7166_v6 = vpop.f32.mrb[43].mxu1 }
 0x420   : > { %v7167_v7 = vadd.f32 %v7166_v6, %v7165_v5  ;;  %v2468_v15 = vadd.f32 %v7164_v1, %v6637_v9 }
 0x422   : > { %v2471_v22 = vadd.f32 %v7167_v7, %v6637_v9 }
 0x424   : > { %v7190_v11 = vpop.f32.mrb[40].mxu0  ;;  %v7168_v12 = vpop.f32.mrb[44].mxu1 }
 0x425   : > { %v7191_v13 = vpop.f32.mrb[41].mxu0  ;;  %v7169_v8 = vpop.f32.mrb[45].mxu1 }
 0x426   : > { %v7192_v16 = vadd.f32 %v7191_v13, %v7190_v11  ;;  %v7193_v10 = vpop.f32.mrb[42].mxu0  ;;  %v7170_v17 = vadd.f32 %v7169_v8, %v7168_v12  ;;  %v7171_v18 = vpop.f32.mrb[46].mxu1 }
 0x427   : > { %v7194_v19 = vpop.f32.mrb[43].mxu0  ;;  %v7172_v20 = vpop.f32.mrb[47].mxu1 }
 0x428   : > { %v2517_v23 = vadd.f32 %v7192_v16, %v2468_v15  ;;  %v7195_v24 = vadd.f32 %v7194_v19, %v7193_v10  ;;  %v7173_v26 = vadd.f32 %v7172_v20, %v7171_v18  ;;  %v2476_v28 = vadd.f32 %v7170_v17, %v6637_v9 }
 0x42a   : > { %v2520_v27 = vadd.f32 %v7195_v24, %v2471_v22  ;;  %v2479_v34 = vadd.f32 %v7173_v26, %v6637_v9 }
 0x42c   : > { %v7196_v29 = vpop.f32.mrb[44].mxu0 }
 0x42d   : > { %v7197_v30 = vpop.f32.mrb[45].mxu0 }
 0x42e   : > { %v7198_v36 = vadd.f32 %v7197_v30, %v7196_v29  ;;  %v7199_v37 = vpop.f32.mrb[46].mxu0  ;;  %v8424_v30 = vmov 0.0  }
 0x42f   : > { %v7200_v38 = vpop.f32.mrb[47].mxu0  ;;  %3144 = vst [vmem:[#allocation3] sm:$0xff] %v8424_v30  ;;  %3145 = vst [vmem:[#allocation3 + $0x8] sm:$0xff] %v8424_v30 }
 0x430   : > { %v2525_v42 = vadd.f32 %v7198_v36, %v2476_v28  ;;  %v7201_v43 = vadd.f32 %v7200_v38, %v7199_v37 }
 0x432   : > { %v2528_v46 = vadd.f32 %v7201_v43, %v2479_v34 }
 0x43c   : > { %v7218_v47 = vpop.f32.mrb[48].mxu1 }
 0x43d   : > { %v7219_v48 = vpop.f32.mrb[49].mxu1 }
 0x43e   : > { %v7220_v49 = vadd.f32 %v7219_v48, %v7218_v47  ;;  %v7221_v56 = vpop.f32.mrb[50].mxu1 }
 0x43f   : > { %v7222_v57 = vpop.f32.mrb[51].mxu1 }
 0x440   : > { %v2566_v62 = vadd.f32 %v7220_v49, %v2517_v23  ;;  %v7223_v63 = vadd.f32 %v7222_v57, %v7221_v56 }
 0x442   : > { %v2569_v14 = vadd.f32 %v7223_v63, %v2520_v27 }
 0x444   : > { %v7224_v21 = vpop.f32.mrb[52].mxu1  ;;  %v7246_v25 = vpop.f32.mrb[48].mxu0 }
 0x445   : > { %v7225_v31 = vpop.f32.mrb[53].mxu1  ;;  %v7247_v35 = vpop.f32.mrb[49].mxu0 }
 0x446   : > { %v7226_v40 = vadd.f32 %v7225_v31, %v7224_v21  ;;  %v7248_v32 = vadd.f32 %v7247_v35, %v7246_v25  ;;  %v7227_v33 = vpop.f32.mrb[54].mxu1  ;;  %v7249_v39 = vpop.f32.mrb[50].mxu0 }
 0x447   : > { %v7228_v41 = vpop.f32.mrb[55].mxu1  ;;  %v7250_v44 = vpop.f32.mrb[51].mxu0 }
 0x448   : > { %v2574_v45 = vadd.f32 %v7226_v40, %v2525_v42  ;;  %v2615_v50 = vadd.f32 %v7248_v32, %v2566_v62  ;;  %v7229_v51 = vadd.f32 %v7228_v41, %v7227_v33  ;;  %v7251_v54 = vadd.f32 %v7250_v44, %v7249_v39 }
 0x44a   : > { %v2577_v55 = vadd.f32 %v7229_v51, %v2528_v46  ;;  %v2618_v52 = vadd.f32 %v7251_v54, %v2569_v14 }
 0x44c   : > { %v7252_v58 = vpop.f32.mrb[52].mxu0 }
 0x44d   : > { %v7253_v59 = vpop.f32.mrb[53].mxu0 }
 0x44e   : > { %v7254_v60 = vadd.f32 %v7253_v59, %v7252_v58  ;;  %v7255_v0 = vpop.f32.mrb[54].mxu0 }
 0x44f   : > { %v7256_v2 = vpop.f32.mrb[55].mxu0 }
 0x450   : > { %v2623_v3 = vadd.f32 %v7254_v60, %v2574_v45  ;;  %v7257_v4 = vadd.f32 %v7256_v2, %v7255_v0 }
 0x452   : > { %v2626_v53 = vadd.f32 %v7257_v4, %v2577_v55 }
 0x45c   : > { %v7274_v61 = vpop.f32.mrb[56].mxu1 }
 0x45d   : > { %v7275_v1 = vpop.f32.mrb[57].mxu1 }
 0x45e   : > { %v7276_v5 = vadd.f32 %v7275_v1, %v7274_v61  ;;  %v7277_v6 = vpop.f32.mrb[58].mxu1 }
 0x45f   : > { %v7278_v7 = vpop.f32.mrb[59].mxu1 }
 0x460   : > { %v2664_v9 = vadd.f32 %v7276_v5, %v2615_v50  ;;  %v7279_v11 = vadd.f32 %v7278_v7, %v7277_v6 }
 0x462   : > { %v2667_v12 = vadd.f32 %v7279_v11, %v2618_v52 }
 0x464   : > { %v7280_v13 = vpop.f32.mrb[60].mxu1  ;;  %v7302_v8 = vpop.f32.mrb[56].mxu0 }
 0x465   : > { %v7281_v15 = vpop.f32.mrb[61].mxu1  ;;  %v7303_v16 = vpop.f32.mrb[57].mxu0 }
 0x466   : > { %v7282_v10 = vadd.f32 %v7281_v15, %v7280_v13  ;;  %v7304_v17 = vadd.f32 %v7303_v16, %v7302_v8  ;;  %v7283_v18 = vpop.f32.mrb[62].mxu1  ;;  %v7305_v19 = vpop.f32.mrb[58].mxu0 }
 0x467   : > { %v7284_v20 = vpop.f32.mrb[63].mxu1  ;;  %v7306_v22 = vpop.f32.mrb[59].mxu0 }
 0x468   : > { %v2672_v23 = vadd.f32 %v7282_v10, %v2623_v3  ;;  %v2713_v24 = vadd.f32 %v7304_v17, %v2664_v9  ;;  %v7285_v26 = vadd.f32 %v7284_v20, %v7283_v18  ;;  %v7307_v27 = vadd.f32 %v7306_v22, %v7305_v19 }
 0x46a   : > { %v2675_v28 = vadd.f32 %v7285_v26, %v2626_v53  ;;  %v2716_v29 = vadd.f32 %v7307_v27, %v2667_v12 }
 0x46c   : > { %v7308_v34 = vpop.f32.mrb[60].mxu0 }
 0x46d   : > { %v7309_v36 = vpop.f32.mrb[61].mxu0 }
 0x46e   : > { %v7310_v37 = vadd.f32 %v7309_v36, %v7308_v34  ;;  %v7311_v38 = vpop.f32.mrb[62].mxu0 }
 0x46f   : > { %v7312_v42 = vpop.f32.mrb[63].mxu0 }
 0x470   : > { %v2721_v43 = vadd.f32 %v7310_v37, %v2672_v23  ;;  %v7313_v46 = vadd.f32 %v7312_v42, %v7311_v38 }
 0x472   : > { %v2724_v47 = vadd.f32 %v7313_v46, %v2675_v28  ;;  %v6766_v46 = vld [vmem:[#allocation12] ss:$0 sm:$0xff] }
 0x47c   : > { %v7330_v48 = vpop.f32.mrb[64].mxu1 }
 0x47d   : > { %v7331_v49 = vpop.f32.mrb[65].mxu1 }
 0x47e   : > { %v7332_v56 = vadd.f32 %v7331_v49, %v7330_v48  ;;  %v7333_v57 = vpop.f32.mrb[66].mxu1 }
 0x47f   : > { %v7334_v62 = vpop.f32.mrb[67].mxu1 }
 0x480   : > { %v2762_v63 = vadd.f32 %v7332_v56, %v2713_v24  ;;  %v7335_v14 = vadd.f32 %v7334_v62, %v7333_v57  ;;  %v6767_v57 = vld [vmem:[#allocation14] ss:$0 sm:$0xff]  ;;  %v8425_v62 = vmov 1966171168  }
 0x482   : > { %v2765_v21 = vadd.f32 %v7335_v14, %v2716_v29  ;;  %v2914_v14 = vlaneseq }
 0x484   : > { %v7336_v25 = vpop.f32.mrb[68].mxu1  ;;  %v7358_v31 = vpop.f32.mrb[64].mxu0  ;;  %vm9143_vm6 = vcmp.lt.s32.totalorder %v2914_v14, 512 }
 0x485   : > { %v7337_v35 = vpop.f32.mrb[69].mxu1  ;;  %v7359_v40 = vpop.f32.mrb[65].mxu0 }
 0x486   : > { %v7338_v32 = vadd.f32 %v7337_v35, %v7336_v25  ;;  %v7360_v33 = vadd.f32 %v7359_v40, %v7358_v31  ;;  %v7339_v39 = vpop.f32.mrb[70].mxu1  ;;  %v7361_v41 = vpop.f32.mrb[66].mxu0 }
 0x487   : > { %v7340_v44 = vpop.f32.mrb[71].mxu1  ;;  %v7362_v45 = vpop.f32.mrb[67].mxu0 }
 0x488   : > { %v2770_v50 = vadd.f32 %v7338_v32, %v2721_v43  ;;  %v2811_v51 = vadd.f32 %v7360_v33, %v2762_v63  ;;  %v7341_v54 = vadd.f32 %v7340_v44, %v7339_v39  ;;  %v7363_v55 = vadd.f32 %v7362_v45, %v7361_v41 }
 0x489   : > { %v2912_v63 = vunpack.c.l.s4 %v8425_v62  ;;  %v2915_v44 = vshrl.u32 %v2914_v14, 7 }
 0x48a   : > { %v2773_v52 = vadd.f32 %v7341_v54, %v2724_v47  ;;  %v2814_v58 = vadd.f32 %v7363_v55, %v2765_v21 }
 0x48b   : > { %v2913_v41 = vunpack.c.0.s8 %v2912_v63 }
 0x48c   : > { %v2827_v59 = vadd.f32 %v2814_v58, %v2811_v51  ;;  %v7364_v60 = vpop.f32.mrb[68].mxu0 }
 0x48d   : > { %v7365_v0 = vpop.f32.mrb[69].mxu0 }
 0x48e   : > { %v7366_v2 = vadd.f32 %v7365_v0, %v7364_v60  ;;  %v7367_v3 = vpop.f32.mrb[70].mxu0 }
 0x48f   : > { %v7368_v4 = vpop.f32.mrb[71].mxu0 }
 0x490   : > { %v2819_v53 = vadd.f32 %v7366_v2, %v2770_v50  ;;  %v7369_v61 = vadd.f32 %v7368_v4, %v7367_v3 }
 0x492   : > { %v2828_v1 = vadd.f32 %v2827_v59, %v2819_v53  ;;  %v2822_v5 = vadd.f32 %v7369_v61, %v2773_v52  ;;  %v9139_v59 = vsub.s32 %v2913_v41, %v2915_v44 }
 0x494   : > { %v2829_v6 = vadd.f32 %v2828_v1, %v2822_v5 }
 0x496   : > { %v2830_v7 = vrot.slane %v2829_v6, 4 }
 0x498   : > { %v2831_v9 = vadd.f32 %v2830_v7, %v2829_v6 }
 0x49a   : > { %v2832_v11 = vrot.slane %v2831_v9, 2 }
 0x49c   : > { %v2833_v12 = vadd.f32 %v2832_v11, %v2831_v9 }
 0x49e   : > { %v2834_v13 = vrot.slane %v2833_v12, 1 }
 0x4a0   : > { %v2835_v8 = vadd.f32 %v2834_v13, %v2833_v12 }
 0x4a2   : > { %v2836_v15 = vmul.f32 0.03125, %v2835_v8 }
 0x4a4   : > { %v2837_v16 = vsub.f32 %v2811_v51, %v2836_v15  ;;  %v2838_v10 = vsub.f32 %v2814_v58, %v2836_v15  ;;  %v2839_v17 = vsub.f32 %v2819_v53, %v2836_v15  ;;  %v2840_v18 = vsub.f32 %v2822_v5, %v2836_v15 }
 0x4a6   : > { %v2841_v19 = vmul.f32 %v2837_v16, %v2837_v16  ;;  %v2842_v20 = vmul.f32 %v2838_v10, %v2838_v10  ;;  %v2843_v22 = vmul.f32 %v2839_v17, %v2839_v17  ;;  %v2844_v24 = vmul.f32 %v2840_v18, %v2840_v18 }
 0x4a8   : > { %v2845_v23 = vadd.f32 %v2842_v20, %v2841_v19 }
 0x4aa   : > { %v2846_v26 = vadd.f32 %v2845_v23, %v2843_v22 }
 0x4ac   : > { %v2847_v27 = vadd.f32 %v2846_v26, %v2844_v24 }
 0x4ae   : > { %v2848_v28 = vrot.slane %v2847_v27, 4 }
 0x4b0   : > { %v2849_v29 = vadd.f32 %v2848_v28, %v2847_v27 }
 0x4b2   : > { %v2850_v30 = vrot.slane %v2849_v29, 2 }
 0x4b4   : > { %v2851_v34 = vadd.f32 %v2850_v30, %v2849_v29 }
 0x4b6   : > { %v2852_v36 = vrot.slane %v2851_v34, 1 }
 0x4b8   : > { %v2853_v37 = vadd.f32 %v2852_v36, %v2851_v34 }
 0x4ba   : > { %v2854_v38 = vmul.f32 0.03125, %v2853_v37 }
 0x4bc   : > { %v2855_v42 = vadd.f32 1e-05, %v2854_v38 }
 0x4be   : > { %7894 = vrsqrt.f32 %v2855_v42 }
 0x4c8   : > { %v7895_v43 = vpop.eup %7894 }
 0x4c9   : > { %v2857_v47 = vmul.f32 %v7895_v43, %v2837_v16  ;;  %v2858_v48 = vmul.f32 %v7895_v43, %v2838_v10  ;;  %v2859_v49 = vmul.f32 %v7895_v43, %v2839_v17  ;;  %v2860_v56 = vmul.f32 %v7895_v43, %v2840_v18 }
 0x4cb   : > { %v2867_v21 = vmul.f32 %v6766_v46, %v2857_v47  ;;  %v2868_v25 = vmul.f32 %v6766_v46, %v2858_v48  ;;  %v2869_v31 = vmul.f32 %v6766_v46, %v2859_v49  ;;  %v2870_v35 = vmul.f32 %v6766_v46, %v2860_v56 }
 0x4cd   : > { %v2877_v40 = vadd.f32 %v6767_v57, %v2867_v21  ;;  %v2878_v32 = vadd.f32 %v6767_v57, %v2868_v25  ;;  %v2879_v33 = vadd.f32 %v6767_v57, %v2869_v31  ;;  %v2880_v39 = vadd.f32 %v6767_v57, %v2870_v35 }
 0x4cf   : > { %vm2881_vm1 = vcmp.gt.f32.partialorder %v2877_v40, 0.0  ;;  %vm2882_vm3 = vcmp.gt.f32.partialorder %v2878_v32, 0.0  ;;  %vm2883_vm4 = vcmp.gt.f32.partialorder %v2879_v33, 0.0  ;;  %vm2884_vm5 = vcmp.gt.f32.partialorder %v2880_v39, 0.0 }
 0x4d0   : > { %v2885_v45 = vmul.f32 0.2, %v2877_v40  ;;  %v2886_v50 = vmul.f32 0.2, %v2878_v32  ;;  %v2887_v51 = vmul.f32 0.2, %v2879_v33 }
 0x4d1   : > { %v2888_v54 = vmul.f32 0.2, %v2880_v39 }
 0x4d2   : > { %v2889_v55 = vsel %vm2881_vm1, %v2877_v40, %v2885_v45  ;;  %v2890_v52 = vsel %vm2882_vm3, %v2878_v32, %v2886_v50  ;;  %v9137_v58 = vsel %vm2883_vm4, %v2879_v33, %v2887_v51 }
 0x4d3   : > { %v9141_v60 = vsel %vm2884_vm5, %v2880_v39, %v2888_v54  ;;  %v2894_v0 = vrot.slane %v2889_v55, 1  ;;  %v2895_v2 = vrot.slane %v2889_v55, 2  ;;  %v2896_v3 = vrot.slane %v2889_v55, 3 }
 0x4d4   : > { %v2897_v4 = vrot.slane %v2889_v55, 4  ;;  %v2898_v53 = vrot.slane %v2889_v55, 5  ;;  %v2899_v61 = vrot.slane %v2889_v55, 6  ;;  %v2900_v1 = vrot.slane %v2889_v55, 7 }
 0x4d5   : > { %v2902_v6 = vrot.slane %v2890_v52, 1  ;;  %v2903_v7 = vrot.slane %v2890_v52, 2  ;;  %v2904_v9 = vrot.slane %v2890_v52, 3  ;;  %v2905_v11 = vrot.slane %v2890_v52, 4 }
 0x4d6   : > { %v2906_v12 = vrot.slane %v2890_v52, 5  ;;  %v2907_v13 = vrot.slane %v2890_v52, 6  ;;  %v2908_v8 = vrot.slane %v2890_v52, 7  ;;  %v2909_v15 = vcombine.low %v2889_v55, %v2894_v0 }
 0x4d7   : > { %v2910_v16 = vcombine.low %v2895_v2, %v2896_v3  ;;  %v2939_v10 = vcombine.low %v2897_v4, %v2898_v53  ;;  %v2940_v17 = vcombine.low %v2899_v61, %v2900_v1  ;;  %v2966_v18 = vcombine.low %v2890_v52, %v2902_v6 }
 0x4d8   : > { %v2917_v19 = vrot.slane %v2909_v15, %v9139_v59  ;;  %v2967_v20 = vcombine.low %v2903_v7, %v2904_v9  ;;  %v2993_v22 = vcombine.low %v2905_v11, %v2906_v12  ;;  %v2994_v23 = vcombine.low %v2907_v13, %v2908_v8 }
 0x4d9   : > { %v2924_v24 = vrot.slane %v2910_v16, %v9139_v59  ;;  %v2947_v26 = vrot.slane %v2939_v10, %v9139_v59  ;;  %v2954_v27 = vrot.slane %v2940_v17, %v9139_v59  ;;  %v2974_v28 = vrot.slane %v2966_v18, %v9139_v59 }
 0x4da   : > { %v2981_v29 = vrot.slane %v2967_v20, %v9139_v59  ;;  %v3001_v30 = vrot.slane %v2993_v22, %v9139_v59  ;;  %v3008_v34 = vrot.slane %v2994_v23, %v9139_v59  ;;  %v3021_v36 = vrot.slane %v9137_v58, 1 }
 0x4db   : > { %v2925_v37 = vcombine.low %v2917_v19, %v2924_v24  ;;  %v2955_v38 = vcombine.low %v2947_v26, %v2954_v27  ;;  %v3022_v42 = vrot.slane %v9137_v58, 2  ;;  %v3023_v43 = vrot.slane %v9137_v58, 3 }
 0x4dc   : > { %v2982_v46 = vcombine.low %v2974_v28, %v2981_v29  ;;  %v3009_v47 = vcombine.low %v3001_v30, %v3008_v34  ;;  %v3024_v48 = vrot.slane %v9137_v58, 4  ;;  %v3025_v49 = vrot.slane %v9137_v58, 5 }
 0x4dd   : > { %v2932_v56 = vrot.slane %v2925_v37, %v9139_v59  ;;  %v2962_v57 = vrot.slane %v2955_v38, %v9139_v59  ;;  %v3026_v62 = vrot.slane %v9137_v58, 6  ;;  %v3027_v63 = vrot.slane %v9137_v58, 7 }
 0x4de   : > { %v2989_v14 = vrot.slane %v2982_v46, %v9139_v59  ;;  %v3016_v21 = vrot.slane %v3009_v47, %v9139_v59  ;;  %v3029_v25 = vrot.slane %v9141_v60, 1  ;;  %v3030_v31 = vrot.slane %v9141_v60, 2 }
 0x4df   : > { %2938 = vst.msk [vmem:[#allocation2] ss:$2 sm:$0xf] %vm9143_vm6, %v2932_v56  ;;  %2965 = vst.msk [vmem:[#allocation2 + $0x8] ss:$2 sm:$0xf] %vm9143_vm6, %v2962_v57  ;;  %v3036_v41 = vcombine.low %v9137_v58, %v3021_v36  ;;  %v3037_v44 = vcombine.low %v3022_v42, %v3023_v43  ;;  %v3063_v45 = vcombine.low %v3024_v48, %v3025_v49 }
 0x4e0   : > { %v3031_v35 = vrot.slane %v9141_v60, 3  ;;  %v3032_v40 = vrot.slane %v9141_v60, 4  ;;  %v3033_v32 = vrot.slane %v9141_v60, 5  ;;  %v3034_v33 = vrot.slane %v9141_v60, 6 }
 0x4e1   : > { %2992 = vst.msk [vmem:[#allocation2 + $0x10] ss:$2 sm:$0xf] %vm9143_vm6, %v2989_v14  ;;  %3019 = vst.msk [vmem:[#allocation2 + $0x18] ss:$2 sm:$0xf] %vm9143_vm6, %v3016_v21  ;;  %v3064_v50 = vcombine.low %v3026_v62, %v3027_v63  ;;  %v3090_v51 = vcombine.low %v9141_v60, %v3029_v25  ;;  %v3044_v52 = vrot.slane %v3036_v41, %v9139_v59 }
 0x4e2   : > { %v3035_v39 = vrot.slane %v9141_v60, 7  ;;  %v3091_v54 = vcombine.low %v3030_v31, %v3031_v35  ;;  %v3117_v55 = vcombine.low %v3032_v40, %v3033_v32  ;;  %v3051_v0 = vrot.slane %v3037_v44, %v9139_v59 }
 0x4e3   : > { %v3071_v2 = vrot.slane %v3063_v45, %v9139_v59  ;;  %v3078_v4 = vrot.slane %v3064_v50, %v9139_v59  ;;  %v3098_v53 = vrot.slane %v3090_v51, %v9139_v59 }
 0x4e4   : > { %v3118_v3 = vcombine.low %v3034_v33, %v3035_v39  ;;  %v3105_v58 = vrot.slane %v3091_v54, %v9139_v59  ;;  %v3125_v61 = vrot.slane %v3117_v55, %v9139_v59  ;;  %v3052_v1 = vcombine.low %v3044_v52, %v3051_v0 }
 0x4e5   : > { %v3079_v6 = vcombine.low %v3071_v2, %v3078_v4 }
 0x4e6   : > { %v3132_v60 = vrot.slane %v3118_v3, %v9139_v59  ;;  %v3106_v7 = vcombine.low %v3098_v53, %v3105_v58  ;;  %v3059_v9 = vrot.slane %v3052_v1, %v9139_v59 }
 0x4e7   : > { %v3086_v12 = vrot.slane %v3079_v6, %v9139_v59 }
 0x4e8   : > { %v3133_v11 = vcombine.low %v3125_v61, %v3132_v60  ;;  %v3113_v13 = vrot.slane %v3106_v7, %v9139_v59  ;;  %3062 = vst.msk [vmem:[#allocation2 + $0x1] ss:$2 sm:$0xf] %vm9143_vm6, %v3059_v9 }
 0x4e9   : > { %3089 = vst.msk [vmem:[#allocation2 + $0x9] ss:$2 sm:$0xf] %vm9143_vm6, %v3086_v12 }
 0x4ea   : > { %v3140_v8 = vrot.slane %v3133_v11, %v9139_v59  ;;  %3116 = vst.msk [vmem:[#allocation2 + $0x11] ss:$2 sm:$0xf] %vm9143_vm6, %v3113_v13 }
 0x4ec   : > { %3143 = vst.msk [vmem:[#allocation2 + $0x19] ss:$2 sm:$0xf] %vm9143_vm6, %v3140_v8 }
 0x4ed PF: > { %v3178_v59 = vld [vmem:[%s8873_s23] sm:$0xff]  ;;  %v3179_v16 = vld [vmem:[%s8873_s23 + $0x8] sm:$0xff]  ;;  %v8426_v21 = vmov 1983009808   ;;  %v3157_v31 = vlaneseq  ;;  %s7096_s18 = sshll.u32 %s8523_s19, 3  ;;  %p7026_p9 = scmp.ne.s32.totalorder %s8523_s19, 3 }
 0x4ee   : > { %v3182_v15 = vld [vmem:[%s8873_s23 + $0x20] sm:$0xff]  ;;  %v3183_v17 = vld [vmem:[%s8873_s23 + $0x28] sm:$0xff]  ;;  %v3155_v25 = vunpack.c.l.s4 %v8426_v21  ;;  %s3150_s8 = scalar_lea.vmem [#allocation2], %s7096_s18  ;;  %vm5214_vm7 = vcmask (!%p7026_p9), 1041408   ;;  %s9692_s0 = sld [smem:[#allocation38_spill]] (!%p7026_p9) }
 0x4ef   : > { %v6771_v10 = vcombine.high %v3178_v59, %v3182_v15  ;;  %v6770_v5 = vcombine.low %v3178_v59, %v3182_v15  ;;  %v3186_v18 = vld [vmem:[%s8873_s23 + $0x40] sm:$0xff]  ;;  %v6773_v20 = vcombine.high %v3179_v16, %v3183_v17  ;;  %v6772_v22 = vcombine.low %v3179_v16, %v3183_v17  ;;  %v3187_v24 = vld [vmem:[%s8873_s23 + $0x48] sm:$0xff] }
 0x4f0   : > { %v3190_v19 = vld [vmem:[%s8873_s23 + $0x60] sm:$0xff]  ;;  %v3191_v26 = vld [vmem:[%s8873_s23 + $0x68] sm:$0xff]  ;;  %v3156_v50 = vunpack.c.0.s8 %v3155_v25  ;;  %v9225_v51 = vshrl.u32 %v3157_v31, 7 }
 0x4f1   : > { %v6779_v23 = vcombine.high %v3186_v18, %v3190_v19  ;;  %v3194_v27 = vld [vmem:[%s8873_s23 + $0x80] sm:$0xff]  ;;  %4714 = vmatprep.subr.bf16.mxu0 %v6771_v10  ;;  %v6781_v28 = vcombine.high %v3187_v24, %v3191_v26  ;;  %v3195_v30 = vld [vmem:[%s8873_s23 + $0x88] sm:$0xff]  ;;  %4796 = vmatprep.subr.bf16.mxu1 %v6773_v20  ;;  %v6778_v36 = vcombine.low %v3186_v18, %v3190_v19 }
 0x4f2   : > { %v3198_v29 = vld [vmem:[%s8873_s23 + $0xa0] sm:$0xff]  ;;  %v3199_v34 = vld [vmem:[%s8873_s23 + $0xa8] sm:$0xff]  ;;  %4715 = vmatpush1.bf16.msra.mxu0 %v6770_v5  ;;  %4797 = vmatpush1.bf16.msra.mxu1 %v6772_v22  ;;  %v6780_v37 = vcombine.low %v3187_v24, %v3191_v26  ;;  %v9233_v58 = vsub.s32 %v3156_v50, %v9225_v51 }
 0x4f3   : > { %4716 = vmatprep.subr.bf16.mxu0 %v6779_v23  ;;  %v6787_v38 = vcombine.high %v3194_v27, %v3198_v29  ;;  %4798 = vmatprep.subr.bf16.mxu1 %v6781_v28  ;;  %v6789_v42 = vcombine.high %v3195_v30, %v3199_v34  ;;  %v3202_v43 = vld [vmem:[%s8873_s23 + $0xc0] sm:$0xff]  ;;  %v3203_v47 = vld [vmem:[%s8873_s23 + $0xc8] sm:$0xff]  ;;  %v6786_v49 = vcombine.low %v3194_v27, %v3198_v29 }
 0x4f4   : > { %v3206_v46 = vld [vmem:[%s8873_s23 + $0xe0] sm:$0xff]  ;;  %v3207_v48 = vld [vmem:[%s8873_s23 + $0xe8] sm:$0xff]  ;;  %v6788_v56 = vcombine.low %v3195_v30, %v3199_v34 }
 0x4f5   : > { %v6795_v57 = vcombine.high %v3202_v43, %v3206_v46  ;;  %v6797_v62 = vcombine.high %v3203_v47, %v3207_v48  ;;  %v3210_v63 = vld [vmem:[%s8873_s23 + $0x100] sm:$0xff]  ;;  %v3211_v35 = vld [vmem:[%s8873_s23 + $0x108] sm:$0xff]  ;;  %v6794_v32 = vcombine.low %v3202_v43, %v3206_v46  ;;  %v6796_v33 = vcombine.low %v3203_v47, %v3207_v48 }
 0x4f6   : > { %4717 = vmatpush1.bf16.msra.mxu0 %v6778_v36  ;;  %4799 = vmatpush1.bf16.msra.mxu1 %v6780_v37  ;;  %v3214_v14 = vld [vmem:[%s8873_s23 + $0x120] sm:$0xff]  ;;  %v3215_v40 = vld [vmem:[%s8873_s23 + $0x128] sm:$0xff] }
 0x4f7   : > { %4718 = vmatprep.subr.bf16.mxu0 %v6787_v38  ;;  %4800 = vmatprep.subr.bf16.mxu1 %v6789_v42  ;;  %v6803_v39 = vcombine.high %v3210_v63, %v3214_v14  ;;  %v6805_v41 = vcombine.high %v3211_v35, %v3215_v40  ;;  %v3218_v44 = vld [vmem:[%s8873_s23 + $0x140] sm:$0xff]  ;;  %v3219_v54 = vld [vmem:[%s8873_s23 + $0x148] sm:$0xff]  ;;  %v6802_v52 = vcombine.low %v3210_v63, %v3214_v14 }
 0x4f8   : > { %v3222_v45 = vld [vmem:[%s8873_s23 + $0x160] sm:$0xff]  ;;  %v3223_v55 = vld [vmem:[%s8873_s23 + $0x168] sm:$0xff]  ;;  %v6804_v0 = vcombine.low %v3211_v35, %v3215_v40 }
 0x4f9   : > { %v6811_v2 = vcombine.high %v3218_v44, %v3222_v45  ;;  %v6813_v3 = vcombine.high %v3219_v54, %v3223_v55  ;;  %v3226_v4 = vld [vmem:[%s8873_s23 + $0x180] sm:$0xff]  ;;  %v3227_v61 = vld [vmem:[%s8873_s23 + $0x188] sm:$0xff]  ;;  %v6810_v60 = vcombine.low %v3218_v44, %v3222_v45  ;;  %v6812_v6 = vcombine.low %v3219_v54, %v3223_v55 }
 0x4fa   : > { %4719 = vmatpush1.bf16.msra.mxu0 %v6786_v49  ;;  %4801 = vmatpush1.bf16.msra.mxu1 %v6788_v56  ;;  %v3230_v53 = vld [vmem:[%s8873_s23 + $0x1a0] sm:$0xff]  ;;  %v3231_v1 = vld [vmem:[%s8873_s23 + $0x1a8] sm:$0xff] }
 0x4fb   : > { %4720 = vmatprep.subr.bf16.mxu0 %v6795_v57  ;;  %4802 = vmatprep.subr.bf16.mxu1 %v6797_v62  ;;  %v6819_v7 = vcombine.high %v3226_v4, %v3230_v53  ;;  %v9237_v9 = vld [vmem:[%s3150_s8] sm:$0xff]  ;;  %v6821_v11 = vcombine.high %v3227_v61, %v3231_v1  ;;  %v3235_v59 = vld [vmem:[%s8873_s23 + $0x1c8] sm:$0xff]  ;;  %v6818_v16 = vcombine.low %v3226_v4, %v3230_v53 }
 0x4fc   : > { %v3234_v12 = vld [vmem:[%s8873_s23 + $0x1c0] sm:$0xff]  ;;  %v9243_v8 = vrot.slane %v9237_v9, %v9233_v58  ;;  %v3239_v15 = vld [vmem:[%s8873_s23 + $0x1e8] sm:$0xff]  ;;  %v6820_v17 = vcombine.low %v3227_v61, %v3231_v1 }
 0x4fd   : > { %v3238_v13 = vld [vmem:[%s8873_s23 + $0x1e0] sm:$0xff]  ;;  %v6829_v18 = vcombine.high %v3235_v59, %v3239_v15  ;;  %v3243_v23 = vld [vmem:[%s8873_s23 + $0x208] sm:$0xff]  ;;  %v6828_v27 = vcombine.low %v3235_v59, %v3239_v15 }
 0x4fe   : > { %4721 = vmatpush1.bf16.msra.mxu0 %v6794_v32  ;;  %4803 = vmatpush1.bf16.msra.mxu1 %v6796_v33  ;;  %v3168_v10 = vcombine.high %v9243_v8, %v9243_v8  ;;  %v6827_v5 = vcombine.high %v3234_v12, %v3238_v13  ;;  %v3242_v19 = vld [vmem:[%s8873_s23 + $0x200] sm:$0xff]  ;;  %v3247_v24 = vld [vmem:[%s8873_s23 + $0x228] sm:$0xff]  ;;  %v6826_v26 = vcombine.low %v3234_v12, %v3238_v13 }
 0x4ff   : > { %4722 = vmatprep.subr.bf16.mxu0 %v6803_v39  ;;  %4804 = vmatprep.subr.bf16.mxu1 %v6805_v41  ;;  %v3246_v20 = vld [vmem:[%s8873_s23 + $0x220] sm:$0xff]  ;;  %v6837_v29 = vcombine.high %v3243_v23, %v3247_v24  ;;  %v3251_v36 = vld [vmem:[%s8873_s23 + $0x248] sm:$0xff]  ;;  %v6836_v42 = vcombine.low %v3243_v23, %v3247_v24 }
 0x500   : > { %v9251_v22 = vpack.c.bf16 %v3168_v10, %v3168_v10  ;;  %v6835_v28 = vcombine.high %v3242_v19, %v3246_v20  ;;  %v3250_v30 = vld [vmem:[%s8873_s23 + $0x240] sm:$0xff]  ;;  %v3255_v37 = vld [vmem:[%s8873_s23 + $0x268] sm:$0xff]  ;;  %v6834_v38 = vcombine.low %v3242_v19, %v3246_v20 }
 0x501   : > { %v3254_v34 = vld [vmem:[%s8873_s23 + $0x260] sm:$0xff]  ;;  %v6845_v46 = vcombine.high %v3251_v36, %v3255_v37  ;;  %v3259_v49 = vld [vmem:[%s8873_s23 + $0x288] sm:$0xff]  ;;  %v6844_v62 = vcombine.low %v3251_v36, %v3255_v37 }
 0x502   : > { %4723 = vmatpush1.bf16.msra.mxu0 %v6802_v52  ;;  %4805 = vmatpush1.bf16.msra.mxu1 %v6804_v0  ;;  %v6843_v43 = vcombine.high %v3250_v30, %v3254_v34  ;;  %v3258_v47 = vld [vmem:[%s8873_s23 + $0x280] sm:$0xff]  ;;  %v3263_v56 = vld [vmem:[%s8873_s23 + $0x2a8] sm:$0xff]  ;;  %v6842_v57 = vcombine.low %v3250_v30, %v3254_v34 }
 0x503   : > { %4724 = vmatprep.subr.bf16.mxu0 %v6811_v2  ;;  %4806 = vmatprep.subr.bf16.mxu1 %v6813_v3  ;;  %v3262_v48 = vld [vmem:[%s8873_s23 + $0x2a0] sm:$0xff]  ;;  %v6853_v14 = vcombine.high %v3259_v49, %v3263_v56  ;;  %v3267_v31 = vld [vmem:[%s8873_s23 + $0x2c8] sm:$0xff]  ;;  %v6852_v32 = vcombine.low %v3259_v49, %v3263_v56 }
 0x504   : > { %4746 = vmatprep.mubr.bf16.mxu0 %v9251_v22  ;;  %4828 = vmatprep.mubr.bf16.mxu1 %v9251_v22  ;;  %v6851_v63 = vcombine.high %v3258_v47, %v3262_v48  ;;  %v3266_v21 = vld [vmem:[%s8873_s23 + $0x2c0] sm:$0xff]  ;;  %v3271_v35 = vld [vmem:[%s8873_s23 + $0x2e8] sm:$0xff]  ;;  %v6850_v40 = vcombine.low %v3258_v47, %v3262_v48  ;;  %v9300_v48 = vpack.c.bf16 %v9243_v8, %v9243_v8 }
 0x505   : > { %v3270_v25 = vld [vmem:[%s8873_s23 + $0x2e0] sm:$0xff]  ;;  %v6861_v39 = vcombine.high %v3267_v31, %v3271_v35  ;;  %v3275_v45 = vld [vmem:[%s8873_s23 + $0x308] sm:$0xff]  ;;  %v6860_v55 = vcombine.low %v3267_v31, %v3271_v35 }
 0x506   : > { %4725 = vmatpush1.bf16.msra.mxu0 %v6810_v60  ;;  %4807 = vmatpush1.bf16.msra.mxu1 %v6812_v6  ;;  %v6859_v33 = vcombine.high %v3266_v21, %v3270_v25  ;;  %v3274_v41 = vld [vmem:[%s8873_s23 + $0x300] sm:$0xff]  ;;  %v3279_v50 = vld [vmem:[%s8873_s23 + $0x328] sm:$0xff]  ;;  %v6858_v54 = vcombine.low %v3266_v21, %v3270_v25 }
 0x507   : > { %4726 = vmatprep.subr.bf16.mxu0 %v6819_v7  ;;  %4808 = vmatprep.subr.bf16.mxu1 %v6821_v11  ;;  %v3278_v44 = vld [vmem:[%s8873_s23 + $0x320] sm:$0xff]  ;;  %v6869_v0 = vcombine.high %v3275_v45, %v3279_v50  ;;  %v3283_v4 = vld [vmem:[%s8873_s23 + $0x348] sm:$0xff]  ;;  %v6868_v1 = vcombine.low %v3275_v45, %v3279_v50 }
 0x508   : > { %v6867_v52 = vcombine.high %v3274_v41, %v3278_v44  ;;  %v3282_v2 = vld [vmem:[%s8873_s23 + $0x340] sm:$0xff]  ;;  %v3287_v53 = vld [vmem:[%s8873_s23 + $0x368] sm:$0xff]  ;;  %v6866_v61 = vcombine.low %v3274_v41, %v3278_v44 }
 0x509   : > { %v3286_v3 = vld [vmem:[%s8873_s23 + $0x360] sm:$0xff]  ;;  %v6877_v6 = vcombine.high %v3283_v4, %v3287_v53  ;;  %v3291_v12 = vld [vmem:[%s8873_s23 + $0x388] sm:$0xff]  ;;  %v6876_v15 = vcombine.low %v3283_v4, %v3287_v53 }
 0x50a   : > { %4727 = vmatpush1.bf16.msra.mxu0 %v6818_v16  ;;  %4809 = vmatpush1.bf16.msra.mxu1 %v6820_v17  ;;  %v6875_v60 = vcombine.high %v3282_v2, %v3286_v3  ;;  %v3290_v7 = vld [vmem:[%s8873_s23 + $0x380] sm:$0xff]  ;;  %v3295_v13 = vld [vmem:[%s8873_s23 + $0x3a8] sm:$0xff]  ;;  %v6874_v59 = vcombine.low %v3282_v2, %v3286_v3 }
 0x50b   : > { %4728 = vmatprep.subr.bf16.mxu0 %v6827_v5  ;;  %4810 = vmatprep.subr.bf16.mxu1 %v6829_v18  ;;  %v3294_v11 = vld [vmem:[%s8873_s23 + $0x3a0] sm:$0xff]  ;;  %v6885_v10 = vcombine.high %v3291_v12, %v3295_v13  ;;  %v3153_v18 = vcombine.high %v9237_v9, %v9237_v9  ;;  %v3299_v19 = vld [vmem:[%s8873_s23 + $0x3c8] sm:$0xff]  ;;  %v6884_v24 = vcombine.low %v3291_v12, %v3295_v13 }
 0x50c   : > { %v6883_v16 = vcombine.high %v3290_v7, %v3294_v11  ;;  %v3298_v17 = vld [vmem:[%s8873_s23 + $0x3c0] sm:$0xff]  ;;  %v3303_v20 = vld [vmem:[%s8873_s23 + $0x3e8] sm:$0xff]  ;;  %v6882_v23 = vcombine.low %v3290_v7, %v3294_v11 }
 0x50d   : > { %v3302_v5 = vld [vmem:[%s8873_s23 + $0x3e0] sm:$0xff]  ;;  %v9290_v30 = vrot.slane %v3153_v18, %v9233_v58  ;;  %v3307_v9 = vld [vmem:[%s8873_s23 + $0x408] sm:$0xff]  ;;  %v6892_v37 = vcombine.low %v3299_v19, %v3303_v20 }
 0x50e   : > { %4729 = vmatpush1.bf16.msra.mxu0 %v6826_v26  ;;  %4811 = vmatpush1.bf16.msra.mxu1 %v6828_v27  ;;  %v6891_v26 = vcombine.high %v3298_v17, %v3302_v5  ;;  %v6893_v27 = vcombine.high %v3299_v19, %v3303_v20  ;;  %v3311_v34 = vld [vmem:[%s8873_s23 + $0x428] sm:$0xff]  ;;  %v6890_v36 = vcombine.low %v3298_v17, %v3302_v5  ;;  %v3322_v21 = vld [vmem:[%s8873_s23 + $0x480] sm:$0xff] }
 0x50f   : > { %4730 = vmatprep.subr.bf16.mxu0 %v6835_v28  ;;  %4812 = vmatprep.subr.bf16.mxu1 %v6837_v29  ;;  %v3306_v28 = vld [vmem:[%s8873_s23 + $0x400] sm:$0xff]  ;;  %v3169_v47 = vcombine.high %v9290_v30, %v9290_v30  ;;  %v3315_v49 = vld [vmem:[%s8873_s23 + $0x448] sm:$0xff] }
 0x510   : > { %v3310_v29 = vld [vmem:[%s8873_s23 + $0x420] sm:$0xff]  ;;  %v3319_v56 = vld [vmem:[%s8873_s23 + $0x468] sm:$0xff] }
 0x511   : > { %v3326_v25 = vld [vmem:[%s8873_s23 + $0x4a0] sm:$0xff]  ;;  %v9306_v31 = vpack.c.bf16 %v3169_v47, %v3169_v47  ;;  %v3323_v8 = vld [vmem:[%s8873_s23 + $0x488] sm:$0xff] }
 0x512   : > { %4731 = vmatpush1.bf16.msra.mxu0 %v6834_v38  ;;  %4813 = vmatpush1.bf16.msra.mxu1 %v6836_v42  ;;  %v6899_v38 = vcombine.high %v3306_v28, %v3310_v29  ;;  %v6901_v42 = vcombine.high %v3307_v9, %v3311_v34  ;;  %v3327_v35 = vld [vmem:[%s8873_s23 + $0x4a8] sm:$0xff]  ;;  %v3330_v41 = vld [vmem:[%s8873_s23 + $0x4c0] sm:$0xff] }
 0x513   : > { %4732 = vmatprep.subr.bf16.mxu0 %v6843_v43  ;;  %4814 = vmatprep.subr.bf16.mxu1 %v6845_v46  ;;  %v3314_v43 = vld [vmem:[%s8873_s23 + $0x440] sm:$0xff]  ;;  %v3331_v45 = vld [vmem:[%s8873_s23 + $0x4c8] sm:$0xff] }
 0x514   : > { %v3318_v46 = vld [vmem:[%s8873_s23 + $0x460] sm:$0xff]  ;;  %v3335_v50 = vld [vmem:[%s8873_s23 + $0x4e8] sm:$0xff] }
 0x515   : > { %v3334_v44 = vld [vmem:[%s8873_s23 + $0x4e0] sm:$0xff]  ;;  %v3339_v4 = vld [vmem:[%s8873_s23 + $0x508] sm:$0xff] }
 0x516   : > { %4733 = vmatpush1.bf16.msra.mxu0 %v6842_v57  ;;  %4815 = vmatpush1.bf16.msra.mxu1 %v6844_v62  ;;  %v6898_v57 = vcombine.low %v3306_v28, %v3310_v29  ;;  %v6900_v62 = vcombine.low %v3307_v9, %v3311_v34  ;;  %v3338_v2 = vld [vmem:[%s8873_s23 + $0x500] sm:$0xff]  ;;  %v3343_v53 = vld [vmem:[%s8873_s23 + $0x528] sm:$0xff] }
 0x517   : > { %4734 = vmatprep.subr.bf16.mxu0 %v6851_v63  ;;  %4816 = vmatprep.subr.bf16.mxu1 %v6853_v14  ;;  %v6907_v63 = vcombine.high %v3314_v43, %v3318_v46  ;;  %v6909_v14 = vcombine.high %v3315_v49, %v3319_v56  ;;  %v3342_v3 = vld [vmem:[%s8873_s23 + $0x520] sm:$0xff]  ;;  %v3347_v12 = vld [vmem:[%s8873_s23 + $0x548] sm:$0xff] }
 0x518   : > { %v3346_v7 = vld [vmem:[%s8873_s23 + $0x540] sm:$0xff]  ;;  %v3351_v13 = vld [vmem:[%s8873_s23 + $0x568] sm:$0xff] }
 0x519   : > { %v3350_v11 = vld [vmem:[%s8873_s23 + $0x560] sm:$0xff]  ;;  %v3355_v18 = vld [vmem:[%s8873_s23 + $0x588] sm:$0xff] }
 0x51a   : > { %4735 = vmatpush1.bf16.msra.mxu0 %v6850_v40  ;;  %4817 = vmatpush1.bf16.msra.mxu1 %v6852_v32  ;;  %v6906_v40 = vcombine.low %v3314_v43, %v3318_v46  ;;  %v6908_v32 = vcombine.low %v3315_v49, %v3319_v56  ;;  %v3354_v17 = vld [vmem:[%s8873_s23 + $0x580] sm:$0xff]  ;;  %v3359_v19 = vld [vmem:[%s8873_s23 + $0x5a8] sm:$0xff]  ;;  %v6938_v20 = vcombine.low %v3346_v7, %v3350_v11 }
 0x51b   : > { %4736 = vmatprep.subr.bf16.mxu0 %v6859_v33  ;;  %4818 = vmatprep.subr.bf16.mxu1 %v6861_v39  ;;  %v6915_v33 = vcombine.high %v3322_v21, %v3326_v25  ;;  %v6917_v39 = vcombine.high %v3323_v8, %v3327_v35  ;;  %v3358_v5 = vld [vmem:[%s8873_s23 + $0x5a0] sm:$0xff]  ;;  %v3363_v29 = vld [vmem:[%s8873_s23 + $0x5c8] sm:$0xff] }
 0x51c   : > { %v3366_v28 = vld [vmem:[%s8873_s23 + $0x5e0] sm:$0xff]  ;;  %v3367_v9 = vld [vmem:[%s8873_s23 + $0x5e8] sm:$0xff]  ;;  %v6946_v34 = vcombine.low %v3354_v17, %v3358_v5 }
 0x51d   : > { %v3374_v43 = vld [vmem:[%s8873_s23 + $0x620] sm:$0xff]  ;;  %v3371_v46 = vld [vmem:[%s8873_s23 + $0x608] sm:$0xff]  ;;  %v6956_v56 = vcombine.low %v3363_v29, %v3367_v9 }
 0x51e   : > { %4737 = vmatpush1.bf16.msra.mxu0 %v6858_v54  ;;  %4819 = vmatpush1.bf16.msra.mxu1 %v6860_v55  ;;  %v6914_v54 = vcombine.low %v3322_v21, %v3326_v25  ;;  %v6916_v55 = vcombine.low %v3323_v8, %v3327_v35  ;;  %v3375_v47 = vld [vmem:[%s8873_s23 + $0x628] sm:$0xff] }
 0x51f   : > { %4738 = vmatprep.subr.bf16.mxu0 %v6867_v52  ;;  %4820 = vmatprep.subr.bf16.mxu1 %v6869_v0  ;;  %v6923_v52 = vcombine.high %v3330_v41, %v3334_v44  ;;  %v6925_v0 = vcombine.high %v3331_v45, %v3335_v50  ;;  %v3379_v21 = vld [vmem:[%s8873_s23 + $0x648] sm:$0xff]  ;;  %v6964_v35 = vcombine.low %v3371_v46, %v3375_v47 }
 0x520   : > { %v3383_v25 = vld [vmem:[%s8873_s23 + $0x668] sm:$0xff] }
 0x522   : > { %4739 = vmatpush1.bf16.msra.mxu0 %v6866_v61  ;;  %4821 = vmatpush1.bf16.msra.mxu1 %v6868_v1  ;;  %v6922_v61 = vcombine.low %v3330_v41, %v3334_v44  ;;  %v6924_v1 = vcombine.low %v3331_v45, %v3335_v50  ;;  %v3387_v41 = vld [vmem:[%s8873_s23 + $0x688] sm:$0xff]  ;;  %v6972_v50 = vcombine.low %v3379_v21, %v3383_v25 }
 0x523   : > { %4740 = vmatprep.subr.bf16.mxu0 %v6875_v60  ;;  %4822 = vmatprep.subr.bf16.mxu1 %v6877_v6  ;;  %v6931_v60 = vcombine.high %v3338_v2, %v3342_v3  ;;  %v6933_v6 = vcombine.high %v3339_v4, %v3343_v53  ;;  %v3391_v44 = vld [vmem:[%s8873_s23 + $0x6a8] sm:$0xff] }
 0x526   : > { %4741 = vmatpush1.bf16.msra.mxu0 %v6874_v59  ;;  %4823 = vmatpush1.bf16.msra.mxu1 %v6876_v15  ;;  %v6930_v59 = vcombine.low %v3338_v2, %v3342_v3  ;;  %v6932_v15 = vcombine.low %v3339_v4, %v3343_v53  ;;  %v3395_v2 = vld [vmem:[%s8873_s23 + $0x6c8] sm:$0xff]  ;;  %v6980_v53 = vcombine.low %v3387_v41, %v3391_v44 }
 0x527   : > { %4742 = vmatprep.subr.bf16.mxu0 %v6883_v16  ;;  %4824 = vmatprep.subr.bf16.mxu1 %v6885_v10  ;;  %v6939_v16 = vcombine.high %v3346_v7, %v3350_v11  ;;  %v6941_v10 = vcombine.high %v3347_v12, %v3351_v13  ;;  %v3399_v3 = vld [vmem:[%s8873_s23 + $0x6e8] sm:$0xff] }
 0x528   : > { %v3403_v7 = vld [vmem:[%s8873_s23 + $0x708] sm:$0xff] }
 0x529   : > { %v3407_v11 = vld [vmem:[%s8873_s23 + $0x728] sm:$0xff] }
 0x52a   : > { %4743 = vmatpush1.bf16.msra.mxu0 %v6882_v23  ;;  %4825 = vmatpush1.bf16.msra.mxu1 %v6884_v24  ;;  %v6940_v23 = vcombine.low %v3347_v12, %v3351_v13  ;;  %v6947_v24 = vcombine.high %v3354_v17, %v3358_v5  ;;  %v6988_v13 = vcombine.low %v3395_v2, %v3399_v3  ;;  %v3411_v17 = vld [vmem:[%s8873_s23 + $0x748] sm:$0xff] }
 0x52b   : > { %4744 = vmatprep.subr.bf16.mxu0 %v6891_v26  ;;  %4826 = vmatprep.subr.bf16.mxu1 %v6893_v27  ;;  %v6949_v26 = vcombine.high %v3355_v18, %v3359_v19  ;;  %v3362_v27 = vld [vmem:[%s8873_s23 + $0x5c0] sm:$0xff]  ;;  %v3415_v5 = vld [vmem:[%s8873_s23 + $0x768] sm:$0xff] }
 0x52c   : > { %v6954_v49 = vcombine.low %v3362_v27, %v3366_v28 }
 0x52e   : > { %4745 = vmatpush1.bf16.msra.mxu0 %v6890_v36  ;;  %4827 = vmatpush1.bf16.msra.mxu1 %v6892_v37  ;;  %v6948_v36 = vcombine.low %v3355_v18, %v3359_v19  ;;  %v6955_v37 = vcombine.high %v3362_v27, %v3366_v28  ;;  %v6996_v19 = vcombine.low %v3403_v7, %v3407_v11  ;;  %v3419_v27 = vld [vmem:[%s8873_s23 + $0x788] sm:$0xff] }
 0x52f   : > { %4755 = vmatprep.subr.bf16.mxu0 %v6899_v38  ;;  %4837 = vmatprep.subr.bf16.mxu1 %v6901_v42  ;;  %v6957_v38 = vcombine.high %v3363_v29, %v3367_v9  ;;  %v3370_v42 = vld [vmem:[%s8873_s23 + $0x600] sm:$0xff]  ;;  %v3423_v28 = vld [vmem:[%s8873_s23 + $0x7a8] sm:$0xff]  ;;  %v7004_v9 = vcombine.low %v3411_v17, %v3415_v5 }
 0x530   : > { %v6962_v8 = vcombine.low %v3370_v42, %v3374_v43 }
 0x531   : > { %4747 = vmatmul.mubr.bf16.vlgmr.msra.gmra.mrb[0].mxu0 %v9300_v48  ;;  %4829 = vmatmul.mubr.bf16.vlgmr.msra.gmra.mrb[0].mxu1 %v9300_v48 }
 0x532   : > { %4756 = vmatpush1.bf16.msra.mxu0 %v6898_v57  ;;  %4838 = vmatpush1.bf16.msra.mxu1 %v6900_v62  ;;  %v6963_v57 = vcombine.high %v3370_v42, %v3374_v43  ;;  %v6965_v62 = vcombine.high %v3371_v46, %v3375_v47  ;;  %v3427_v42 = vld [vmem:[%s8873_s23 + $0x7c8] sm:$0xff]  ;;  %v7012_v47 = vcombine.low %v3419_v27, %v3423_v28 }
 0x533   : > { %4757 = vmatprep.subr.bf16.mxu0 %v6907_v63  ;;  %4839 = vmatprep.subr.bf16.mxu1 %v6909_v14  ;;  %v3378_v63 = vld [vmem:[%s8873_s23 + $0x640] sm:$0xff]  ;;  %v3431_v43 = vld [vmem:[%s8873_s23 + $0x7e8] sm:$0xff] }
 0x534   : > { %4787 = vmatprep.mubr.bf16.mxu0 %v9306_v31  ;;  %4869 = vmatprep.mubr.bf16.mxu1 %v9306_v31  ;;  %v3382_v14 = vld [vmem:[%s8873_s23 + $0x660] sm:$0xff] }
 0x535   : > { %v6970_v45 = vcombine.low %v3378_v63, %v3382_v14 }
 0x536   : > { %4758 = vmatpush1.bf16.msra.mxu0 %v6906_v40  ;;  %4840 = vmatpush1.bf16.msra.mxu1 %v6908_v32  ;;  %v6971_v40 = vcombine.high %v3378_v63, %v3382_v14  ;;  %v6973_v32 = vcombine.high %v3379_v21, %v3383_v25  ;;  %v3181_v63 = vld [vmem:[%s8873_s23 + $0x18] sm:$0xff]  ;;  %v7020_v25 = vcombine.low %v3427_v42, %v3431_v43 }
 0x537   : > { %4759 = vmatprep.subr.bf16.mxu0 %v6915_v33  ;;  %4841 = vmatprep.subr.bf16.mxu1 %v6917_v39  ;;  %v3386_v33 = vld [vmem:[%s8873_s23 + $0x680] sm:$0xff]  ;;  %v3185_v14 = vld [vmem:[%s8873_s23 + $0x38] sm:$0xff] }
 0x538   : > { %v3390_v39 = vld [vmem:[%s8873_s23 + $0x6a0] sm:$0xff] }
 0x539   : > { %v6978_v4 = vcombine.low %v3386_v33, %v3390_v39 }
 0x53a   : > { %4760 = vmatpush1.bf16.msra.mxu0 %v6914_v54  ;;  %4842 = vmatpush1.bf16.msra.mxu1 %v6916_v55  ;;  %v6979_v54 = vcombine.high %v3386_v33, %v3390_v39  ;;  %v6981_v55 = vcombine.high %v3387_v41, %v3391_v44  ;;  %v9374_v33 = vpack.c.bf16 %v9290_v30, %v9290_v30  ;;  %v3189_v39 = vld [vmem:[%s8873_s23 + $0x58] sm:$0xff] }
 0x53b   : > { %4761 = vmatprep.subr.bf16.mxu0 %v6923_v52  ;;  %4843 = vmatprep.subr.bf16.mxu1 %v6925_v0  ;;  %v3394_v52 = vld [vmem:[%s8873_s23 + $0x6c0] sm:$0xff]  ;;  %v3193_v41 = vld [vmem:[%s8873_s23 + $0x78] sm:$0xff] }
 0x53c   : > { %v3398_v0 = vld [vmem:[%s8873_s23 + $0x6e0] sm:$0xff]  ;;  %v3197_v30 = vld [vmem:[%s8873_s23 + $0x98] sm:$0xff] }
 0x53d   : > { %v6986_v12 = vcombine.low %v3394_v52, %v3398_v0 }
 0x53e   : > { %4762 = vmatpush1.bf16.msra.mxu0 %v6922_v61  ;;  %4844 = vmatpush1.bf16.msra.mxu1 %v6924_v1  ;;  %v6987_v61 = vcombine.high %v3394_v52, %v3398_v0  ;;  %v6989_v1 = vcombine.high %v3395_v2, %v3399_v3  ;;  %v3200_v52 = vld [vmem:[%s8873_s23 + $0xb0] sm:$0xff]  ;;  %v3201_v0 = vld [vmem:[%s8873_s23 + $0xb8] sm:$0xff]  ;;  %v6784_v3 = vcombine.low %v3189_v39, %v3193_v41 }
 0x53f   : > { %4763 = vmatprep.subr.bf16.mxu0 %v6931_v60  ;;  %4845 = vmatprep.subr.bf16.mxu1 %v6933_v6  ;;  %v3402_v60 = vld [vmem:[%s8873_s23 + $0x700] sm:$0xff] }
 0x540   : > { %v3406_v6 = vld [vmem:[%s8873_s23 + $0x720] sm:$0xff] }
 0x541   : > { %v6994_v18 = vcombine.low %v3402_v60, %v3406_v6 }
 0x542   : > { %4764 = vmatpush1.bf16.msra.mxu0 %v6930_v59  ;;  %4846 = vmatpush1.bf16.msra.mxu1 %v6932_v15  ;;  %v6995_v59 = vcombine.high %v3402_v60, %v3406_v6  ;;  %v6997_v15 = vcombine.high %v3403_v7, %v3407_v11  ;;  %v3205_v60 = vld [vmem:[%s8873_s23 + $0xd8] sm:$0xff]  ;;  %v6792_v11 = vcombine.low %v3197_v30, %v3201_v0 }
 0x543   : > { %4765 = vmatprep.subr.bf16.mxu0 %v6939_v16  ;;  %4847 = vmatprep.subr.bf16.mxu1 %v6941_v10  ;;  %v3410_v16 = vld [vmem:[%s8873_s23 + $0x740] sm:$0xff]  ;;  %v3209_v6 = vld [vmem:[%s8873_s23 + $0xf8] sm:$0xff] }
 0x544   : > { %v3414_v10 = vld [vmem:[%s8873_s23 + $0x760] sm:$0xff] }
 0x545   : > { %v7002_v29 = vcombine.low %v3410_v16, %v3414_v10 }
 0x546   : > { %4766 = vmatpush1.bf16.msra.mxu0 %v6938_v20  ;;  %4848 = vmatpush1.bf16.msra.mxu1 %v6940_v23  ;;  %v7003_v20 = vcombine.high %v3410_v16, %v3414_v10  ;;  %v7005_v23 = vcombine.high %v3411_v17, %v3415_v5  ;;  %v3213_v16 = vld [vmem:[%s8873_s23 + $0x118] sm:$0xff] }
 0x547   : > { %4767 = vmatprep.subr.bf16.mxu0 %v6947_v24  ;;  %4849 = vmatprep.subr.bf16.mxu1 %v6949_v26  ;;  %v3418_v24 = vld [vmem:[%s8873_s23 + $0x780] sm:$0xff]  ;;  %v3217_v10 = vld [vmem:[%s8873_s23 + $0x138] sm:$0xff] }
 0x548   : > { %v3422_v26 = vld [vmem:[%s8873_s23 + $0x7a0] sm:$0xff] }
 0x549   : > { %v7010_v46 = vcombine.low %v3418_v24, %v3422_v26 }
 0x54a   : > { %4768 = vmatpush1.bf16.msra.mxu0 %v6946_v34  ;;  %4850 = vmatpush1.bf16.msra.mxu1 %v6948_v36  ;;  %v7011_v34 = vcombine.high %v3418_v24, %v3422_v26  ;;  %v7013_v36 = vcombine.high %v3419_v27, %v3423_v28  ;;  %v3225_v24 = vld [vmem:[%s8873_s23 + $0x178] sm:$0xff]  ;;  %v6808_v27 = vcombine.low %v3213_v16, %v3217_v10 }
 0x54b   : > { %4769 = vmatprep.subr.bf16.mxu0 %v6955_v37  ;;  %4851 = vmatprep.subr.bf16.mxu1 %v6957_v38  ;;  %v3426_v37 = vld [vmem:[%s8873_s23 + $0x7c0] sm:$0xff] }
 0x54c   : > { %v3430_v38 = vld [vmem:[%s8873_s23 + $0x7e0] sm:$0xff] }
 0x54d   : > { %v7018_v21 = vcombine.low %v3426_v37, %v3430_v38 }
 0x54e   : > { %4770 = vmatpush1.bf16.msra.mxu0 %v6954_v49  ;;  %4852 = vmatpush1.bf16.msra.mxu1 %v6956_v56  ;;  %v7019_v49 = vcombine.high %v3426_v37, %v3430_v38  ;;  %v7021_v56 = vcombine.high %v3427_v42, %v3431_v43  ;;  %v3233_v37 = vld [vmem:[%s8873_s23 + $0x1b8] sm:$0xff] }
 0x54f   : > { %4771 = vmatprep.subr.bf16.mxu0 %v6963_v57  ;;  %4853 = vmatprep.subr.bf16.mxu1 %v6965_v62  ;;  %v3180_v57 = vld [vmem:[%s8873_s23 + $0x10] sm:$0xff] }
 0x550   : > { %v3184_v62 = vld [vmem:[%s8873_s23 + $0x30] sm:$0xff] }
 0x551   : > { %v6774_v44 = vcombine.low %v3180_v57, %v3184_v62 }
 0x552   : > { %4772 = vmatpush1.bf16.msra.mxu0 %v6962_v8  ;;  %4854 = vmatpush1.bf16.msra.mxu1 %v6964_v35  ;;  %v6775_v8 = vcombine.high %v3180_v57, %v3184_v62  ;;  %v6777_v35 = vcombine.high %v3181_v63, %v3185_v14  ;;  %v3241_v57 = vld [vmem:[%s8873_s23 + $0x1f8] sm:$0xff] }
 0x553   : > { %4773 = vmatprep.subr.bf16.mxu0 %v6971_v40  ;;  %4855 = vmatprep.subr.bf16.mxu1 %v6973_v32  ;;  %v3188_v40 = vld [vmem:[%s8873_s23 + $0x50] sm:$0xff] }
 0x554   : > { %v3192_v32 = vld [vmem:[%s8873_s23 + $0x70] sm:$0xff] }
 0x555   : > { %v6782_v2 = vcombine.low %v3188_v40, %v3192_v32 }
 0x556   : > { %4774 = vmatpush1.bf16.msra.mxu0 %v6970_v45  ;;  %4856 = vmatpush1.bf16.msra.mxu1 %v6972_v50  ;;  %v6776_v45 = vcombine.low %v3181_v63, %v3185_v14  ;;  %v6783_v50 = vcombine.high %v3188_v40, %v3192_v32  ;;  %v3249_v40 = vld [vmem:[%s8873_s23 + $0x238] sm:$0xff] }
 0x557   : > { %4775 = vmatprep.subr.bf16.mxu0 %v6979_v54  ;;  %4857 = vmatprep.subr.bf16.mxu1 %v6981_v55  ;;  %v6785_v54 = vcombine.high %v3189_v39, %v3193_v41  ;;  %v3196_v55 = vld [vmem:[%s8873_s23 + $0x90] sm:$0xff] }
 0x558   : > { %v6790_v7 = vcombine.low %v3196_v55, %v3200_v52 }
 0x55a   : > { %4776 = vmatpush1.bf16.msra.mxu0 %v6978_v4  ;;  %4858 = vmatpush1.bf16.msra.mxu1 %v6980_v53  ;;  %v6791_v4 = vcombine.high %v3196_v55, %v3200_v52  ;;  %v6793_v53 = vcombine.high %v3197_v30, %v3201_v0  ;;  %v3257_v55 = vld [vmem:[%s8873_s23 + $0x278] sm:$0xff] }
 0x55b   : > { %4777 = vmatprep.subr.bf16.mxu0 %v6987_v61  ;;  %4859 = vmatprep.subr.bf16.mxu1 %v6989_v1  ;;  %v3204_v61 = vld [vmem:[%s8873_s23 + $0xd0] sm:$0xff] }
 0x55c   : > { %v3208_v1 = vld [vmem:[%s8873_s23 + $0xf0] sm:$0xff] }
 0x55d   : > { %v6798_v17 = vcombine.low %v3204_v61, %v3208_v1 }
 0x55e   : > { %4778 = vmatpush1.bf16.msra.mxu0 %v6986_v12  ;;  %4860 = vmatpush1.bf16.msra.mxu1 %v6988_v13  ;;  %v6799_v12 = vcombine.high %v3204_v61, %v3208_v1  ;;  %v6801_v13 = vcombine.high %v3205_v60, %v3209_v6  ;;  %v3265_v61 = vld [vmem:[%s8873_s23 + $0x2b8] sm:$0xff] }
 0x55f   : > { %4779 = vmatprep.subr.bf16.mxu0 %v6995_v59  ;;  %4861 = vmatprep.subr.bf16.mxu1 %v6997_v15  ;;  %v3212_v59 = vld [vmem:[%s8873_s23 + $0x110] sm:$0xff] }
 0x560   : > { %v3216_v15 = vld [vmem:[%s8873_s23 + $0x130] sm:$0xff] }
 0x561   : > { %v6807_v5 = vcombine.high %v3212_v59, %v3216_v15  ;;  %v6806_v26 = vcombine.low %v3212_v59, %v3216_v15  ;;  %v3273_v59 = vld [vmem:[%s8873_s23 + $0x2f8] sm:$0xff] }
 0x562   : > { %4780 = vmatpush1.bf16.msra.mxu0 %v6994_v18  ;;  %4862 = vmatpush1.bf16.msra.mxu1 %v6996_v19  ;;  %v6809_v18 = vcombine.high %v3213_v16, %v3217_v10  ;;  %v3220_v19 = vld [vmem:[%s8873_s23 + $0x150] sm:$0xff] }
 0x563   : > { %4781 = vmatprep.subr.bf16.mxu0 %v7003_v20  ;;  %4863 = vmatprep.subr.bf16.mxu1 %v7005_v23  ;;  %v3224_v20 = vld [vmem:[%s8873_s23 + $0x170] sm:$0xff]  ;;  %v3221_v23 = vld [vmem:[%s8873_s23 + $0x158] sm:$0xff] }
 0x564   : > { %v6815_v28 = vcombine.high %v3220_v19, %v3224_v20  ;;  %v6814_v38 = vcombine.low %v3220_v19, %v3224_v20  ;;  %v6816_v42 = vcombine.low %v3221_v23, %v3225_v24  ;;  %v3281_v19 = vld [vmem:[%s8873_s23 + $0x338] sm:$0xff] }
 0x566   : > { %4782 = vmatpush1.bf16.msra.mxu0 %v7002_v29  ;;  %4864 = vmatpush1.bf16.msra.mxu1 %v7004_v9  ;;  %v6817_v29 = vcombine.high %v3221_v23, %v3225_v24  ;;  %v3228_v9 = vld [vmem:[%s8873_s23 + $0x190] sm:$0xff] }
 0x567   : > { %4783 = vmatprep.subr.bf16.mxu0 %v7011_v34  ;;  %4865 = vmatprep.subr.bf16.mxu1 %v7013_v36  ;;  %v3232_v34 = vld [vmem:[%s8873_s23 + $0x1b0] sm:$0xff]  ;;  %v3229_v36 = vld [vmem:[%s8873_s23 + $0x198] sm:$0xff] }
 0x568   : > { %v6823_v43 = vcombine.high %v3228_v9, %v3232_v34  ;;  %v6822_v62 = vcombine.low %v3228_v9, %v3232_v34  ;;  %v6824_v63 = vcombine.low %v3229_v36, %v3233_v37  ;;  %v3289_v9 = vld [vmem:[%s8873_s23 + $0x378] sm:$0xff] }
 0x56a   : > { %4784 = vmatpush1.bf16.msra.mxu0 %v7010_v46  ;;  %4866 = vmatpush1.bf16.msra.mxu1 %v7012_v47  ;;  %v6825_v46 = vcombine.high %v3229_v36, %v3233_v37  ;;  %v3236_v47 = vld [vmem:[%s8873_s23 + $0x1d0] sm:$0xff] }
 0x56b   : > { %4785 = vmatprep.subr.bf16.mxu0 %v7019_v49  ;;  %4867 = vmatprep.subr.bf16.mxu1 %v7021_v56  ;;  %v3240_v49 = vld [vmem:[%s8873_s23 + $0x1f0] sm:$0xff]  ;;  %v3237_v56 = vld [vmem:[%s8873_s23 + $0x1d8] sm:$0xff] }
 0x56c   : > { %v6831_v14 = vcombine.high %v3236_v47, %v3240_v49  ;;  %v6830_v32 = vcombine.low %v3236_v47, %v3240_v49  ;;  %v6832_v39 = vcombine.low %v3237_v56, %v3241_v57  ;;  %v3297_v47 = vld [vmem:[%s8873_s23 + $0x3b8] sm:$0xff] }
 0x56e   : > { %4786 = vmatpush1.bf16.msra.mxu0 %v7018_v21  ;;  %4868 = vmatpush1.bf16.msra.mxu1 %v7020_v25  ;;  %v6833_v21 = vcombine.high %v3237_v56, %v3241_v57  ;;  %v3244_v25 = vld [vmem:[%s8873_s23 + $0x210] sm:$0xff] }
 0x56f   : > { %4878 = vmatprep.subr.bf16.mxu0 %v6775_v8  ;;  %4960 = vmatprep.subr.bf16.mxu1 %v6777_v35  ;;  %v3248_v8 = vld [vmem:[%s8873_s23 + $0x230] sm:$0xff]  ;;  %v3245_v35 = vld [vmem:[%s8873_s23 + $0x218] sm:$0xff] }
 0x570   : > { %v6839_v41 = vcombine.high %v3244_v25, %v3248_v8  ;;  %v6838_v52 = vcombine.low %v3244_v25, %v3248_v8  ;;  %v6840_v30 = vcombine.low %v3245_v35, %v3249_v40  ;;  %v3305_v25 = vld [vmem:[%s8873_s23 + $0x3f8] sm:$0xff] }
 0x571   : > { %4788 = vmatmul.mubr.bf16.vlgmr.msra.gmra.mrb[0].mxu0 %v9374_v33  ;;  %4870 = vmatmul.mubr.bf16.vlgmr.msra.gmra.mrb[0].mxu1 %v9374_v33 }
 0x572   : > { %4879 = vmatpush1.bf16.msra.mxu0 %v6774_v44  ;;  %4961 = vmatpush1.bf16.msra.mxu1 %v6776_v45  ;;  %v6841_v44 = vcombine.high %v3245_v35, %v3249_v40  ;;  %v3252_v45 = vld [vmem:[%s8873_s23 + $0x250] sm:$0xff] }
 0x573   : > { %4880 = vmatprep.subr.bf16.mxu0 %v6783_v50  ;;  %4962 = vmatprep.subr.bf16.mxu1 %v6785_v54  ;;  %v3256_v50 = vld [vmem:[%s8873_s23 + $0x270] sm:$0xff]  ;;  %v3253_v54 = vld [vmem:[%s8873_s23 + $0x258] sm:$0xff] }
 0x574   : > { %4910 = vmatprep.mubr.bf16.mxu0 %v9251_v22  ;;  %4992 = vmatprep.mubr.bf16.mxu1 %v9251_v22  ;;  %v6800_v22 = vcombine.low %v3205_v60, %v3209_v6  ;;  %v6847_v0 = vcombine.high %v3252_v45, %v3256_v50  ;;  %v6846_v1 = vcombine.low %v3252_v45, %v3256_v50  ;;  %v3313_v45 = vld [vmem:[%s8873_s23 + $0x438] sm:$0xff] }
 0x575   : > { %v6848_v60 = vcombine.low %v3253_v54, %v3257_v55 }
 0x576   : > { %4881 = vmatpush1.bf16.msra.mxu0 %v6782_v2  ;;  %4963 = vmatpush1.bf16.msra.mxu1 %v6784_v3  ;;  %v6849_v2 = vcombine.high %v3253_v54, %v3257_v55  ;;  %v3260_v3 = vld [vmem:[%s8873_s23 + $0x290] sm:$0xff] }
 0x577   : > { %4882 = vmatprep.subr.bf16.mxu0 %v6791_v4  ;;  %4964 = vmatprep.subr.bf16.mxu1 %v6793_v53  ;;  %v3264_v4 = vld [vmem:[%s8873_s23 + $0x2b0] sm:$0xff]  ;;  %v3261_v53 = vld [vmem:[%s8873_s23 + $0x298] sm:$0xff] }
 0x578   : > { %v6855_v6 = vcombine.high %v3260_v3, %v3264_v4  ;;  %v6854_v15 = vcombine.low %v3260_v3, %v3264_v4  ;;  %v6856_v16 = vcombine.low %v3261_v53, %v3265_v61  ;;  %v3321_v3 = vld [vmem:[%s8873_s23 + $0x478] sm:$0xff] }
 0x57a   : > { %4883 = vmatpush1.bf16.msra.mxu0 %v6790_v7  ;;  %4965 = vmatpush1.bf16.msra.mxu1 %v6792_v11  ;;  %v6857_v7 = vcombine.high %v3261_v53, %v3265_v61  ;;  %v3268_v11 = vld [vmem:[%s8873_s23 + $0x2d0] sm:$0xff] }
 0x57b   : > { %4884 = vmatprep.subr.bf16.mxu0 %v6799_v12  ;;  %4966 = vmatprep.subr.bf16.mxu1 %v6801_v13  ;;  %v3272_v12 = vld [vmem:[%s8873_s23 + $0x2f0] sm:$0xff]  ;;  %v3269_v13 = vld [vmem:[%s8873_s23 + $0x2d8] sm:$0xff] }
 0x57c   : > { %v6863_v10 = vcombine.high %v3268_v11, %v3272_v12  ;;  %v6862_v20 = vcombine.low %v3268_v11, %v3272_v12  ;;  %v6864_v23 = vcombine.low %v3269_v13, %v3273_v59  ;;  %v3329_v11 = vld [vmem:[%s8873_s23 + $0x4b8] sm:$0xff] }
 0x57e   : > { %4885 = vmatpush1.bf16.msra.mxu0 %v6798_v17  ;;  %4967 = vmatpush1.bf16.msra.mxu1 %v6800_v22  ;;  %v6865_v17 = vcombine.high %v3269_v13, %v3273_v59  ;;  %v3276_v22 = vld [vmem:[%s8873_s23 + $0x310] sm:$0xff] }
 0x57f   : > { %4886 = vmatprep.subr.bf16.mxu0 %v6807_v5  ;;  %4968 = vmatprep.subr.bf16.mxu1 %v6809_v18  ;;  %v3280_v5 = vld [vmem:[%s8873_s23 + $0x330] sm:$0xff]  ;;  %v3277_v18 = vld [vmem:[%s8873_s23 + $0x318] sm:$0xff] }
 0x580   : > { %v6871_v24 = vcombine.high %v3276_v22, %v3280_v5  ;;  %v6870_v34 = vcombine.low %v3276_v22, %v3280_v5  ;;  %v6872_v36 = vcombine.low %v3277_v18, %v3281_v19  ;;  %v3337_v22 = vld [vmem:[%s8873_s23 + $0x4f8] sm:$0xff] }
 0x582   : > { %4887 = vmatpush1.bf16.msra.mxu0 %v6806_v26  ;;  %4969 = vmatpush1.bf16.msra.mxu1 %v6808_v27  ;;  %v6873_v26 = vcombine.high %v3277_v18, %v3281_v19  ;;  %v3284_v27 = vld [vmem:[%s8873_s23 + $0x350] sm:$0xff] }
 0x583   : > { %4888 = vmatprep.subr.bf16.mxu0 %v6815_v28  ;;  %4970 = vmatprep.subr.bf16.mxu1 %v6817_v29  ;;  %v3288_v28 = vld [vmem:[%s8873_s23 + $0x370] sm:$0xff]  ;;  %v3285_v29 = vld [vmem:[%s8873_s23 + $0x358] sm:$0xff] }
 0x584   : > { %v6879_v37 = vcombine.high %v3284_v27, %v3288_v28  ;;  %v6878_v49 = vcombine.low %v3284_v27, %v3288_v28  ;;  %v6880_v56 = vcombine.low %v3285_v29, %v3289_v9 }
 0x586   : > { %4889 = vmatpush1.bf16.msra.mxu0 %v6814_v38  ;;  %4971 = vmatpush1.bf16.msra.mxu1 %v6816_v42  ;;  %v6881_v38 = vcombine.high %v3285_v29, %v3289_v9  ;;  %v3292_v42 = vld [vmem:[%s8873_s23 + $0x390] sm:$0xff] }
 0x587   : > { %4890 = vmatprep.subr.bf16.mxu0 %v6823_v43  ;;  %4972 = vmatprep.subr.bf16.mxu1 %v6825_v46  ;;  %v3296_v43 = vld [vmem:[%s8873_s23 + $0x3b0] sm:$0xff]  ;;  %v3293_v46 = vld [vmem:[%s8873_s23 + $0x398] sm:$0xff] }
 0x588   : > { %v6887_v57 = vcombine.high %v3292_v42, %v3296_v43  ;;  %v6886_v8 = vcombine.low %v3292_v42, %v3296_v43  ;;  %v6888_v35 = vcombine.low %v3293_v46, %v3297_v47  ;;  %v3348_v9 = vld [vmem:[%s8873_s23 + $0x550] sm:$0xff] }
 0x58a   : > { %4891 = vmatpush1.bf16.msra.mxu0 %v6822_v62  ;;  %4973 = vmatpush1.bf16.msra.mxu1 %v6824_v63  ;;  %v6889_v62 = vcombine.high %v3293_v46, %v3297_v47  ;;  %v3300_v63 = vld [vmem:[%s8873_s23 + $0x3d0] sm:$0xff] }
 0x58b   : > { %4892 = vmatprep.subr.bf16.mxu0 %v6831_v14  ;;  %4974 = vmatprep.subr.bf16.mxu1 %v6833_v21  ;;  %v3304_v14 = vld [vmem:[%s8873_s23 + $0x3f0] sm:$0xff]  ;;  %v3301_v21 = vld [vmem:[%s8873_s23 + $0x3d8] sm:$0xff] }
 0x58c   : > { %v6895_v40 = vcombine.high %v3300_v63, %v3304_v14  ;;  %v6894_v50 = vcombine.low %v3300_v63, %v3304_v14  ;;  %v6896_v54 = vcombine.low %v3301_v21, %v3305_v25  ;;  %v3356_v47 = vld [vmem:[%s8873_s23 + $0x590] sm:$0xff] }
 0x58e   : > { %4893 = vmatpush1.bf16.msra.mxu0 %v6830_v32  ;;  %4975 = vmatpush1.bf16.msra.mxu1 %v6832_v39  ;;  %v6897_v32 = vcombine.high %v3301_v21, %v3305_v25  ;;  %v3308_v39 = vld [vmem:[%s8873_s23 + $0x410] sm:$0xff] }
 0x58f   : > { %4894 = vmatprep.subr.bf16.mxu0 %v6839_v41  ;;  %4976 = vmatprep.subr.bf16.mxu1 %v6841_v44  ;;  %v3312_v41 = vld [vmem:[%s8873_s23 + $0x430] sm:$0xff]  ;;  %v3309_v44 = vld [vmem:[%s8873_s23 + $0x418] sm:$0xff] }
 0x590   : > { %v6903_v55 = vcombine.high %v3308_v39, %v3312_v41  ;;  %v6902_v4 = vcombine.low %v3308_v39, %v3312_v41  ;;  %v6904_v53 = vcombine.low %v3309_v44, %v3313_v45  ;;  %v3364_v25 = vld [vmem:[%s8873_s23 + $0x5d0] sm:$0xff] }
 0x592   : > { %4895 = vmatpush1.bf16.msra.mxu0 %v6838_v52  ;;  %4977 = vmatpush1.bf16.msra.mxu1 %v6840_v30  ;;  %v6905_v52 = vcombine.high %v3309_v44, %v3313_v45  ;;  %v3316_v30 = vld [vmem:[%s8873_s23 + $0x450] sm:$0xff] }
 0x593   : > { %4896 = vmatprep.subr.bf16.mxu0 %v6847_v0  ;;  %4978 = vmatprep.subr.bf16.mxu1 %v6849_v2  ;;  %v3320_v0 = vld [vmem:[%s8873_s23 + $0x470] sm:$0xff]  ;;  %v3317_v2 = vld [vmem:[%s8873_s23 + $0x458] sm:$0xff] }
 0x594   : > { %v6911_v61 = vcombine.high %v3316_v30, %v3320_v0  ;;  %v6910_v12 = vcombine.low %v3316_v30, %v3320_v0  ;;  %v6912_v13 = vcombine.low %v3317_v2, %v3321_v3  ;;  %v3372_v45 = vld [vmem:[%s8873_s23 + $0x610] sm:$0xff] }
 0x596   : > { %4897 = vmatpush1.bf16.msra.mxu0 %v6846_v1  ;;  %4979 = vmatpush1.bf16.msra.mxu1 %v6848_v60  ;;  %v6913_v1 = vcombine.high %v3317_v2, %v3321_v3  ;;  %v3324_v60 = vld [vmem:[%s8873_s23 + $0x490] sm:$0xff] }
 0x597   : > { %4898 = vmatprep.subr.bf16.mxu0 %v6855_v6  ;;  %4980 = vmatprep.subr.bf16.mxu1 %v6857_v7  ;;  %v3328_v6 = vld [vmem:[%s8873_s23 + $0x4b0] sm:$0xff]  ;;  %v3325_v7 = vld [vmem:[%s8873_s23 + $0x498] sm:$0xff] }
 0x598   : > { %v6919_v59 = vcombine.high %v3324_v60, %v3328_v6  ;;  %v6920_v5 = vcombine.low %v3325_v7, %v3329_v11  ;;  %v3380_v3 = vld [vmem:[%s8873_s23 + $0x650] sm:$0xff] }
 0x59a   : > { %4899 = vmatpush1.bf16.msra.mxu0 %v6854_v15  ;;  %4981 = vmatpush1.bf16.msra.mxu1 %v6856_v16  ;;  %v6921_v15 = vcombine.high %v3325_v7, %v3329_v11  ;;  %v3332_v16 = vld [vmem:[%s8873_s23 + $0x4d0] sm:$0xff] }
 0x59b   : > { %4900 = vmatprep.subr.bf16.mxu0 %v6863_v10  ;;  %4982 = vmatprep.subr.bf16.mxu1 %v6865_v17  ;;  %v3336_v10 = vld [vmem:[%s8873_s23 + $0x4f0] sm:$0xff]  ;;  %v3333_v17 = vld [vmem:[%s8873_s23 + $0x4d8] sm:$0xff] }
 0x59c   : > { %v6927_v18 = vcombine.high %v3332_v16, %v3336_v10  ;;  %v6929_v19 = vcombine.high %v3333_v17, %v3337_v22  ;;  %v6926_v27 = vcombine.low %v3332_v16, %v3336_v10  ;;  %v3388_v11 = vld [vmem:[%s8873_s23 + $0x690] sm:$0xff] }
 0x59e   : > { %4901 = vmatpush1.bf16.msra.mxu0 %v6862_v20  ;;  %4983 = vmatpush1.bf16.msra.mxu1 %v6864_v23  ;;  %v3340_v20 = vld [vmem:[%s8873_s23 + $0x510] sm:$0xff] }
 0x59f   : > { %4902 = vmatprep.subr.bf16.mxu0 %v6871_v24  ;;  %4984 = vmatprep.subr.bf16.mxu1 %v6873_v26  ;;  %v3344_v23 = vld [vmem:[%s8873_s23 + $0x530] sm:$0xff]  ;;  %v3341_v24 = vld [vmem:[%s8873_s23 + $0x518] sm:$0xff] }
 0x5a0   : > { %v3345_v26 = vld [vmem:[%s8873_s23 + $0x538] sm:$0xff]  ;;  %v6935_v28 = vcombine.high %v3340_v20, %v3344_v23 }
 0x5a1   : > { %v6937_v29 = vcombine.high %v3341_v24, %v3345_v26  ;;  %v6936_v42 = vcombine.low %v3341_v24, %v3345_v26  ;;  %v3404_v26 = vld [vmem:[%s8873_s23 + $0x710] sm:$0xff] }
 0x5a2   : > { %4903 = vmatpush1.bf16.msra.mxu0 %v6870_v34  ;;  %4985 = vmatpush1.bf16.msra.mxu1 %v6872_v36  ;;  %v3352_v34 = vld [vmem:[%s8873_s23 + $0x570] sm:$0xff]  ;;  %v3349_v36 = vld [vmem:[%s8873_s23 + $0x558] sm:$0xff] }
 0x5a3   : > { %4904 = vmatprep.subr.bf16.mxu0 %v6879_v37  ;;  %4986 = vmatprep.subr.bf16.mxu1 %v6881_v38  ;;  %v3353_v37 = vld [vmem:[%s8873_s23 + $0x578] sm:$0xff]  ;;  %v6934_v38 = vcombine.low %v3340_v20, %v3344_v23  ;;  %v6943_v43 = vcombine.high %v3348_v9, %v3352_v34 }
 0x5a4   : > { %v6945_v46 = vcombine.high %v3349_v36, %v3353_v37  ;;  %v6944_v63 = vcombine.low %v3349_v36, %v3353_v37  ;;  %v3412_v37 = vld [vmem:[%s8873_s23 + $0x750] sm:$0xff] }
 0x5a6   : > { %4905 = vmatpush1.bf16.msra.mxu0 %v6878_v49  ;;  %4987 = vmatpush1.bf16.msra.mxu1 %v6880_v56  ;;  %v3360_v49 = vld [vmem:[%s8873_s23 + $0x5b0] sm:$0xff]  ;;  %v3357_v56 = vld [vmem:[%s8873_s23 + $0x598] sm:$0xff] }
 0x5a7   : > { %4906 = vmatprep.subr.bf16.mxu0 %v6887_v57  ;;  %4988 = vmatprep.subr.bf16.mxu1 %v6889_v62  ;;  %v3361_v57 = vld [vmem:[%s8873_s23 + $0x5b8] sm:$0xff]  ;;  %v6942_v62 = vcombine.low %v3348_v9, %v3352_v34  ;;  %v6951_v14 = vcombine.high %v3356_v47, %v3360_v49 }
 0x5a8   : > { %v6953_v21 = vcombine.high %v3357_v56, %v3361_v57  ;;  %v6952_v39 = vcombine.low %v3357_v56, %v3361_v57  ;;  %v3420_v57 = vld [vmem:[%s8873_s23 + $0x790] sm:$0xff] }
 0x5aa   : > { %4907 = vmatpush1.bf16.msra.mxu0 %v6886_v8  ;;  %4989 = vmatpush1.bf16.msra.mxu1 %v6888_v35  ;;  %v3368_v8 = vld [vmem:[%s8873_s23 + $0x5f0] sm:$0xff]  ;;  %v3365_v35 = vld [vmem:[%s8873_s23 + $0x5d8] sm:$0xff] }
 0x5ab   : > { %4908 = vmatprep.subr.bf16.mxu0 %v6895_v40  ;;  %4990 = vmatprep.subr.bf16.mxu1 %v6897_v32  ;;  %v3369_v40 = vld [vmem:[%s8873_s23 + $0x5f8] sm:$0xff]  ;;  %v6950_v32 = vcombine.low %v3356_v47, %v3360_v49  ;;  %v6959_v41 = vcombine.high %v3364_v25, %v3368_v8 }
 0x5ac   : > { %v6961_v44 = vcombine.high %v3365_v35, %v3369_v40  ;;  %v6960_v30 = vcombine.low %v3365_v35, %v3369_v40  ;;  %v3428_v40 = vld [vmem:[%s8873_s23 + $0x7d0] sm:$0xff] }
 0x5ae   : > { %4909 = vmatpush1.bf16.msra.mxu0 %v6894_v50  ;;  %4991 = vmatpush1.bf16.msra.mxu1 %v6896_v54  ;;  %v3376_v50 = vld [vmem:[%s8873_s23 + $0x630] sm:$0xff]  ;;  %v3373_v54 = vld [vmem:[%s8873_s23 + $0x618] sm:$0xff] }
 0x5af   : > { %4919 = vmatprep.subr.bf16.mxu0 %v6903_v55  ;;  %5001 = vmatprep.subr.bf16.mxu1 %v6905_v52  ;;  %v3377_v55 = vld [vmem:[%s8873_s23 + $0x638] sm:$0xff]  ;;  %v6958_v52 = vcombine.low %v3364_v25, %v3368_v8  ;;  %v6967_v0 = vcombine.high %v3372_v45, %v3376_v50 }
 0x5b0   : > { %v6969_v2 = vcombine.high %v3373_v54, %v3377_v55 }
 0x5b1   : > { %4911 = vmatmul.mubr.bf16.vlgmr.msra.gmra.mrb[4].mxu0 %v9300_v48  ;;  %4993 = vmatmul.mubr.bf16.vlgmr.msra.gmra.mrb[4].mxu1 %v9300_v48  ;;  %v6918_v48 = vcombine.low %v3324_v60, %v3328_v6  ;;  %v6968_v60 = vcombine.low %v3373_v54, %v3377_v55 }
 0x5b2   : > { %4920 = vmatpush1.bf16.msra.mxu0 %v6902_v4  ;;  %5002 = vmatpush1.bf16.msra.mxu1 %v6904_v53  ;;  %v3384_v4 = vld [vmem:[%s8873_s23 + $0x670] sm:$0xff]  ;;  %v3381_v53 = vld [vmem:[%s8873_s23 + $0x658] sm:$0xff] }
 0x5b3   : > { %4921 = vmatprep.subr.bf16.mxu0 %v6911_v61  ;;  %5003 = vmatprep.subr.bf16.mxu1 %v6913_v1  ;;  %v3385_v61 = vld [vmem:[%s8873_s23 + $0x678] sm:$0xff]  ;;  %v6966_v1 = vcombine.low %v3372_v45, %v3376_v50  ;;  %v6975_v6 = vcombine.high %v3380_v3, %v3384_v4 }
 0x5b4   : > { %4951 = vmatprep.mubr.bf16.mxu0 %v9306_v31  ;;  %5033 = vmatprep.mubr.bf16.mxu1 %v9306_v31  ;;  %v6928_v31 = vcombine.low %v3333_v17, %v3337_v22  ;;  %v6977_v7 = vcombine.high %v3381_v53, %v3385_v61  ;;  %v6976_v16 = vcombine.low %v3381_v53, %v3385_v61  ;;  %v3396_v22 = vld [vmem:[%s8873_s23 + $0x6d0] sm:$0xff] }
 0x5b6   : > { %4922 = vmatpush1.bf16.msra.mxu0 %v6910_v12  ;;  %5004 = vmatpush1.bf16.msra.mxu1 %v6912_v13  ;;  %v3392_v12 = vld [vmem:[%s8873_s23 + $0x6b0] sm:$0xff]  ;;  %v3389_v13 = vld [vmem:[%s8873_s23 + $0x698] sm:$0xff] }
 0x5b7   : > { %4923 = vmatprep.subr.bf16.mxu0 %v6919_v59  ;;  %5005 = vmatprep.subr.bf16.mxu1 %v6921_v15  ;;  %v3393_v59 = vld [vmem:[%s8873_s23 + $0x6b8] sm:$0xff]  ;;  %v6974_v15 = vcombine.low %v3380_v3, %v3384_v4  ;;  %v6983_v10 = vcombine.high %v3388_v11, %v3392_v12 }
 0x5b8   : > { %v6985_v17 = vcombine.high %v3389_v13, %v3393_v59  ;;  %v6984_v20 = vcombine.low %v3389_v13, %v3393_v59 }
 0x5ba   : > { %4924 = vmatpush1.bf16.msra.mxu0 %v6918_v48  ;;  %5006 = vmatpush1.bf16.msra.mxu1 %v6920_v5  ;;  %v3400_v48 = vld [vmem:[%s8873_s23 + $0x6f0] sm:$0xff]  ;;  %v3397_v5 = vld [vmem:[%s8873_s23 + $0x6d8] sm:$0xff] }
 0x5bb   : > { %4925 = vmatprep.subr.bf16.mxu0 %v6927_v18  ;;  %5007 = vmatprep.subr.bf16.mxu1 %v6929_v19  ;;  %v3401_v18 = vld [vmem:[%s8873_s23 + $0x6f8] sm:$0xff]  ;;  %v6982_v19 = vcombine.low %v3388_v11, %v3392_v12  ;;  %v6991_v23 = vcombine.high %v3396_v22, %v3400_v48  ;;  %v3146_v12 = vld [vmem:[#allocation3] sm:$0xff] }
 0x5bc   : > { %v6993_v24 = vcombine.high %v3397_v5, %v3401_v18  ;;  %v6992_v9 = vcombine.low %v3397_v5, %v3401_v18 }
 0x5be   : > { %4926 = vmatpush1.bf16.msra.mxu0 %v6926_v27  ;;  %5008 = vmatpush1.bf16.msra.mxu1 %v6928_v31  ;;  %v3408_v27 = vld [vmem:[%s8873_s23 + $0x730] sm:$0xff]  ;;  %v3405_v31 = vld [vmem:[%s8873_s23 + $0x718] sm:$0xff] }
 0x5bf   : > { %4927 = vmatprep.subr.bf16.mxu0 %v6935_v28  ;;  %5009 = vmatprep.subr.bf16.mxu1 %v6937_v29  ;;  %v3409_v28 = vld [vmem:[%s8873_s23 + $0x738] sm:$0xff]  ;;  %v6990_v29 = vcombine.low %v3396_v22, %v3400_v48  ;;  %v6999_v34 = vcombine.high %v3404_v26, %v3408_v27 }
 0x5c0   : > { %v7001_v36 = vcombine.high %v3405_v31, %v3409_v28  ;;  %v7000_v47 = vcombine.low %v3405_v31, %v3409_v28  ;;  %v7897_v31 = vld [vmem:[#allocation21 + $0x40] sm:$0xff] (!%p7026_p9)  }
 0x5c1   : > { %v7898_v28 = vld [vmem:[#allocation21] sm:$0xff] (!%p7026_p9)  }
 0x5c2   : > { %4928 = vmatpush1.bf16.msra.mxu0 %v6934_v38  ;;  %5010 = vmatpush1.bf16.msra.mxu1 %v6936_v42  ;;  %v3416_v38 = vld [vmem:[%s8873_s23 + $0x770] sm:$0xff]  ;;  %v3413_v42 = vld [vmem:[%s8873_s23 + $0x758] sm:$0xff] }
 0x5c3   : > { %4929 = vmatprep.subr.bf16.mxu0 %v6943_v43  ;;  %5011 = vmatprep.subr.bf16.mxu1 %v6945_v46  ;;  %v3417_v43 = vld [vmem:[%s8873_s23 + $0x778] sm:$0xff]  ;;  %v6998_v46 = vcombine.low %v3404_v26, %v3408_v27  ;;  %v7007_v49 = vcombine.high %v3412_v37, %v3416_v38 }
 0x5c4   : > { %v7009_v56 = vcombine.high %v3413_v42, %v3417_v43  ;;  %v7008_v25 = vcombine.low %v3413_v42, %v3417_v43  ;;  %v7905_v42 = vld [vmem:[#allocation21 + $0x50] sm:$0xff] (!%p7026_p9)  }
 0x5c5   : > { %v7906_v43 = vld [vmem:[#allocation21 + $0x10] sm:$0xff] (!%p7026_p9)  }
 0x5c6   : > { %4930 = vmatpush1.bf16.msra.mxu0 %v6942_v62  ;;  %5012 = vmatpush1.bf16.msra.mxu1 %v6944_v63  ;;  %v3424_v62 = vld [vmem:[%s8873_s23 + $0x7b0] sm:$0xff]  ;;  %v3421_v63 = vld [vmem:[%s8873_s23 + $0x798] sm:$0xff] }
 0x5c7   : > { %4931 = vmatprep.subr.bf16.mxu0 %v6951_v14  ;;  %5013 = vmatprep.subr.bf16.mxu1 %v6953_v21  ;;  %v3425_v14 = vld [vmem:[%s8873_s23 + $0x7b8] sm:$0xff]  ;;  %v7006_v21 = vcombine.low %v3412_v37, %v3416_v38  ;;  %v7015_v8 = vcombine.high %v3420_v57, %v3424_v62  ;;  %v7903_v37 = vld [vmem:[#allocation21 + $0xc8] sm:$0xff] (!%p7026_p9)  }
 0x5c8   : > { %v7017_v35 = vcombine.high %v3421_v63, %v3425_v14  ;;  %v7016_v45 = vcombine.low %v3421_v63, %v3425_v14  ;;  %v7904_v38 = vld [vmem:[#allocation21 + $0x88] sm:$0xff] (!%p7026_p9)   ;;  %v7913_v63 = vld [vmem:[#allocation21 + $0x60] sm:$0xff] (!%p7026_p9)  }
 0x5c9   : > { %v7914_v14 = vld [vmem:[#allocation21 + $0x20] sm:$0xff] (!%p7026_p9)  }
 0x5ca   : > { %4932 = vmatpush1.bf16.msra.mxu0 %v6950_v32  ;;  %5014 = vmatpush1.bf16.msra.mxu1 %v6952_v39  ;;  %v3432_v32 = vld [vmem:[%s8873_s23 + $0x7f0] sm:$0xff]  ;;  %v3429_v39 = vld [vmem:[%s8873_s23 + $0x7d8] sm:$0xff] }
 0x5cb   : > { %4933 = vmatprep.subr.bf16.mxu0 %v6959_v41  ;;  %5015 = vmatprep.subr.bf16.mxu1 %v6961_v44  ;;  %v3433_v41 = vld [vmem:[%s8873_s23 + $0x7f8] sm:$0xff]  ;;  %v7014_v44 = vcombine.low %v3420_v57, %v3424_v62  ;;  %v7023_v50 = vcombine.high %v3428_v40, %v3432_v32  ;;  %v7022_v55 = vcombine.low %v3428_v40, %v3432_v32  ;;  %v7911_v57 = vld [vmem:[#allocation21 + $0xd8] sm:$0xff] (!%p7026_p9)   ;;  %v7919_v40 = vld [vmem:[#allocation21 + $0xe8] sm:$0xff] (!%p7026_p9)  }
 0x5cc   : > { %v7025_v54 = vcombine.high %v3429_v39, %v3433_v41  ;;  %v7912_v62 = vld [vmem:[#allocation21 + $0x98] sm:$0xff] (!%p7026_p9)   ;;  %v7920_v32 = vld [vmem:[#allocation21 + $0xa8] sm:$0xff] (!%p7026_p9)  }
 0x5ce   : > { %4934 = vmatpush1.bf16.msra.mxu0 %v6958_v52  ;;  %5016 = vmatpush1.bf16.msra.mxu1 %v6960_v30  ;;  %v7024_v52 = vcombine.low %v3429_v39, %v3433_v41  ;;  %v7921_v39 = vld [vmem:[#allocation21 + $0x70] sm:$0xff] (!%p7026_p9)  }
 0x5cf   : > { %4935 = vmatprep.subr.bf16.mxu0 %v6967_v0  ;;  %5017 = vmatprep.subr.bf16.mxu1 %v6969_v2  ;;  %v7922_v41 = vld [vmem:[#allocation21 + $0x30] sm:$0xff] (!%p7026_p9)  }
 0x5d2   : > { %4936 = vmatpush1.bf16.msra.mxu0 %v6966_v1  ;;  %5018 = vmatpush1.bf16.msra.mxu1 %v6968_v60 }
 0x5d3   : > { %4937 = vmatprep.subr.bf16.mxu0 %v6975_v6  ;;  %5019 = vmatprep.subr.bf16.mxu1 %v6977_v7 }
 0x5d6   : > { %4938 = vmatpush1.bf16.msra.mxu0 %v6974_v15  ;;  %5020 = vmatpush1.bf16.msra.mxu1 %v6976_v16 }
 0x5d7   : > { %4939 = vmatprep.subr.bf16.mxu0 %v6983_v10  ;;  %5021 = vmatprep.subr.bf16.mxu1 %v6985_v17 }
 0x5da   : > { %4940 = vmatpush1.bf16.msra.mxu0 %v6982_v19  ;;  %5022 = vmatpush1.bf16.msra.mxu1 %v6984_v20 }
 0x5db   : > { %4941 = vmatprep.subr.bf16.mxu0 %v6991_v23  ;;  %5023 = vmatprep.subr.bf16.mxu1 %v6993_v24  ;;  %v3147_v24 = vld [vmem:[#allocation3 + $0x8] sm:$0xff] }
 0x5de   : > { %4942 = vmatpush1.bf16.msra.mxu0 %v6990_v29  ;;  %5024 = vmatpush1.bf16.msra.mxu1 %v6992_v9  ;;  %v7899_v29 = vld [vmem:[#allocation21 + $0xc0] sm:$0xff] (!%p7026_p9)  }
 0x5df   : > { %4943 = vmatprep.subr.bf16.mxu0 %v6999_v34  ;;  %5025 = vmatprep.subr.bf16.mxu1 %v7001_v36  ;;  %v7900_v9 = vld [vmem:[#allocation21 + $0x80] sm:$0xff] (!%p7026_p9)   ;;  %v7901_v34 = vld [vmem:[#allocation21 + $0x48] sm:$0xff] (!%p7026_p9)  }
 0x5e0   : > { %v7902_v36 = vld [vmem:[#allocation21 + $0x8] sm:$0xff] (!%p7026_p9)  }
 0x5e2   : > { %4944 = vmatpush1.bf16.msra.mxu0 %v6998_v46  ;;  %5026 = vmatpush1.bf16.msra.mxu1 %v7000_v47  ;;  %v7907_v46 = vld [vmem:[#allocation21 + $0xd0] sm:$0xff] (!%p7026_p9)  }
 0x5e3   : > { %4945 = vmatprep.subr.bf16.mxu0 %v7007_v49  ;;  %5027 = vmatprep.subr.bf16.mxu1 %v7009_v56  ;;  %v7908_v47 = vld [vmem:[#allocation21 + $0x90] sm:$0xff] (!%p7026_p9)   ;;  %v7909_v49 = vld [vmem:[#allocation21 + $0x58] sm:$0xff] (!%p7026_p9)  }
 0x5e4   : > { %v7910_v56 = vld [vmem:[#allocation21 + $0x18] sm:$0xff] (!%p7026_p9)  }
 0x5e6   : > { %4946 = vmatpush1.bf16.msra.mxu0 %v7006_v21  ;;  %5028 = vmatpush1.bf16.msra.mxu1 %v7008_v25  ;;  %v7915_v21 = vld [vmem:[#allocation21 + $0xe0] sm:$0xff] (!%p7026_p9)  }
 0x5e7   : > { %4947 = vmatprep.subr.bf16.mxu0 %v7015_v8  ;;  %5029 = vmatprep.subr.bf16.mxu1 %v7017_v35  ;;  %v7916_v25 = vld [vmem:[#allocation21 + $0xa0] sm:$0xff] (!%p7026_p9)   ;;  %v7917_v8 = vld [vmem:[#allocation21 + $0x68] sm:$0xff] (!%p7026_p9)  }
 0x5e8   : > { %v7918_v35 = vld [vmem:[#allocation21 + $0x28] sm:$0xff] (!%p7026_p9)  }
 0x5ea   : > { %4948 = vmatpush1.bf16.msra.mxu0 %v7014_v44  ;;  %5030 = vmatpush1.bf16.msra.mxu1 %v7016_v45  ;;  %v7923_v44 = vld [vmem:[#allocation21 + $0xf0] sm:$0xff] (!%p7026_p9)   ;;  %v5100_v45 = vsub.s32 (!%p7026_p9), 0, %v9225_v51 }
 0x5eb   : > { %4949 = vmatprep.subr.bf16.mxu0 %v7023_v50  ;;  %5031 = vmatprep.subr.bf16.mxu1 %v7025_v54  ;;  %v7924_v50 = vld [vmem:[#allocation21 + $0xb0] sm:$0xff] (!%p7026_p9)   ;;  %v5104_v54 = vsub.s32 (!%p7026_p9), 1, %v9225_v51 }
 0x5ee   : > { %4950 = vmatpush1.bf16.msra.mxu0 %v7022_v55  ;;  %5032 = vmatpush1.bf16.msra.mxu1 %v7024_v52  ;;  %v7925_v55 = vld [vmem:[#allocation21 + $0x78] sm:$0xff] (!%p7026_p9)   ;;  %v5108_v52 = vsub.s32 (!%p7026_p9), 2, %v9225_v51 }
 0x5ef   : > { %7370 = vmatprep.subr.bf16.mxu0 (!%p7026_p9), %v7897_v31  ;;  %7392 = vmatprep.subr.bf16.mxu1 (!%p7026_p9), %v7899_v29  ;;  %v5116_v29 = vsub.s32 (!%p7026_p9), 4, %v9225_v51 }
 0x5f1   : > { %4952 = vmatmul.mubr.bf16.vlgmr.msra.gmra.mrb[4].mxu0 %v9374_v33  ;;  %5034 = vmatmul.mubr.bf16.vlgmr.msra.gmra.mrb[4].mxu1 %v9374_v33 }
 0x5f2   : > { %7371 = vmatpush3.bf16.msra.mxu0 (!%p7026_p9), %v7898_v28  ;;  %7393 = vmatpush3.bf16.msra.mxu1 (!%p7026_p9), %v7900_v9 }
 0x5f3   : > { %7372 = vmatprep.subr.bf16.mxu0 (!%p7026_p9), %v7901_v34  ;;  %7394 = vmatprep.subr.bf16.mxu1 (!%p7026_p9), %v7903_v37  ;;  %v5124_v37 = vsub.s32 (!%p7026_p9), 6, %v9225_v51 }
 0x5f6   : > { %7373 = vmatpush3.bf16.msra.mxu0 (!%p7026_p9), %v7902_v36  ;;  %7395 = vmatpush3.bf16.msra.mxu1 (!%p7026_p9), %v7904_v38  ;;  %v5120_v36 = vsub.s32 (!%p7026_p9), 5, %v9225_v51 }
 0x5f7   : > { %7374 = vmatprep.subr.bf16.mxu0 (!%p7026_p9), %v7905_v42  ;;  %7396 = vmatprep.subr.bf16.mxu1 (!%p7026_p9), %v7907_v46 }
 0x5fa   : > { %7375 = vmatpush3.bf16.msra.mxu0 (!%p7026_p9), %v7906_v43  ;;  %7397 = vmatpush3.bf16.msra.mxu1 (!%p7026_p9), %v7908_v47  ;;  %v5128_v43 = vsub.s32 (!%p7026_p9), 7, %v9225_v51 }
 0x5fb   : > { %7376 = vmatprep.subr.bf16.mxu0 (!%p7026_p9), %v7909_v49  ;;  %7398 = vmatprep.subr.bf16.mxu1 (!%p7026_p9), %v7911_v57 }
 0x5fe   : > { %7377 = vmatpush3.bf16.msra.mxu0 (!%p7026_p9), %v7910_v56  ;;  %7399 = vmatpush3.bf16.msra.mxu1 (!%p7026_p9), %v7912_v62 }
 0x5ff   : > { %7378 = vmatprep.subr.bf16.mxu0 (!%p7026_p9), %v7913_v63  ;;  %7400 = vmatprep.subr.bf16.mxu1 (!%p7026_p9), %v7915_v21 }
 0x602   : > { %7379 = vmatpush3.bf16.msra.mxu0 (!%p7026_p9), %v7914_v14  ;;  %7401 = vmatpush3.bf16.msra.mxu1 (!%p7026_p9), %v7916_v25 }
 0x603   : > { %7380 = vmatprep.subr.bf16.mxu0 (!%p7026_p9), %v7917_v8  ;;  %7402 = vmatprep.subr.bf16.mxu1 (!%p7026_p9), %v7919_v40 }
 0x606   : > { %7381 = vmatpush3.bf16.msra.mxu0 (!%p7026_p9), %v7918_v35  ;;  %7403 = vmatpush3.bf16.msra.mxu1 (!%p7026_p9), %v7920_v32 }
 0x607   : > { %7382 = vmatprep.subr.bf16.mxu0 (!%p7026_p9), %v7921_v39  ;;  %7404 = vmatprep.subr.bf16.mxu1 (!%p7026_p9), %v7923_v44 }
 0x60a   : > { %7383 = vmatpush3.bf16.msra.mxu0 (!%p7026_p9), %v7922_v41  ;;  %7405 = vmatpush3.bf16.msra.mxu1 (!%p7026_p9), %v7924_v50 }
 0x60b   : > { %7384 = vmatprep.subr.bf16.mxu0 (!%p7026_p9), %v7925_v55 }
 0x644   : > { %v4789_v30 = vpop.f32.mrb[0].mxu0  ;;  %v4871_v0 = vpop.f32.mrb[0].mxu1 }
 0x645   : > { %v4791_v2 = vpop.f32.mrb[1].mxu0  ;;  %v4873_v4 = vpop.f32.mrb[1].mxu1 }
 0x646   : > { %v5050_v3 = vcombine.low %v4789_v30, %v4791_v2  ;;  %v4793_v53 = vpop.f32.mrb[2].mxu0  ;;  %v5051_v61 = vcombine.low %v4871_v0, %v4873_v4  ;;  %v4875_v1 = vpop.f32.mrb[2].mxu1  ;;  %v7926_v30 = vld [vmem:[#allocation21 + $0x38] sm:$0xff] (!%p7026_p9)   ;;  %v5112_v0 = vsub.s32 (!%p7026_p9), 3, %v9225_v51  ;;  %v9517_v4 = vld [vmem:[#allocation17] sm:$0xff] (!%p7026_p9) }
 0x647   : > { %v4794_v60 = vpop.f32.mrb[3].mxu0  ;;  %v4876_v7 = vpop.f32.mrb[3].mxu1  ;;  %v7927_v2 = vld [vmem:[#allocation21 + $0xf8] sm:$0xff] (!%p7026_p9)   ;;  %7385 = vmatpush3.bf16.msra.mxu0 (!%p7026_p9), %v7926_v30  ;;  %v5168_v53 = vld [vmem:[#allocation18] sm:$0xff] (!%p7026_p9)  ;;  %v5105_v1 = vrot.slane (!%p7026_p9), %v9517_v4, %v5104_v54  ;;  %v5117_v62 = vrot.slane (!%p7026_p9), %v9517_v4, %v5116_v29  ;;  %v5121_v51 = vrot.slane (!%p7026_p9), %v9517_v4, %v5120_v36  ;;  %v5125_v50 = vrot.slane (!%p7026_p9), %v9517_v4, %v5124_v37 }
 0x648   : > { %v5058_v6 = vrot.slane %v5050_v3, %v9233_v58  ;;  %v5065_v11 = vrot.slane %v5051_v61, %v9233_v58  ;;  %v7928_v3 = vld [vmem:[#allocation21 + $0xb8] sm:$0xff] (!%p7026_p9)   ;;  %7406 = vmatprep.subr.bf16.mxu1 (!%p7026_p9), %v7927_v2  ;;  %v5101_v61 = vrot.slane (!%p7026_p9), %v9517_v4, %v5100_v45  ;;  %v5109_v60 = vrot.slane (!%p7026_p9), %v9517_v4, %v5108_v52 }
 0x649   : > { %7407 = vmatpush3.bf16.msra.mxu1 (!%p7026_p9), %v7928_v3  ;;  %v5169_v7 = vld [vmem:[#allocation20] sm:$0xff] (!%p7026_p9)  ;;  %v5517_v46 = vrot.slane (!%p7026_p9), %v5168_v53, %v5116_v29  ;;  %v5521_v49 = vrot.slane (!%p7026_p9), %v5168_v53, %v5120_v36  ;;  %v5525_v56 = vrot.slane (!%p7026_p9), %v5168_v53, %v5124_v37  ;;  %v5529_v63 = vrot.slane (!%p7026_p9), %v5168_v53, %v5128_v43 }
 0x64a   : > { %v5066_v13 = vcombine.low %v5058_v6, %v5065_v11  ;;  %v5113_v6 = vrot.slane (!%p7026_p9), %v9517_v4, %v5112_v0  ;;  %v5501_v11 = vrot.slane (!%p7026_p9), %v5168_v53, %v5100_v45  ;;  %v5588_v14 = vrot.slane (!%p7026_p9), %v5169_v7, %v5116_v29 }
 0x64b   : > { %v5547_v8 = vcombine.low (!%p7026_p9), %v5517_v46, %v5521_v49  ;;  %v5548_v35 = vcombine.low (!%p7026_p9), %v5525_v56, %v5529_v63  ;;  %v5592_v40 = vrot.slane (!%p7026_p9), %v5169_v7, %v5120_v36  ;;  %v5596_v32 = vrot.slane (!%p7026_p9), %v5169_v7, %v5124_v37 }
 0x64c   : > { %v5086_v59 = vadd.f32 %v5066_v13, %v3146_v12  ;;  %v5505_v12 = vrot.slane (!%p7026_p9), %v5168_v53, %v5104_v54  ;;  %v5509_v13 = vrot.slane (!%p7026_p9), %v5168_v53, %v5108_v52  ;;  %v5600_v39 = vrot.slane (!%p7026_p9), %v5169_v7, %v5128_v43 }
 0x64d   : > { %v5555_v55 = vrot.slane (!%p7026_p9), %v5547_v8, %v9233_v58  ;;  %v5618_v30 = vcombine.low (!%p7026_p9), %v5588_v14, %v5592_v40 }
 0x64e   : > { %5088 = vst [vmem:[#allocation3] sm:$0xff] %v5086_v59  ;;  %v5513_v59 = vrot.slane (!%p7026_p9), %v5168_v53, %v5112_v0  ;;  %v5619_v53 = vcombine.low (!%p7026_p9), %v5596_v32, %v5600_v39 }
 0x6c4   : > { %v4953_v15 = vpop.f32.mrb[4].mxu0  ;;  %v5035_v33 = vpop.f32.mrb[4].mxu1 }
 0x6c5   : > { %v4955_v16 = vpop.f32.mrb[5].mxu0  ;;  %v5037_v17 = vpop.f32.mrb[5].mxu1 }
 0x6c6   : > { %v5067_v10 = vcombine.low %v4953_v15, %v4955_v16  ;;  %v4957_v22 = vpop.f32.mrb[6].mxu0  ;;  %v5068_v48 = vcombine.low %v5035_v33, %v5037_v17  ;;  %v5039_v5 = vpop.f32.mrb[6].mxu1  ;;  %v7929_v15 = vld [vmem:[#allocation21 + $0x140] sm:$0xff] (!%p7026_p9)   ;;  %v5130_v33 = vcombine.low (!%p7026_p9), %v5101_v61, %v5105_v1  ;;  %v5131_v16 = vcombine.low (!%p7026_p9), %v5109_v60, %v5113_v6 }
 0x6c7   : > { %v4958_v18 = vpop.f32.mrb[7].mxu0  ;;  %v5040_v20 = vpop.f32.mrb[7].mxu1  ;;  %v5576_v17 = vrot.slane (!%p7026_p9), %v5169_v7, %v5104_v54  ;;  %v5530_v22 = vcombine.low (!%p7026_p9), %v5501_v11, %v5505_v12  ;;  %v5580_v5 = vrot.slane (!%p7026_p9), %v5169_v7, %v5108_v52  ;;  %7414 = vmatprep.subr.bf16.mxu0 (!%p7026_p9), %v7929_v15  ;;  %v5562_v52 = vrot.slane (!%p7026_p9), %v5548_v35, %v9233_v58 }
 0x6c8   : > { %v5075_v19 = vrot.slane %v5067_v10, %v9233_v58  ;;  %v5082_v23 = vrot.slane %v5068_v48, %v9233_v58  ;;  %5093 = sbr.rel (%p7026_p9) target bundleno = 2083 (0x823), region = 136  ;;  %v5572_v10 = vrot.slane (!%p7026_p9), %v5169_v7, %v5100_v45  ;;  %v5531_v48 = vcombine.low (!%p7026_p9), %v5509_v13, %v5513_v59 }
 0x6c9   : > { %v5584_v18 = vrot.slane (!%p7026_p9), %v5169_v7, %v5112_v0  ;;  %v5138_v20 = vrot.slane (!%p7026_p9), %v5130_v33, %v9233_v58  ;;  %v9552_v6 = vcombine.low (!%p7026_p9), %v5555_v55, %v5562_v52  ;;  %v5129_v11 = vrot.slane (!%p7026_p9), %v9517_v4, %v5128_v43 }
 0x6ca   : > { %v5083_v26 = vcombine.low %v5075_v19, %v5082_v23  ;;  %v7931_v19 = vld [vmem:[#allocation21 + $0x1c0] sm:$0xff] (!%p7026_p9)   ;;  %v5145_v23 = vrot.slane (!%p7026_p9), %v5131_v16, %v9233_v58  ;;  %v5545_v31 = vrot.slane (!%p7026_p9), %v5531_v48, %v9233_v58  ;;  %v5626_v12 = vrot.slane (!%p7026_p9), %v5618_v30, %v9233_v58 }
 0x6cb   : > { %v5602_v28 = vcombine.low (!%p7026_p9), %v5580_v5, %v5584_v18  ;;  %7436 = vmatprep.subr.bf16.mxu1 (!%p7026_p9), %v7931_v19  ;;  %v5633_v13 = vrot.slane (!%p7026_p9), %v5619_v53, %v9233_v58  ;;  %v5147_v18 = vcombine.low (!%p7026_p9), %v5117_v62, %v5121_v51  ;;  %v5148_v19 = vcombine.low (!%p7026_p9), %v5125_v50, %v5129_v11 }
 0x6cc   : > { %v5087_v27 = vadd.f32 %v5083_v26, %v3147_v24  ;;  %v5601_v24 = vcombine.low (!%p7026_p9), %v5572_v10, %v5576_v17  ;;  %v5094_v26 = vld [vmem:[#allocation3] sm:$0xff] (!%p7026_p9)  ;;  %v5146_v9 = vcombine.low (!%p7026_p9), %v5138_v20, %v5145_v23 }
 0x6cd   : > { %v5616_v42 = vrot.slane (!%p7026_p9), %v5602_v28, %v9233_v58  ;;  %v9558_v10 = vcombine.low (!%p7026_p9), %v5626_v12, %v5633_v13  ;;  %v5155_v29 = vrot.slane (!%p7026_p9), %v5147_v18, %v9233_v58 }
 0x6ce   : > { %5089 = vst [vmem:[#allocation3 + $0x8] sm:$0xff] %v5087_v27  ;;  %v5538_v27 = vrot.slane (!%p7026_p9), %v5530_v22, %v9233_v58  ;;  %v5609_v34 = vrot.slane (!%p7026_p9), %v5601_v24, %v9233_v58  ;;  %v9535_v47 = vadd.f32 (!%p7026_p9), %v5146_v9, %v5094_v26  ;;  %v5162_v9 = vrot.slane (!%p7026_p9), %v5148_v19, %v9233_v58 }
 0x6d0   : > { %v9531_v38 = vcombine.low %v5538_v27, %v5545_v31  ;;  %v9537_v57 = vcombine.low %v5609_v34, %v5616_v42  ;;  %v5172_v21 = vcombine.high %v9535_v47, %v9535_v47  ;;  %v5179_v25 = vrot.slane %v9535_v47, %v9233_v58 }
 0x6d1   : > { %v5163_v56 = vcombine.low %v5155_v29, %v5162_v9 }
 0x6d2   : > { %v5186_v41 = vrot.slane %v5172_v21, %v9233_v58  ;;  %v5187_v44 = vcombine.high %v5179_v25, %v5179_v25  ;;  %v5215_v45 = vsel %vm5214_vm7, %v5179_v25, 0.0 }
 0x6d3   : > { %v5216_v54 = vrot.slane %v5215_v45, 4 }
 0x6d4   : > { %v5188_v0 = vcombine.high %v5186_v41, %v5186_v41  ;;  %v5222_v2 = vsel %vm5214_vm7, %v5187_v44, 0.0  ;;  %v5229_v3 = vsel %vm5214_vm7, %v5186_v41, 0.0 }
 0x6d5   : > { %v5217_v61 = vadd.f32 %v5216_v54, %v5215_v45  ;;  %v5223_v1 = vrot.slane %v5222_v2, 4  ;;  %v5230_v60 = vrot.slane %v5229_v3, 4  ;;  %v5095_v25 = vld [vmem:[#allocation3 + $0x8] sm:$0xff] }
 0x6d6   : > { %v5236_v7 = vsel %vm5214_vm7, %v5188_v0, 0.0  ;;  %v9563_v51 = vadd.f32 %v5163_v56, %v5095_v25 }
 0x6d7   : > { %v5218_v59 = vrot.slane %v5217_v61, 2  ;;  %v5224_v15 = vadd.f32 %v5223_v1, %v5222_v2  ;;  %v5231_v33 = vadd.f32 %v5230_v60, %v5229_v3  ;;  %v5237_v16 = vrot.slane %v5236_v7, 4 }
 0x6d8   : > { %v5189_v35 = vcombine.high %v9563_v51, %v9563_v51  ;;  %v5196_v40 = vrot.slane %v9563_v51, %v9233_v58 }
 0x6d9   : > { %v5219_v17 = vadd.f32 %v5218_v59, %v5217_v61  ;;  %v5225_v22 = vrot.slane %v5224_v15, 2  ;;  %v5232_v48 = vrot.slane %v5231_v33, 2  ;;  %v5238_v5 = vadd.f32 %v5237_v16, %v5236_v7 }
 0x6da   : > { %v5203_v39 = vrot.slane %v5189_v35, %v9233_v58  ;;  %v5204_v41 = vcombine.high %v5196_v40, %v5196_v40  ;;  %v5243_v44 = vsel %vm5214_vm7, %v5196_v40, 0.0 }
 0x6db   : > { %v5220_v20 = vrot.slane %v5219_v17, 1  ;;  %v5226_v23 = vadd.f32 %v5225_v22, %v5224_v15  ;;  %v5233_v24 = vadd.f32 %v5232_v48, %v5231_v33  ;;  %v5239_v4 = vrot.slane %v5238_v5, 2 }
 0x6dc   : > { %v5244_v50 = vrot.slane %v5243_v44, 4  ;;  %v5205_v54 = vcombine.high %v5203_v39, %v5203_v39  ;;  %v5250_v55 = vsel %vm5214_vm7, %v5204_v41, 0.0  ;;  %v5257_v52 = vsel %vm5214_vm7, %v5203_v39, 0.0 }
 0x6dd   : > { %v5221_v26 = vadd.f32 %v5220_v20, %v5219_v17  ;;  %v5227_v27 = vrot.slane %v5226_v23, 1  ;;  %v5234_v31 = vrot.slane %v5233_v24, 1  ;;  %v5240_v28 = vadd.f32 %v5239_v4, %v5238_v5 }
 0x6de   : > { %v5245_v0 = vadd.f32 %v5244_v50, %v5243_v44  ;;  %v5251_v2 = vrot.slane %v5250_v55, 4  ;;  %v5258_v3 = vrot.slane %v5257_v52, 4  ;;  %v5264_v53 = vsel %vm5214_vm7, %v5205_v54, 0.0 }
 0x6df   : > { %v5228_v34 = vadd.f32 %v5227_v27, %v5226_v23  ;;  %v5235_v36 = vadd.f32 %v5234_v31, %v5233_v24  ;;  %v5241_v37 = vrot.slane %v5240_v28, 1  ;;  %v5271_v42 = vmul.f32 0.5, %v5221_v26 }
 0x6e0   : > { %v5246_v60 = vrot.slane %v5245_v0, 2  ;;  %v5259_v7 = vadd.f32 %v5258_v3, %v5257_v52  ;;  %v5265_v11 = vrot.slane %v5264_v53, 4 }
 0x6e1   : > { %v5242_v43 = vadd.f32 %v5241_v37, %v5240_v28  ;;  %v5272_v46 = vmul.f32 0.5, %v5228_v34  ;;  %v5273_v49 = vmul.f32 0.5, %v5235_v36 }
 0x6e2   : > { %v5247_v15 = vadd.f32 %v5246_v60, %v5245_v0  ;;  %v5260_v17 = vrot.slane %v5259_v7, 2  ;;  %v5266_v22 = vadd.f32 %v5265_v11, %v5264_v53 }
 0x6e3   : > { %v5274_v62 = vmul.f32 0.5, %v5242_v43  ;;  %v5287_v63 = vcombine.low %v5271_v42, %v5272_v46 }
 0x6e4   : > { %v5248_v19 = vrot.slane %v5247_v15, 1  ;;  %v5261_v31 = vadd.f32 %v5260_v17, %v5259_v7  ;;  %v5267_v28 = vrot.slane %v5266_v22, 2 }
 0x6e5   : > { %v5288_v14 = vcombine.low %v5273_v49, %v5274_v62  ;;  %v5295_v21 = vrot.slane %v5287_v63, %v9233_v58 }
 0x6e6   : > { %v5249_v27 = vadd.f32 %v5248_v19, %v5247_v15  ;;  %v5262_v42 = vrot.slane %v5261_v31, 1  ;;  %v5268_v43 = vadd.f32 %v5267_v28, %v5266_v22 }
 0x6e7   : > { %v5302_v8 = vrot.slane %v5288_v14, %v9233_v58 }
 0x6e8   : > { %v5263_v14 = vadd.f32 %v5262_v42, %v5261_v31  ;;  %v5275_v25 = vmul.f32 0.5, %v5249_v27 }
 0x6e9   : > { %v5303_v32 = vcombine.low %v5295_v21, %v5302_v8  ;;  %v5269_v21 = vrot.slane %v5268_v43, 1 }
 0x6ea   : > { %v5277_v44 = vmul.f32 0.5, %v5263_v14 }
 0x6eb   : > { %v9573_v45 = vsub.f32 %v9535_v47, %v5303_v32  ;;  %v5252_v47 = vadd.f32 %v5251_v2, %v5250_v55  ;;  %v5270_v39 = vadd.f32 %v5269_v21, %v5268_v43 }
 0x6ed   : > { %v5325_v30 = vmul.f32 %v9573_v45, %v9573_v45  ;;  %v5253_v16 = vrot.slane %v5252_v47, 2 }
 0x6ef   : > { %v5329_v61 = vcombine.high %v5325_v30, %v5325_v30  ;;  %v5336_v1 = vrot.slane %v5325_v30, %v9233_v58  ;;  %v5254_v4 = vadd.f32 %v5253_v16, %v5252_v47  ;;  %v5278_v30 = vmul.f32 0.5, %v5270_v39 }
 0x6f1   : > { %v5343_v12 = vrot.slane %v5329_v61, %v9233_v58  ;;  %v5344_v13 = vcombine.high %v5336_v1, %v5336_v1  ;;  %v5371_v59 = vsel %vm5214_vm7, %v5336_v1, 0.0  ;;  %v5255_v37 = vrot.slane %v5254_v4, 1 }
 0x6f2   : > { %v5372_v33 = vrot.slane %v5371_v59, 4  ;;  %v5305_v1 = vcombine.low %v5277_v44, %v5278_v30 }
 0x6f3   : > { %v5345_v48 = vcombine.high %v5343_v12, %v5343_v12  ;;  %v5378_v5 = vsel %vm5214_vm7, %v5344_v13, 0.0  ;;  %v5385_v18 = vsel %vm5214_vm7, %v5343_v12, 0.0  ;;  %v5256_v63 = vadd.f32 %v5255_v37, %v5254_v4 }
 0x6f4   : > { %v5373_v20 = vadd.f32 %v5372_v33, %v5371_v59  ;;  %v5379_v23 = vrot.slane %v5378_v5, 4  ;;  %v5386_v24 = vrot.slane %v5385_v18, 4  ;;  %v5319_v13 = vrot.slane %v5305_v1, %v9233_v58 }
 0x6f5   : > { %v5392_v26 = vsel %vm5214_vm7, %v5345_v48, 0.0  ;;  %v5276_v41 = vmul.f32 0.5, %v5256_v63 }
 0x6f6   : > { %v5374_v29 = vrot.slane %v5373_v20, 2  ;;  %v5380_v9 = vadd.f32 %v5379_v23, %v5378_v5  ;;  %v5387_v34 = vadd.f32 %v5386_v24, %v5385_v18  ;;  %v5393_v36 = vrot.slane %v5392_v26, 4 }
 0x6f7   : > { %v5304_v0 = vcombine.low %v5275_v25, %v5276_v41 }
 0x6f8   : > { %v5375_v46 = vadd.f32 %v5374_v29, %v5373_v20  ;;  %v5381_v49 = vrot.slane %v5380_v9, 2  ;;  %v5388_v56 = vrot.slane %v5387_v34, 2  ;;  %v5394_v62 = vadd.f32 %v5393_v36, %v5392_v26 }
 0x6f9   : > { %v5312_v60 = vrot.slane %v5304_v0, %v9233_v58 }
 0x6fa   : > { %v5376_v8 = vrot.slane %v5375_v46, 1  ;;  %v5382_v35 = vadd.f32 %v5381_v49, %v5380_v9  ;;  %v5389_v40 = vadd.f32 %v5388_v56, %v5387_v34  ;;  %v5395_v32 = vrot.slane %v5394_v62, 2 }
 0x6fb   : > { %v5320_v16 = vcombine.low %v5312_v60, %v5319_v13 }
 0x6fc   : > { %v5377_v50 = vadd.f32 %v5376_v8, %v5375_v46  ;;  %v5383_v54 = vrot.slane %v5382_v35, 1  ;;  %v5390_v55 = vrot.slane %v5389_v40, 1  ;;  %v5396_v52 = vadd.f32 %v5395_v32, %v5394_v62 }
 0x6fd   : > { %v9589_v22 = vsub.f32 %v9563_v51, %v5320_v16 }
 0x6fe   : > { %v5384_v2 = vadd.f32 %v5383_v54, %v5382_v35  ;;  %v5391_v3 = vadd.f32 %v5390_v55, %v5389_v40  ;;  %v5397_v53 = vrot.slane %v5396_v52, 1  ;;  %v5427_v61 = vmul.f32 0.5, %v5377_v50 }
 0x6ff   : > { %v5326_v48 = vmul.f32 %v9589_v22, %v9589_v22 }
 0x700   : > { %v5398_v47 = vadd.f32 %v5397_v53, %v5396_v52  ;;  %v5428_v7 = vmul.f32 0.5, %v5384_v2  ;;  %v5429_v11 = vmul.f32 0.5, %v5391_v3  ;;  %v5435_v12 = vadd.f32 1e-05, %v5427_v61 }
 0x701   : > { %v5346_v5 = vcombine.high %v5326_v48, %v5326_v48  ;;  %v5353_v18 = vrot.slane %v5326_v48, %v9233_v58 }
 0x702   : > { %v5430_v59 = vmul.f32 0.5, %v5398_v47  ;;  %v5436_v15 = vadd.f32 1e-05, %v5428_v7  ;;  %v5437_v33 = vadd.f32 1e-05, %v5429_v11  ;;  %7961 = vrsqrt.f32 %v5435_v12 }
 0x703   : > { %v5360_v19 = vrot.slane %v5346_v5, %v9233_v58  ;;  %v5361_v20 = vcombine.high %v5353_v18, %v5353_v18  ;;  %v5399_v23 = vsel %vm5214_vm7, %v5353_v18, 0.0 }
 0x704   : > { %v5438_v17 = vadd.f32 1e-05, %v5430_v59  ;;  %7963 = vrsqrt.f32 %v5436_v15  ;;  %v5400_v4 = vrot.slane %v5399_v23, 4 }
 0x705   : > { %7965 = vrsqrt.f32 %v5437_v33  ;;  %v5362_v26 = vcombine.high %v5360_v19, %v5360_v19  ;;  %v5406_v27 = vsel %vm5214_vm7, %v5361_v20, 0.0  ;;  %v5413_v51 = vsel %vm5214_vm7, %v5360_v19, 0.0 }
 0x706   : > { %7967 = vrsqrt.f32 %v5438_v17  ;;  %v5401_v28 = vadd.f32 %v5400_v4, %v5399_v23  ;;  %v5407_v29 = vrot.slane %v5406_v27, 4  ;;  %v5414_v9 = vrot.slane %v5413_v51, 4  ;;  %v7933_v23 = vld [vmem:[#allocation21 + $0x148] sm:$0xff]  }
 0x707   : > { %v5420_v37 = vsel %vm5214_vm7, %v5362_v26, 0.0  ;;  %v7932_v26 = vld [vmem:[#allocation21 + $0x180] sm:$0xff]  }
 0x708   : > { %v5402_v43 = vrot.slane %v5401_v28, 2  ;;  %v5408_v46 = vadd.f32 %v5407_v29, %v5406_v27  ;;  %v5415_v49 = vadd.f32 %v5414_v9, %v5413_v51  ;;  %v5421_v56 = vrot.slane %v5420_v37, 4  ;;  %v7935_v27 = vld [vmem:[#allocation21 + $0x1c8] sm:$0xff]   ;;  %v7937_v29 = vld [vmem:[#allocation21 + $0x150] sm:$0xff]  }
 0x70a   : > { %v5403_v14 = vadd.f32 %v5402_v43, %v5401_v28  ;;  %v5409_v21 = vrot.slane %v5408_v46, 2  ;;  %v5416_v25 = vrot.slane %v5415_v49, 2  ;;  %v5422_v8 = vadd.f32 %v5421_v56, %v5420_v37  ;;  %v7939_v37 = vld [vmem:[#allocation21 + $0x1d0] sm:$0xff]  }
 0x70c   : > { %v7962_v24 = vpop.eup %7961  ;;  %v5404_v40 = vrot.slane %v5403_v14, 1  ;;  %v5410_v32 = vadd.f32 %v5409_v21, %v5408_v46  ;;  %v5417_v39 = vadd.f32 %v5416_v25, %v5415_v49  ;;  %v5423_v41 = vrot.slane %v5422_v8, 2  ;;  %v7938_v46 = vld [vmem:[#allocation21 + $0x110] sm:$0xff]   ;;  %v7941_v49 = vld [vmem:[#allocation21 + $0x158] sm:$0xff]   ;;  %v7945_v25 = vld [vmem:[#allocation21 + $0x160] sm:$0xff]  }
 0x70d   : > { %v7942_v21 = vld [vmem:[#allocation21 + $0x118] sm:$0xff]  }
 0x70e   : > { %v7964_v31 = vpop.eup %7963  ;;  %v5405_v50 = vadd.f32 %v5404_v40, %v5403_v14  ;;  %v5411_v54 = vrot.slane %v5410_v32, 1  ;;  %v5418_v55 = vrot.slane %v5417_v39, 1  ;;  %v5424_v52 = vadd.f32 %v5423_v41, %v5422_v8  ;;  %v7947_v40 = vld [vmem:[#allocation21 + $0x1e0] sm:$0xff]   ;;  %v7949_v41 = vld [vmem:[#allocation21 + $0x168] sm:$0xff]  }
 0x70f   : > { %v7966_v34 = vpop.eup %7965  ;;  %v5459_v36 = vcombine.low %v7962_v24, %v7964_v31  ;;  %v7934_v31 = vld [vmem:[#allocation21 + $0x108] sm:$0xff]  }
 0x710   : > { %v7968_v42 = vpop.eup %7967  ;;  %v5412_v0 = vadd.f32 %v5411_v54, %v5410_v32  ;;  %v5419_v2 = vadd.f32 %v5418_v55, %v5417_v39  ;;  %v5425_v3 = vrot.slane %v5424_v52, 1  ;;  %v5431_v53 = vmul.f32 0.5, %v5405_v50  ;;  %v7946_v39 = vld [vmem:[#allocation21 + $0x120] sm:$0xff]   ;;  %v7951_v54 = vld [vmem:[#allocation21 + $0x1e8] sm:$0xff]  }
 0x711   : > { %v5460_v62 = vcombine.low %v7966_v34, %v7968_v42  ;;  %v5467_v63 = vrot.slane %v5459_v36, %v9233_v58  ;;  %v7936_v36 = vld [vmem:[#allocation21 + $0x188] sm:$0xff]   ;;  %v7948_v50 = vld [vmem:[#allocation21 + $0x1a0] sm:$0xff]  }
 0x712   : > { %v5426_v1 = vadd.f32 %v5425_v3, %v5424_v52  ;;  %v5432_v60 = vmul.f32 0.5, %v5412_v0  ;;  %v5433_v47 = vmul.f32 0.5, %v5419_v2  ;;  %v5439_v7 = vadd.f32 1e-05, %v5431_v53  ;;  %v7953_v52 = vld [vmem:[#allocation21 + $0x170] sm:$0xff]   ;;  %v7952_v0 = vld [vmem:[#allocation21 + $0x1a8] sm:$0xff]  }
 0x713   : > { %v5474_v35 = vrot.slane %v5460_v62, %v9233_v58  ;;  %v7940_v62 = vld [vmem:[#allocation21 + $0x190] sm:$0xff]  }
 0x714   : > { %v5434_v12 = vmul.f32 0.5, %v5426_v1  ;;  %v5440_v13 = vadd.f32 1e-05, %v5432_v60  ;;  %v5441_v59 = vadd.f32 1e-05, %v5433_v47  ;;  %7969 = vrsqrt.f32 %v5439_v7  ;;  %v7955_v3 = vld [vmem:[#allocation21 + $0x1f0] sm:$0xff]  }
 0x715   : > { %v5475_v44 = vcombine.low %v5467_v63, %v5474_v35  ;;  %v7943_v63 = vld [vmem:[#allocation21 + $0x1d8] sm:$0xff]   ;;  %v7956_v60 = vld [vmem:[#allocation21 + $0x1b0] sm:$0xff]  }
 0x716   : > { %v5442_v33 = vadd.f32 1e-05, %v5434_v12  ;;  %7971 = vrsqrt.f32 %v5440_v13  ;;  %v7944_v35 = vld [vmem:[#allocation21 + $0x198] sm:$0xff]  }
 0x717   : > { %v5495_v30 = vmul.f32 %v5475_v44, %v9573_v45  ;;  %7973 = vrsqrt.f32 %v5441_v59  ;;  %v7957_v1 = vld [vmem:[#allocation21 + $0x178] sm:$0xff]  }
 0x718   : > { %7975 = vrsqrt.f32 %v5442_v33  ;;  %v7958_v12 = vld [vmem:[#allocation21 + $0x138] sm:$0xff]  }
 0x719   : > { %v5566_v61 = vmul.f32 %v9531_v38, %v5495_v30  ;;  %v7960_v59 = vld [vmem:[#allocation21 + $0x1b8] sm:$0xff]  }
 0x71b   : > { %v5637_v11 = vadd.f32 %v9537_v57, %v5566_v61  ;;  %v7930_v57 = vld [vmem:[#allocation21 + $0x100] sm:$0xff]  }
 0x71d   : > { %vm5639_vm8 = vcmp.gt.f32.partialorder %v5637_v11, 0.0  ;;  %v5641_v15 = vmul.f32 0.2, %v5637_v11 }
 0x71e   : > { %v7970_v24 = vpop.eup %7969 }
 0x71f   : > { %v5643_v45 = vsel %vm5639_vm8, %v5637_v11, %v5641_v15  ;;  %v7959_v11 = vld [vmem:[#allocation21 + $0x1f8] sm:$0xff]  }
 0x720   : > { %v5654_v16 = vrot.slane %v5643_v45, %v9233_v58  ;;  %v5647_v17 = vcombine.high %v5643_v45, %v5643_v45  ;;  %v7972_v51 = vpop.eup %7971  ;;  %v7027_v45 = vld [vmem:[#allocation23] ss:$0 sm:$0xff] }
 0x721   : > { %v7974_v28 = vpop.eup %7973  ;;  %v5476_v9 = vcombine.low %v7970_v24, %v7972_v51 }
 0x722   : > { %v5662_v38 = vcombine.high %v5654_v16, %v5654_v16  ;;  %v5661_v48 = vrot.slane %v5647_v17, %v9233_v58  ;;  %v5689_v5 = vpack.c.bf16 %v5654_v16, %v5654_v16  ;;  %v7976_v34 = vpop.eup %7975 }
 0x723   : > { %v5477_v42 = vcombine.low %v7974_v28, %v7976_v34  ;;  %v5484_v43 = vrot.slane %v5476_v9, %v9233_v58 }
 0x724   : > { %v5690_v18 = vpack.c.bf16 %v5662_v38, %v5662_v38  ;;  %v5663_v19 = vcombine.high %v5661_v48, %v5661_v48  ;;  %v5691_v20 = vpack.c.bf16 %v5661_v48, %v5661_v48 }
 0x725   : > { %v5491_v56 = vrot.slane %v5477_v42, %v9233_v58 }
 0x726   : > { %6248 = vmatprep.mubr.bf16.mxu0 %v5690_v18  ;;  %v5692_v4 = vpack.c.bf16 %v5663_v19, %v5663_v19 }
 0x727   : > { %6249 = vmatmul.mubr.bf16.vlgmr.msra.gmra.mrb[0].mxu0 %v5689_v5  ;;  %v5492_v14 = vcombine.low %v5484_v43, %v5491_v56 }
 0x728   : > { %7415 = vmatpush3.bf16.msra.mxu0 %v7930_v57  ;;  %6288 = vmatprep.mubr.bf16.mxu1 %v5692_v4 }
 0x729   : > { %6289 = vmatmul.mubr.bf16.vlgmr.msra.gmra.mrb[0].mxu1 %v5691_v20  ;;  %7416 = vmatprep.subr.bf16.mxu0 %v7933_v23  ;;  %v5496_v8 = vmul.f32 %v5492_v14, %v9589_v22  ;;  %v7950_v22 = vld [vmem:[#allocation21 + $0x128] sm:$0xff]  }
 0x72a   : > { %7437 = vmatpush3.bf16.msra.mxu1 %v7932_v26 }
 0x72b   : > { %7438 = vmatprep.subr.bf16.mxu1 %v7935_v27  ;;  %v5567_v32 = vmul.f32 %v9552_v6, %v5496_v8 }
 0x72c   : > { %7417 = vmatpush3.bf16.msra.mxu0 %v7934_v31 }
 0x72d   : > { %7418 = vmatprep.subr.bf16.mxu0 %v7937_v29  ;;  %v5638_v44 = vadd.f32 %v9558_v10, %v5567_v32  ;;  %v7954_v10 = vld [vmem:[#allocation21 + $0x130] sm:$0xff]  }
 0x72e   : > { %7439 = vmatpush3.bf16.msra.mxu1 %v7936_v36 }
 0x72f   : > { %7440 = vmatprep.subr.bf16.mxu1 %v7939_v37  ;;  %vm5640_vm9 = vcmp.gt.f32.partialorder %v5638_v44, 0.0  ;;  %v5642_v55 = vmul.f32 0.2, %v5638_v44 }
 0x730   : > { %7419 = vmatpush3.bf16.msra.mxu0 %v7938_v46 }
 0x731   : > { %7420 = vmatprep.subr.bf16.mxu0 %v7941_v49  ;;  %v5644_v30 = vsel %vm5640_vm9, %v5638_v44, %v5642_v55 }
 0x732   : > { %7441 = vmatpush3.bf16.msra.mxu1 %v7940_v62  ;;  %v5671_v6 = vrot.slane %v5644_v30, %v9233_v58  ;;  %v5664_v2 = vcombine.high %v5644_v30, %v5644_v30 }
 0x733   : > { %7442 = vmatprep.subr.bf16.mxu1 %v7943_v63 }
 0x734   : > { %7421 = vmatpush3.bf16.msra.mxu0 %v7942_v21  ;;  %v5679_v53 = vcombine.high %v5671_v6, %v5671_v6  ;;  %v5678_v61 = vrot.slane %v5664_v2, %v9233_v58  ;;  %v5693_v15 = vpack.c.bf16 %v5671_v6, %v5671_v6 }
 0x735   : > { %7422 = vmatprep.subr.bf16.mxu0 %v7945_v25 }
 0x736   : > { %7443 = vmatpush3.bf16.msra.mxu1 %v7944_v35  ;;  %v5694_v47 = vpack.c.bf16 %v5679_v53, %v5679_v53  ;;  %v5680_v7 = vcombine.high %v5678_v61, %v5678_v61  ;;  %v5695_v58 = vpack.c.bf16 %v5678_v61, %v5678_v61 }
 0x737   : > { %7444 = vmatprep.subr.bf16.mxu1 %v7947_v40 }
 0x738   : > { %7423 = vmatpush3.bf16.msra.mxu0 %v7946_v39  ;;  %6328 = vmatprep.mubr.bf16.mxu0 %v5694_v47  ;;  %v5696_v13 = vpack.c.bf16 %v5680_v7, %v5680_v7 }
 0x739   : > { %7424 = vmatprep.subr.bf16.mxu0 %v7949_v41 }
 0x73a   : > { %7445 = vmatpush3.bf16.msra.mxu1 %v7948_v50  ;;  %6368 = vmatprep.mubr.bf16.mxu1 %v5696_v13 }
 0x73b   : > { %7446 = vmatprep.subr.bf16.mxu1 %v7951_v54 }
 0x73c   : > { %7425 = vmatpush3.bf16.msra.mxu0 %v7950_v22 }
 0x73d   : > { %7426 = vmatprep.subr.bf16.mxu0 %v7953_v52 }
 0x73e   : > { %7447 = vmatpush3.bf16.msra.mxu1 %v7952_v0 }
 0x73f   : > { %7448 = vmatprep.subr.bf16.mxu1 %v7955_v3 }
 0x740   : > { %7427 = vmatpush3.bf16.msra.mxu0 %v7954_v10 }
 0x741   : > { %7428 = vmatprep.subr.bf16.mxu0 %v7957_v1 }
 0x742   : > { %7449 = vmatpush3.bf16.msra.mxu1 %v7956_v60 }
 0x743   : > { %7450 = vmatprep.subr.bf16.mxu1 %v7959_v11 }
 0x744   : > { %7429 = vmatpush3.bf16.msra.mxu0 %v7958_v12 }
 0x746   : > { %7451 = vmatpush3.bf16.msra.mxu1 %v7960_v59 }
 0x747   : > { %6329 = vmatmul.mubr.bf16.vlgmr.msra.gmra.mrb[4].mxu0 %v5693_v15 }
 0x749   : > { %6369 = vmatmul.mubr.bf16.vlgmr.msra.gmra.mrb[4].mxu1 %v5695_v58 }
 0x7fa   : > { %v7386_v33 = vpop.f32.mrb[0].mxu0 }
 0x7fb   : > { %v7387_v16 = vpop.f32.mrb[1].mxu0 }
 0x7fc   : > { %v7388_v17 = vadd.f32 %v7387_v16, %v7386_v33  ;;  %v7389_v38 = vpop.f32.mrb[2].mxu0  ;;  %v7408_v48 = vpop.f32.mrb[0].mxu1 }
 0x7fd   : > { %v7390_v5 = vpop.f32.mrb[3].mxu0  ;;  %v7409_v18 = vpop.f32.mrb[1].mxu1 }
 0x7fe   : > { %v6251_v57 = vadd.f32 %v7388_v17, %v7027_v45  ;;  %v7410_v19 = vadd.f32 %v7409_v18, %v7408_v48  ;;  %v7411_v20 = vpop.f32.mrb[2].mxu1 }
 0x7ff   : > { %v7412_v23 = vpop.f32.mrb[3].mxu1 }
 0x800   : > { %v6291_v24 = vadd.f32 %v7410_v19, %v6251_v57 }
 0x81a   : > { %v7430_v4 = vpop.f32.mrb[4].mxu0 }
 0x81b   : > { %v7431_v26 = vpop.f32.mrb[5].mxu0 }
 0x81c   : > { %v7432_v27 = vadd.f32 %v7431_v26, %v7430_v4  ;;  %v7433_v51 = vpop.f32.mrb[6].mxu0  ;;  %v7452_v31 = vpop.f32.mrb[4].mxu1 }
 0x81d   : > { %v7434_v28 = vpop.f32.mrb[7].mxu0  ;;  %v7453_v29 = vpop.f32.mrb[5].mxu1 }
 0x81e   : > { %v6331_v9 = vadd.f32 %v7432_v27, %v6291_v24  ;;  %v7454_v34 = vadd.f32 %v7453_v29, %v7452_v31  ;;  %v7455_v36 = vpop.f32.mrb[6].mxu1 }
 0x81f   : > { %v7456_v37 = vpop.f32.mrb[7].mxu1 }
 0x820   : > { %v6371_v42 = vadd.f32 %v7454_v34, %v6331_v9 }
 0x822   : > { %6376 = vst [vmem:[%s9692_s0] sm:$0x3] %v6371_v42 }
 0x823 PF: > { %p30_p3 = scmp.ge.s32.totalorder %s8791_s21, 6   ;;  %s9693_s29 = smov %s8397_s30 }
 0x824   : > { %s9694_s30 = smov %s8401_s15  ;;  %s9695_s15 = smov %s8803_s17 }
 0x825   : > { %s9696_s16 = smov %s8791_s21  ;;  %32 = sbr.rel (!%p30_p3) target bundleno = 16 (0x10), region = 177 }
 0x82c   :  { %6388 = vsyncpa [#allocation5], 1 }
 0x82d   :  { %6390 = vsyncpa [#allocation5 + $0x1], 1 }
 0x82e   :  { %6391 = vsyncpa [#allocation7], 1 }
 0x82f   :  { %6392 = vsyncpa [#allocation10], 1 }
 0x830   :  { %6393 = vsyncpa [#allocation13], 1 }
 0x831   :  { %6394 = vsyncpa [#allocation16], 1 }
 0x832   :  { %6396 = vsyncpa [#allocation16 + $0x1], 1 }
 0x833   :  { %6397 = vsyncpa [#allocation19], 1 }
 0x834   :  { %6398 = vsyncpa [#allocation22], 1 }

</bundles_post_ra>
